<compile_context>
chip_gen: v5e
topology: v5e:2x2
jax: 0.10.0
libtpu: 0.0.40
codegen_flags: <defaults>
</compile_context>

<pallas_src>
import jax
import jax.numpy as jnp
from jax.experimental import pallas as pl
from jax.experimental.pallas import tpu as pltpu


# ----------------------------------------------------------------------------
# In-kernel helper: 3x3 conv from a padded CHW scratch via im2col + one matmul
# ----------------------------------------------------------------------------
def _conv3x3_bn_relu(pad_ref, w_ref, s_ref, b_ref, H, W):
    """pad_ref: (Cin, H+2, W+2) padded activations (VMEM); w_ref: (Cout, 9*Cin);
    s_ref/b_ref: (Cout, 1).  Returns ReLU(conv*scale + bias) as (Cout, H*W)."""
    cin = pad_ref.shape[0]
    taps = []
    for k in range(9):                                    # static unroll
        dy, dx = divmod(k, 3)
        taps.append(pad_ref[:, dy:dy + H, dx:dx + W].reshape(cin, H * W))
    patch = jnp.concatenate(taps, axis=0)                 # (9*Cin, H*W)
    acc = jnp.dot(w_ref[...], patch,
                  preferred_element_type=jnp.float32)     # (Cout, H*W)  lane-dense
    return jnp.maximum(acc * s_ref[...] + b_ref[...], 0.0)


# ----------------------------------------------------------------------------
# Fused kernel: upsample+pad+concat -> (conv3x3 + BN + ReLU) x 2
# ----------------------------------------------------------------------------
def _up_double_conv_kernel(x1_ref, x2_ref, a_ref, bt_ref,
                           w1_ref, s1_ref, b1_ref,
                           w2_ref, s2_ref, b2_ref,
                           o_ref, xpad_ref, hpad_ref):
    # x1_ref: (1, C1, h_in, w_in)    deep features (pre-upsample)
    # x2_ref: (1, C2, H, W)          skip connection
    # a_ref : (H+2, h_in)            row interp matrix (upsample + pads folded)
    # bt_ref: (w_in, W+2)            col interp matrix, transposed
    # w1_ref: (Cout, 9*(C1+C2))      stage-1 conv weights (im2col layout)
    # w2_ref: (Cout, 9*Cout)         stage-2 conv weights
    # s*/b* : (Cout, 1)              folded BN scale / bias
    # o_ref : (1, Cout, H*W)         lane-dense output
    C1 = x1_ref.shape[1]
    C2 = x2_ref.shape[1]
    H, W = x2_ref.shape[2], x2_ref.shape[3]

    # ---- fused conv-pad + concat + bilinear x2 upsample into padded scratch
    xpad_ref[...] = jnp.zeros_like(xpad_ref)
    xpad_ref[0:C2, 1:H + 1, 1:W + 1] = x2_ref[0].astype(jnp.float32)
    a = a_ref[...]
    bt = bt_ref[...]
    for c in range(C1):                                   # C1 is small; static unroll
        col = jnp.dot(x1_ref[0, c].astype(jnp.float32), bt,
                      preferred_element_type=jnp.float32)            # (h_in, W+2)
        xpad_ref[C2 + c, :, :] = jnp.dot(a, col,
                                         preferred_element_type=jnp.float32)

    # ---- stage 1: conv3x3 (single K=9*Cin matmul) + folded BN + ReLU
    h = _conv3x3_bn_relu(xpad_ref, w1_ref, s1_ref, b1_ref, H, W)     # (Cout, H*W)

    # ---- stage 2: intermediate stays in VMEM, re-padded into scratch
    hpad_ref[...] = jnp.zeros_like(hpad_ref)
    hpad_ref[:, 1:H + 1, 1:W + 1] = h.reshape(h.shape[0], H, W)
    y = _conv3x3_bn_relu(hpad_ref, w2_ref, s2_ref, b2_ref, H, W)     # (Cout, H*W)

    o_ref[0] = y.astype(o_ref.dtype)


def _up_pallas(x1, x2, A, BT, w1_2d, s1, b1, w2_2d, s2, b2):
    N, C1, h_in, w_in = x1.shape
    _, C2, H, W = x2.shape
    Cin = C1 + C2
    Cout = w1_2d.shape[0]
    Hp, Wp = H + 2, W + 2

    out_flat = pl.pallas_call(
        _up_double_conv_kernel,
        out_shape=jax.ShapeDtypeStruct((N, Cout, H * W), x2.dtype),
        grid=(N,),
        in_specs=[
            pl.BlockSpec((1, C1, h_in, w_in), lambda n: (n, 0, 0, 0)),
            pl.BlockSpec((1, C2, H, W), lambda n: (n, 0, 0, 0)),
            pl.BlockSpec((Hp, h_in), lambda n: (0, 0)),
            pl.BlockSpec((w_in, Wp), lambda n: (0, 0)),
            pl.BlockSpec((Cout, 9 * Cin), lambda n: (0, 0)),
            pl.BlockSpec((Cout, 1), lambda n: (0, 0)),
            pl.BlockSpec((Cout, 1), lambda n: (0, 0)),
            pl.BlockSpec((Cout, 9 * Cout), lambda n: (0, 0)),
            pl.BlockSpec((Cout, 1), lambda n: (0, 0)),
            pl.BlockSpec((Cout, 1), lambda n: (0, 0)),
        ],
        out_specs=pl.BlockSpec((1, Cout, H * W), lambda n: (n, 0, 0)),
        scratch_shapes=[
            pltpu.VMEM((Cin, Hp, Wp), jnp.float32),   # padded concat(x2, up(x1))
            pltpu.VMEM((Cout, Hp, Wp), jnp.float32),  # padded intermediate h
        ],
        compiler_params=pltpu.CompilerParams(
            dimension_semantics=("parallel",),
            vmem_limit_bytes=48 * 1024 * 1024,
        ),
    )(x1, x2, A, BT, w1_2d, s1, b1, w2_2d, s2, b2)
    return out_flat.reshape(N, Cout, H, W)          # lane-dense -> NCHW (free)


# ----------------------------------------------------------------------------
# Wrapper-side parameter folding / interp matrices
# ----------------------------------------------------------------------------
def _interp_matrix(out_size, in_size):
    """Linear-interp matrix M (out,in) s.t. y = M @ x, align_corners=True."""
    if in_size == 1:
        return jnp.ones((out_size, 1), jnp.float32)
    src = jnp.arange(out_size, dtype=jnp.float32) * (in_size - 1) / (out_size - 1)
    i0 = jnp.clip(jnp.floor(src).astype(jnp.int32), 0, in_size - 2)
    w1 = src - i0.astype(jnp.float32)
    M = jnp.zeros((out_size, in_size), jnp.float32)
    rows = jnp.arange(out_size)
    M = M.at[rows, i0].add(1.0 - w1)
    M = M.at[rows, i0 + 1].add(w1)
    return M


def _axis_matrix(out_size, pad_before, in_size):
    """(out_size+2, in_size) matrix folding x2 upsample, F.pad offset and the
    3x3-conv zero pad (1 px each side) along one spatial axis."""
    M = _interp_matrix(2 * in_size, in_size)
    A = jnp.zeros((out_size + 2, in_size), jnp.float32)
    return A.at[1 + pad_before:1 + pad_before + 2 * in_size, :].set(M)


def _fold_bn(conv_bias, gamma, beta, mean, var, eps=1e-5):
    scale = gamma / jnp.sqrt(var + eps)
    bias = (conv_bias - mean) * scale + beta
    return scale, bias


def _w_to_2d(w_oihw):
    # (Cout, Cin, 3, 3) -> (Cout, 3, 3, Cin) -> (Cout, 9*Cin); column = k*Cin+i
    cout, cin = w_oihw.shape[0], w_oihw.shape[1]
    return jnp.transpose(w_oihw, (0, 2, 3, 1)).reshape(cout, 9 * cin)


def up_forward(params, x1_nchw, x2_nchw, eps=1e-5):
    """Equivalent of up(in_ch, out_ch, bilinear=True).forward(x1, x2). NCHW in/out."""
    _, C1, h_in, w_in = x1_nchw.shape
    _, C2, H, W = x2_nchw.shape
    Cout = params["w1"].shape[0]

    diffY = H - 2 * h_in
    diffX = W - 2 * w_in
    A = _axis_matrix(H, diffY // 2, h_in)            # (H+2, h_in)
    BT = _axis_matrix(W, diffX // 2, w_in).T         # (w_in, W+2)

    s1, b1 = _fold_bn(params["b1"], params["bn1_g"], params["bn1_b"],
                      params["bn1_m"], params["bn1_v"], eps)
    s2, b2 = _fold_bn(params["b2"], params["bn2_g"], params["bn2_b"],
                      params["bn2_m"], params["bn2_v"], eps)

    return _up_pallas(
        x1_nchw, x2_nchw, A, BT,
        _w_to_2d(params["w1"]).astype(jnp.float32),
        s1.reshape(Cout, 1).astype(jnp.float32), b1.reshape(Cout, 1).astype(jnp.float32),
        _w_to_2d(params["w2"]).astype(jnp.float32),
        s2.reshape(Cout, 1).astype(jnp.float32), b2.reshape(Cout, 1).astype(jnp.float32))


# ----------------------------------------------------------------------------
# Pure-JAX reference (upsample via interp matrices + lax.conv) for sanity check
# ----------------------------------------------------------------------------
def _ref_conv_bn_relu(x_nhwc, w_oihw, conv_b, g, b, m, v, eps=1e-5):
    w_hwio = jnp.transpose(w_oihw, (2, 3, 1, 0))
    y = jax.lax.conv_general_dilated(
        x_nhwc, w_hwio, window_strides=(1, 1), padding="SAME",
        dimension_numbers=("NHWC", "HWIO", "NHWC")) + conv_b
    scale = g / jnp.sqrt(v + eps)
    return jnp.maximum((y - m) * scale + b, 0.0)


def _ref_up(params, x1_nchw, x2_nchw):
    _, _, h_in, w_in = x1_nchw.shape
    Mh = _interp_matrix(2 * h_in, h_in)
    Mw = _interp_matrix(2 * w_in, w_in)
    x1u = jnp.einsum("Hh,nchw,Ww->ncHW", Mh, x1_nchw, Mw)
    diffY = x2_nchw.shape[2] - x1u.shape[2]
    diffX = x2_nchw.shape[3] - x1u.shape[3]
    x1u = jnp.pad(x1u, ((0, 0), (0, 0),
                        (diffY // 2, diffY - diffY // 2),
                        (diffX // 2, diffX - diffX // 2)))
    x = jnp.concatenate([x2_nchw, x1u], axis=1)
    x = jnp.transpose(x, (0, 2, 3, 1))
    h = _ref_conv_bn_relu(x, params["w1"], params["b1"], params["bn1_g"],
                          params["bn1_b"], params["bn1_m"], params["bn1_v"])
    y = _ref_conv_bn_relu(h, params["w2"], params["b2"], params["bn2_g"],
                          params["bn2_b"], params["bn2_m"], params["bn2_v"])
    return jnp.transpose(y, (0, 3, 1, 2))


if __name__ == "__main__":
    # up(in_ch=8, out_ch=4, bilinear=True); x1 is the deeper (half-res) map.
    in_ch, out_ch = 8, 4
    N, H2, W2 = 2, 16, 16
    key = jax.random.PRNGKey(0)
    ks = jax.random.split(key, 12)

    x1 = jax.random.normal(ks[0], (N, in_ch // 2, H2 // 2, W2 // 2), jnp.float32)
    x2 = jax.random.normal(ks[1], (N, in_ch // 2, H2, W2), jnp.float32)

    params = dict(
        w1=0.2 * jax.random.normal(ks[2], (out_ch, in_ch, 3, 3), jnp.float32),
        b1=0.1 * jax.random.normal(ks[3], (out_ch,), jnp.float32),
        bn1_g=1.0 + 0.1 * jax.random.normal(ks[4], (out_ch,), jnp.float32),
        bn1_b=0.1 * jax.random.normal(ks[5], (out_ch,), jnp.float32),
        bn1_m=0.1 * jax.random.normal(ks[6], (out_ch,), jnp.float32),
        bn1_v=1.0 + 0.1 * jnp.abs(jax.random.normal(ks[7], (out_ch,), jnp.float32)),
        w2=0.2 * jax.random.normal(ks[8], (out_ch, out_ch, 3, 3), jnp.float32),
        b2=0.1 * jax.random.normal(ks[9], (out_ch,), jnp.float32),
        bn2_g=1.0 + 0.1 * jax.random.normal(ks[10], (out_ch,), jnp.float32),
        bn2_b=0.1 * jax.random.normal(ks[11], (out_ch,), jnp.float32),
        bn2_m=jnp.zeros((out_ch,), jnp.float32),
        bn2_v=jnp.ones((out_ch,), jnp.float32),
    )

    out = jax.jit(up_forward)(params, x1, x2)
    out = jax.block_until_ready(out)
    assert out.shape == (N, out_ch, H2, W2), out.shape

    ref = _ref_up(params, x1, x2)
    err = float(jnp.max(jnp.abs(out - ref)))
    assert err < 5e-4, err

    print("KERNEL_OK")
</pallas_src>

<mosaic_0001>
module attributes {stable_mosaic.version = 11 : i64} {
  func.func @_up_double_conv_kernel(%arg0: i32, %arg1: memref<1x4x8x8xf32, #tpu.memory_space<vmem>>, %arg2: memref<1x4x16x16xf32, #tpu.memory_space<vmem>>, %arg3: memref<18x8xf32, #tpu.memory_space<vmem>>, %arg4: memref<8x18xf32, #tpu.memory_space<vmem>>, %arg5: memref<4x72xf32, #tpu.memory_space<vmem>>, %arg6: memref<4x1xf32, #tpu.memory_space<vmem>>, %arg7: memref<4x1xf32, #tpu.memory_space<vmem>>, %arg8: memref<4x36xf32, #tpu.memory_space<vmem>>, %arg9: memref<4x1xf32, #tpu.memory_space<vmem>>, %arg10: memref<4x1xf32, #tpu.memory_space<vmem>>, %arg11: memref<1x4x256xf32, #tpu.memory_space<vmem>>, %arg12: memref<8x18x18xf32, #tpu.memory_space<vmem>>, %arg13: memref<4x18x18xf32, #tpu.memory_space<vmem>>) attributes {dimension_semantics = [#tpu.dimension_semantics<parallel>], iteration_bounds = array<i64: 2>, scalar_prefetch = 0 : i64, scratch_operands = 2 : i64, tpu.core_type = #tpu.core_type<tc>, window_params = [{transform_indices = @transform_0, window_bounds = array<i64: 1, 4, 8, 8>}, {transform_indices = @transform_1, window_bounds = array<i64: 1, 4, 16, 16>}, {pipeline_mode = #tpu.pipeline_mode<synchronous>, transform_indices = @transform_2, window_bounds = array<i64: 18, 8>}, {pipeline_mode = #tpu.pipeline_mode<synchronous>, transform_indices = @transform_3, window_bounds = array<i64: 8, 18>}, {pipeline_mode = #tpu.pipeline_mode<synchronous>, transform_indices = @transform_4, window_bounds = array<i64: 4, 72>}, {pipeline_mode = #tpu.pipeline_mode<synchronous>, transform_indices = @transform_5, window_bounds = array<i64: 4, 1>}, {pipeline_mode = #tpu.pipeline_mode<synchronous>, transform_indices = @transform_6, window_bounds = array<i64: 4, 1>}, {pipeline_mode = #tpu.pipeline_mode<synchronous>, transform_indices = @transform_7, window_bounds = array<i64: 4, 36>}, {pipeline_mode = #tpu.pipeline_mode<synchronous>, transform_indices = @transform_8, window_bounds = array<i64: 4, 1>}, {pipeline_mode = #tpu.pipeline_mode<synchronous>, transform_indices = @transform_9, window_bounds = array<i64: 4, 1>}, {transform_indices = @transform_10, window_bounds = array<i64: 1, 4, 256>}]} {
    %cst = arith.constant 0.000000e+00 : f32
    %0 = vector.broadcast %cst : f32 to vector<8x18x18xf32>
    %c0 = arith.constant 0 : index
    %c0_0 = arith.constant 0 : index
    %c0_1 = arith.constant 0 : index
    %1 = vector.load %arg12[%c0, %c0_0, %c0_1] : memref<8x18x18xf32, #tpu.memory_space<vmem>>, vector<8x18x18xf32>
    tpu.vector_store %arg12[%c0, %c0_0, %c0_1], %0 {strides = array<i32>} : memref<8x18x18xf32, #tpu.memory_space<vmem>>, vector<8x18x18xf32>,
    %c0_2 = arith.constant 0 : index
    %c0_3 = arith.constant 0 : index
    %c0_4 = arith.constant 0 : index
    %c0_5 = arith.constant 0 : index
    %2 = vector.load %arg2[%c0_2, %c0_3, %c0_4, %c0_5] : memref<1x4x16x16xf32, #tpu.memory_space<vmem>>, vector<1x4x16x16xf32>
    %3 = vector.shape_cast %2 : vector<1x4x16x16xf32> to vector<4x16x16xf32>
    %c0_6 = arith.constant 0 : index
    %c1 = arith.constant 1 : index
    %c1_7 = arith.constant 1 : index
    %4 = vector.load %arg12[%c0_6, %c1, %c1_7] : memref<8x18x18xf32, #tpu.memory_space<vmem>>, vector<4x16x16xf32>
    tpu.vector_store %arg12[%c0_6, %c1, %c1_7], %3 {strides = array<i32>} : memref<8x18x18xf32, #tpu.memory_space<vmem>>, vector<4x16x16xf32>,
    %c0_8 = arith.constant 0 : index
    %c0_9 = arith.constant 0 : index
    %5 = vector.load %arg3[%c0_8, %c0_9] : memref<18x8xf32, #tpu.memory_space<vmem>>, vector<18x8xf32>
    %c0_10 = arith.constant 0 : index
    %c0_11 = arith.constant 0 : index
    %6 = vector.load %arg4[%c0_10, %c0_11] : memref<8x18xf32, #tpu.memory_space<vmem>>, vector<8x18xf32>
    %c0_12 = arith.constant 0 : index
    %c0_13 = arith.constant 0 : index
    %c0_14 = arith.constant 0 : index
    %c0_15 = arith.constant 0 : index
    %7 = vector.load %arg1[%c0_12, %c0_13, %c0_14, %c0_15] : memref<1x4x8x8xf32, #tpu.memory_space<vmem>>, vector<1x1x8x8xf32>
    %8 = vector.shape_cast %7 : vector<1x1x8x8xf32> to vector<8x8xf32>
    %cst_16 = arith.constant dense<0.000000e+00> : vector<8x18xf32>
    %9 = tpu.matmul %8, %6, %cst_16 {dimension_numbers = #tpu.dot_dimension_numbers<[1], [0], [0], [1], [0, 0, 1, 1], [], []>} : vector<8x8xf32>, vector<8x18xf32>, vector<8x18xf32> -> vector<8x18xf32>
    %cst_17 = arith.constant dense<0.000000e+00> : vector<18x18xf32>
    %10 = tpu.matmul %5, %9, %cst_17 {dimension_numbers = #tpu.dot_dimension_numbers<[1], [0], [0], [1], [0, 0, 1, 1], [], []>} : vector<18x8xf32>, vector<8x18xf32>, vector<18x18xf32> -> vector<18x18xf32>
    %c4 = arith.constant 4 : index
    %c0_18 = arith.constant 0 : index
    %c0_19 = arith.constant 0 : index
    %11 = vector.load %arg12[%c4, %c0_18, %c0_19] : memref<8x18x18xf32, #tpu.memory_space<vmem>>, vector<1x18x18xf32>
    %12 = vector.shape_cast %11 : vector<1x18x18xf32> to vector<18x18xf32>
    %13 = vector.shape_cast %10 : vector<18x18xf32> to vector<1x18x18xf32>
    tpu.vector_store %arg12[%c4, %c0_18, %c0_19], %13 {strides = array<i32>} : memref<8x18x18xf32, #tpu.memory_space<vmem>>, vector<1x18x18xf32>,
    %c0_20 = arith.constant 0 : index
    %c1_21 = arith.constant 1 : index
    %c0_22 = arith.constant 0 : index
    %c0_23 = arith.constant 0 : index
    %14 = vector.load %arg1[%c0_20, %c1_21, %c0_22, %c0_23] : memref<1x4x8x8xf32, #tpu.memory_space<vmem>>, vector<1x1x8x8xf32>
    %15 = vector.shape_cast %14 : vector<1x1x8x8xf32> to vector<8x8xf32>
    %cst_24 = arith.constant dense<0.000000e+00> : vector<8x18xf32>
    %16 = tpu.matmul %15, %6, %cst_24 {dimension_numbers = #tpu.dot_dimension_numbers<[1], [0], [0], [1], [0, 0, 1, 1], [], []>} : vector<8x8xf32>, vector<8x18xf32>, vector<8x18xf32> -> vector<8x18xf32>
    %cst_25 = arith.constant dense<0.000000e+00> : vector<18x18xf32>
    %17 = tpu.matmul %5, %16, %cst_25 {dimension_numbers = #tpu.dot_dimension_numbers<[1], [0], [0], [1], [0, 0, 1, 1], [], []>} : vector<18x8xf32>, vector<8x18xf32>, vector<18x18xf32> -> vector<18x18xf32>
    %c5 = arith.constant 5 : index
    %c0_26 = arith.constant 0 : index
    %c0_27 = arith.constant 0 : index
    %18 = vector.load %arg12[%c5, %c0_26, %c0_27] : memref<8x18x18xf32, #tpu.memory_space<vmem>>, vector<1x18x18xf32>
    %19 = vector.shape_cast %18 : vector<1x18x18xf32> to vector<18x18xf32>
    %20 = vector.shape_cast %17 : vector<18x18xf32> to vector<1x18x18xf32>
    tpu.vector_store %arg12[%c5, %c0_26, %c0_27], %20 {strides = array<i32>} : memref<8x18x18xf32, #tpu.memory_space<vmem>>, vector<1x18x18xf32>,
    %c0_28 = arith.constant 0 : index
    %c2 = arith.constant 2 : index
    %c0_29 = arith.constant 0 : index
    %c0_30 = arith.constant 0 : index
    %21 = vector.load %arg1[%c0_28, %c2, %c0_29, %c0_30] : memref<1x4x8x8xf32, #tpu.memory_space<vmem>>, vector<1x1x8x8xf32>
    %22 = vector.shape_cast %21 : vector<1x1x8x8xf32> to vector<8x8xf32>
    %cst_31 = arith.constant dense<0.000000e+00> : vector<8x18xf32>
    %23 = tpu.matmul %22, %6, %cst_31 {dimension_numbers = #tpu.dot_dimension_numbers<[1], [0], [0], [1], [0, 0, 1, 1], [], []>} : vector<8x8xf32>, vector<8x18xf32>, vector<8x18xf32> -> vector<8x18xf32>
    %cst_32 = arith.constant dense<0.000000e+00> : vector<18x18xf32>
    %24 = tpu.matmul %5, %23, %cst_32 {dimension_numbers = #tpu.dot_dimension_numbers<[1], [0], [0], [1], [0, 0, 1, 1], [], []>} : vector<18x8xf32>, vector<8x18xf32>, vector<18x18xf32> -> vector<18x18xf32>
    %c6 = arith.constant 6 : index
    %c0_33 = arith.constant 0 : index
    %c0_34 = arith.constant 0 : index
    %25 = vector.load %arg12[%c6, %c0_33, %c0_34] : memref<8x18x18xf32, #tpu.memory_space<vmem>>, vector<1x18x18xf32>
    %26 = vector.shape_cast %25 : vector<1x18x18xf32> to vector<18x18xf32>
    %27 = vector.shape_cast %24 : vector<18x18xf32> to vector<1x18x18xf32>
    tpu.vector_store %arg12[%c6, %c0_33, %c0_34], %27 {strides = array<i32>} : memref<8x18x18xf32, #tpu.memory_space<vmem>>, vector<1x18x18xf32>,
    %c0_35 = arith.constant 0 : index
    %c3 = arith.constant 3 : index
    %c0_36 = arith.constant 0 : index
    %c0_37 = arith.constant 0 : index
    %28 = vector.load %arg1[%c0_35, %c3, %c0_36, %c0_37] : memref<1x4x8x8xf32, #tpu.memory_space<vmem>>, vector<1x1x8x8xf32>
    %29 = vector.shape_cast %28 : vector<1x1x8x8xf32> to vector<8x8xf32>
    %cst_38 = arith.constant dense<0.000000e+00> : vector<8x18xf32>
    %30 = tpu.matmul %29, %6, %cst_38 {dimension_numbers = #tpu.dot_dimension_numbers<[1], [0], [0], [1], [0, 0, 1, 1], [], []>} : vector<8x8xf32>, vector<8x18xf32>, vector<8x18xf32> -> vector<8x18xf32>
    %cst_39 = arith.constant dense<0.000000e+00> : vector<18x18xf32>
    %31 = tpu.matmul %5, %30, %cst_39 {dimension_numbers = #tpu.dot_dimension_numbers<[1], [0], [0], [1], [0, 0, 1, 1], [], []>} : vector<18x8xf32>, vector<8x18xf32>, vector<18x18xf32> -> vector<18x18xf32>
    %c7 = arith.constant 7 : index
    %c0_40 = arith.constant 0 : index
    %c0_41 = arith.constant 0 : index
    %32 = vector.load %arg12[%c7, %c0_40, %c0_41] : memref<8x18x18xf32, #tpu.memory_space<vmem>>, vector<1x18x18xf32>
    %33 = vector.shape_cast %32 : vector<1x18x18xf32> to vector<18x18xf32>
    %34 = vector.shape_cast %31 : vector<18x18xf32> to vector<1x18x18xf32>
    tpu.vector_store %arg12[%c7, %c0_40, %c0_41], %34 {strides = array<i32>} : memref<8x18x18xf32, #tpu.memory_space<vmem>>, vector<1x18x18xf32>,
    %c0_42 = arith.constant 0 : index
    %c0_43 = arith.constant 0 : index
    %c0_44 = arith.constant 0 : index
    %35 = vector.load %arg12[%c0_42, %c0_43, %c0_44] : memref<8x18x18xf32, #tpu.memory_space<vmem>>, vector<8x16x16xf32>
    %36 = vector.shape_cast %35 : vector<8x16x16xf32> to vector<8x256xf32>
    %c0_45 = arith.constant 0 : index
    %c0_46 = arith.constant 0 : index
    %c1_47 = arith.constant 1 : index
    %37 = vector.load %arg12[%c0_45, %c0_46, %c1_47] : memref<8x18x18xf32, #tpu.memory_space<vmem>>, vector<8x16x16xf32>
    %38 = vector.shape_cast %37 : vector<8x16x16xf32> to vector<8x256xf32>
    %c0_48 = arith.constant 0 : index
    %c0_49 = arith.constant 0 : index
    %c2_50 = arith.constant 2 : index
    %39 = vector.load %arg12[%c0_48, %c0_49, %c2_50] : memref<8x18x18xf32, #tpu.memory_space<vmem>>, vector<8x16x16xf32>
    %40 = vector.shape_cast %39 : vector<8x16x16xf32> to vector<8x256xf32>
    %c0_51 = arith.constant 0 : index
    %c1_52 = arith.constant 1 : index
    %c0_53 = arith.constant 0 : index
    %41 = vector.load %arg12[%c0_51, %c1_52, %c0_53] : memref<8x18x18xf32, #tpu.memory_space<vmem>>, vector<8x16x16xf32>
    %42 = vector.shape_cast %41 : vector<8x16x16xf32> to vector<8x256xf32>
    %c0_54 = arith.constant 0 : index
    %c1_55 = arith.constant 1 : index
    %c1_56 = arith.constant 1 : index
    %43 = vector.load %arg12[%c0_54, %c1_55, %c1_56] : memref<8x18x18xf32, #tpu.memory_space<vmem>>, vector<8x16x16xf32>
    %44 = vector.shape_cast %43 : vector<8x16x16xf32> to vector<8x256xf32>
    %c0_57 = arith.constant 0 : index
    %c1_58 = arith.constant 1 : index
    %c2_59 = arith.constant 2 : index
    %45 = vector.load %arg12[%c0_57, %c1_58, %c2_59] : memref<8x18x18xf32, #tpu.memory_space<vmem>>, vector<8x16x16xf32>
    %46 = vector.shape_cast %45 : vector<8x16x16xf32> to vector<8x256xf32>
    %c0_60 = arith.constant 0 : index
    %c2_61 = arith.constant 2 : index
    %c0_62 = arith.constant 0 : index
    %47 = vector.load %arg12[%c0_60, %c2_61, %c0_62] : memref<8x18x18xf32, #tpu.memory_space<vmem>>, vector<8x16x16xf32>
    %48 = vector.shape_cast %47 : vector<8x16x16xf32> to vector<8x256xf32>
    %c0_63 = arith.constant 0 : index
    %c2_64 = arith.constant 2 : index
    %c1_65 = arith.constant 1 : index
    %49 = vector.load %arg12[%c0_63, %c2_64, %c1_65] : memref<8x18x18xf32, #tpu.memory_space<vmem>>, vector<8x16x16xf32>
    %50 = vector.shape_cast %49 : vector<8x16x16xf32> to vector<8x256xf32>
    %c0_66 = arith.constant 0 : index
    %c2_67 = arith.constant 2 : index
    %c2_68 = arith.constant 2 : index
    %51 = vector.load %arg12[%c0_66, %c2_67, %c2_68] : memref<8x18x18xf32, #tpu.memory_space<vmem>>, vector<8x16x16xf32>
    %52 = vector.shape_cast %51 : vector<8x16x16xf32> to vector<8x256xf32>
    %53 = tpu.concatenate %36, %38, %40, %42, %44, %46, %48, %50, %52 in 0 : vector<8x256xf32>, vector<8x256xf32>, vector<8x256xf32>, vector<8x256xf32>, vector<8x256xf32>, vector<8x256xf32>, vector<8x256xf32>, vector<8x256xf32>, vector<8x256xf32> -> vector<72x256xf32>
    %c0_69 = arith.constant 0 : index
    %c0_70 = arith.constant 0 : index
    %54 = vector.load %arg5[%c0_69, %c0_70] : memref<4x72xf32, #tpu.memory_space<vmem>>, vector<4x72xf32>
    %cst_71 = arith.constant dense<0.000000e+00> : vector<4x256xf32>
    %55 = tpu.matmul %54, %53, %cst_71 {dimension_numbers = #tpu.dot_dimension_numbers<[1], [0], [0], [1], [0, 0, 1, 1], [], []>} : vector<4x72xf32>, vector<72x256xf32>, vector<4x256xf32> -> vector<4x256xf32>
    %c0_72 = arith.constant 0 : index
    %c0_73 = arith.constant 0 : index
    %56 = vector.load %arg6[%c0_72, %c0_73] : memref<4x1xf32, #tpu.memory_space<vmem>>, vector<4x1xf32>
    %57 = vector.broadcast %56 : vector<4x1xf32> to vector<4x256xf32>
    %58 = arith.mulf %55, %57 : vector<4x256xf32>
    %c0_74 = arith.constant 0 : index
    %c0_75 = arith.constant 0 : index
    %59 = vector.load %arg7[%c0_74, %c0_75] : memref<4x1xf32, #tpu.memory_space<vmem>>, vector<4x1xf32>
    %60 = vector.broadcast %59 : vector<4x1xf32> to vector<4x256xf32>
    %61 = arith.addf %58, %60 : vector<4x256xf32>
    %cst_76 = arith.constant 0.000000e+00 : f32
    %62 = vector.broadcast %cst_76 : f32 to vector<4x256xf32>
    %63 = arith.maximumf %61, %62 : vector<4x256xf32>
    %cst_77 = arith.constant 0.000000e+00 : f32
    %64 = vector.broadcast %cst_77 : f32 to vector<4x18x18xf32>
    %c0_78 = arith.constant 0 : index
    %c0_79 = arith.constant 0 : index
    %c0_80 = arith.constant 0 : index
    %65 = vector.load %arg13[%c0_78, %c0_79, %c0_80] : memref<4x18x18xf32, #tpu.memory_space<vmem>>, vector<4x18x18xf32>
    tpu.vector_store %arg13[%c0_78, %c0_79, %c0_80], %64 {strides = array<i32>} : memref<4x18x18xf32, #tpu.memory_space<vmem>>, vector<4x18x18xf32>,
    %66 = vector.shape_cast %63 : vector<4x256xf32> to vector<4x16x16xf32>
    %c0_81 = arith.constant 0 : index
    %c1_82 = arith.constant 1 : index
    %c1_83 = arith.constant 1 : index
    %67 = vector.load %arg13[%c0_81, %c1_82, %c1_83] : memref<4x18x18xf32, #tpu.memory_space<vmem>>, vector<4x16x16xf32>
    tpu.vector_store %arg13[%c0_81, %c1_82, %c1_83], %66 {strides = array<i32>} : memref<4x18x18xf32, #tpu.memory_space<vmem>>, vector<4x16x16xf32>,
    %c0_84 = arith.constant 0 : index
    %c0_85 = arith.constant 0 : index
    %c0_86 = arith.constant 0 : index
    %68 = vector.load %arg13[%c0_84, %c0_85, %c0_86] : memref<4x18x18xf32, #tpu.memory_space<vmem>>, vector<4x16x16xf32>
    %69 = vector.shape_cast %68 : vector<4x16x16xf32> to vector<4x256xf32>
    %c0_87 = arith.constant 0 : index
    %c0_88 = arith.constant 0 : index
    %c1_89 = arith.constant 1 : index
    %70 = vector.load %arg13[%c0_87, %c0_88, %c1_89] : memref<4x18x18xf32, #tpu.memory_space<vmem>>, vector<4x16x16xf32>
    %71 = vector.shape_cast %70 : vector<4x16x16xf32> to vector<4x256xf32>
    %c0_90 = arith.constant 0 : index
    %c0_91 = arith.constant 0 : index
    %c2_92 = arith.constant 2 : index
    %72 = vector.load %arg13[%c0_90, %c0_91, %c2_92] : memref<4x18x18xf32, #tpu.memory_space<vmem>>, vector<4x16x16xf32>
    %73 = vector.shape_cast %72 : vector<4x16x16xf32> to vector<4x256xf32>
    %c0_93 = arith.constant 0 : index
    %c1_94 = arith.constant 1 : index
    %c0_95 = arith.constant 0 : index
    %74 = vector.load %arg13[%c0_93, %c1_94, %c0_95] : memref<4x18x18xf32, #tpu.memory_space<vmem>>, vector<4x16x16xf32>
    %75 = vector.shape_cast %74 : vector<4x16x16xf32> to vector<4x256xf32>
    %c0_96 = arith.constant 0 : index
    %c1_97 = arith.constant 1 : index
    %c1_98 = arith.constant 1 : index
    %76 = vector.load %arg13[%c0_96, %c1_97, %c1_98] : memref<4x18x18xf32, #tpu.memory_space<vmem>>, vector<4x16x16xf32>
    %77 = vector.shape_cast %76 : vector<4x16x16xf32> to vector<4x256xf32>
    %c0_99 = arith.constant 0 : index
    %c1_100 = arith.constant 1 : index
    %c2_101 = arith.constant 2 : index
    %78 = vector.load %arg13[%c0_99, %c1_100, %c2_101] : memref<4x18x18xf32, #tpu.memory_space<vmem>>, vector<4x16x16xf32>
    %79 = vector.shape_cast %78 : vector<4x16x16xf32> to vector<4x256xf32>
    %c0_102 = arith.constant 0 : index
    %c2_103 = arith.constant 2 : index
    %c0_104 = arith.constant 0 : index
    %80 = vector.load %arg13[%c0_102, %c2_103, %c0_104] : memref<4x18x18xf32, #tpu.memory_space<vmem>>, vector<4x16x16xf32>
    %81 = vector.shape_cast %80 : vector<4x16x16xf32> to vector<4x256xf32>
    %c0_105 = arith.constant 0 : index
    %c2_106 = arith.constant 2 : index
    %c1_107 = arith.constant 1 : index
    %82 = vector.load %arg13[%c0_105, %c2_106, %c1_107] : memref<4x18x18xf32, #tpu.memory_space<vmem>>, vector<4x16x16xf32>
    %83 = vector.shape_cast %82 : vector<4x16x16xf32> to vector<4x256xf32>
    %c0_108 = arith.constant 0 : index
    %c2_109 = arith.constant 2 : index
    %c2_110 = arith.constant 2 : index
    %84 = vector.load %arg13[%c0_108, %c2_109, %c2_110] : memref<4x18x18xf32, #tpu.memory_space<vmem>>, vector<4x16x16xf32>
    %85 = vector.shape_cast %84 : vector<4x16x16xf32> to vector<4x256xf32>
    %86 = tpu.concatenate %69, %71, %73, %75, %77, %79, %81, %83, %85 in 0 : vector<4x256xf32>, vector<4x256xf32>, vector<4x256xf32>, vector<4x256xf32>, vector<4x256xf32>, vector<4x256xf32>, vector<4x256xf32>, vector<4x256xf32>, vector<4x256xf32> -> vector<36x256xf32>
    %c0_111 = arith.constant 0 : index
    %c0_112 = arith.constant 0 : index
    %87 = vector.load %arg8[%c0_111, %c0_112] : memref<4x36xf32, #tpu.memory_space<vmem>>, vector<4x36xf32>
    %cst_113 = arith.constant dense<0.000000e+00> : vector<4x256xf32>
    %88 = tpu.matmul %87, %86, %cst_113 {dimension_numbers = #tpu.dot_dimension_numbers<[1], [0], [0], [1], [0, 0, 1, 1], [], []>} : vector<4x36xf32>, vector<36x256xf32>, vector<4x256xf32> -> vector<4x256xf32>
    %c0_114 = arith.constant 0 : index
    %c0_115 = arith.constant 0 : index
    %89 = vector.load %arg9[%c0_114, %c0_115] : memref<4x1xf32, #tpu.memory_space<vmem>>, vector<4x1xf32>
    %90 = vector.broadcast %89 : vector<4x1xf32> to vector<4x256xf32>
    %91 = arith.mulf %88, %90 : vector<4x256xf32>
    %c0_116 = arith.constant 0 : index
    %c0_117 = arith.constant 0 : index
    %92 = vector.load %arg10[%c0_116, %c0_117] : memref<4x1xf32, #tpu.memory_space<vmem>>, vector<4x1xf32>
    %93 = vector.broadcast %92 : vector<4x1xf32> to vector<4x256xf32>
    %94 = arith.addf %91, %93 : vector<4x256xf32>
    %cst_118 = arith.constant 0.000000e+00 : f32
    %95 = vector.broadcast %cst_118 : f32 to vector<4x256xf32>
    %96 = arith.maximumf %94, %95 : vector<4x256xf32>
    %c0_119 = arith.constant 0 : index
    %c0_120 = arith.constant 0 : index
    %c0_121 = arith.constant 0 : index
    %97 = vector.load %arg11[%c0_119, %c0_120, %c0_121] : memref<1x4x256xf32, #tpu.memory_space<vmem>>, vector<1x4x256xf32>
    %98 = vector.shape_cast %97 : vector<1x4x256xf32> to vector<4x256xf32>
    %99 = vector.shape_cast %96 : vector<4x256xf32> to vector<1x4x256xf32>
    tpu.vector_store %arg11[%c0_119, %c0_120, %c0_121], %99 {strides = array<i32>} : memref<1x4x256xf32, #tpu.memory_space<vmem>>, vector<1x4x256xf32>,
    return
  }
  func.func @transform_0(%arg0: i32) -> (i32, i32, i32, i32) {
    %c0_i32 = arith.constant 0 : i32
    %c0_i32_0 = arith.constant 0 : i32
    %c0_i32_1 = arith.constant 0 : i32
    %c0_i32_2 = arith.constant 0 : i32
    return %arg0, %c0_i32, %c0_i32_0, %c0_i32_1 : i32, i32, i32, i32
  }
  func.func @transform_1(%arg0: i32) -> (i32, i32, i32, i32) {
    %c0_i32 = arith.constant 0 : i32
    %c0_i32_0 = arith.constant 0 : i32
    %c0_i32_1 = arith.constant 0 : i32
    %c0_i32_2 = arith.constant 0 : i32
    return %arg0, %c0_i32, %c0_i32_0, %c0_i32_1 : i32, i32, i32, i32
  }
  func.func @transform_2(%arg0: i32) -> (i32, i32) {
    %c0_i32 = arith.constant 0 : i32
    %c0_i32_0 = arith.constant 0 : i32
    %c0_i32_1 = arith.constant 0 : i32
    return %c0_i32, %c0_i32_0 : i32, i32
  }
  func.func @transform_3(%arg0: i32) -> (i32, i32) {
    %c0_i32 = arith.constant 0 : i32
    %c0_i32_0 = arith.constant 0 : i32
    %c0_i32_1 = arith.constant 0 : i32
    return %c0_i32, %c0_i32_0 : i32, i32
  }
  func.func @transform_4(%arg0: i32) -> (i32, i32) {
    %c0_i32 = arith.constant 0 : i32
    %c0_i32_0 = arith.constant 0 : i32
    %c0_i32_1 = arith.constant 0 : i32
    return %c0_i32, %c0_i32_0 : i32, i32
  }
  func.func @transform_5(%arg0: i32) -> (i32, i32) {
    %c0_i32 = arith.constant 0 : i32
    %c0_i32_0 = arith.constant 0 : i32
    %c0_i32_1 = arith.constant 0 : i32
    return %c0_i32, %c0_i32_0 : i32, i32
  }
  func.func @transform_6(%arg0: i32) -> (i32, i32) {
    %c0_i32 = arith.constant 0 : i32
    %c0_i32_0 = arith.constant 0 : i32
    %c0_i32_1 = arith.constant 0 : i32
    return %c0_i32, %c0_i32_0 : i32, i32
  }
  func.func @transform_7(%arg0: i32) -> (i32, i32) {
    %c0_i32 = arith.constant 0 : i32
    %c0_i32_0 = arith.constant 0 : i32
    %c0_i32_1 = arith.constant 0 : i32
    return %c0_i32, %c0_i32_0 : i32, i32
  }
  func.func @transform_8(%arg0: i32) -> (i32, i32) {
    %c0_i32 = arith.constant 0 : i32
    %c0_i32_0 = arith.constant 0 : i32
    %c0_i32_1 = arith.constant 0 : i32
    return %c0_i32, %c0_i32_0 : i32, i32
  }
  func.func @transform_9(%arg0: i32) -> (i32, i32) {
    %c0_i32 = arith.constant 0 : i32
    %c0_i32_0 = arith.constant 0 : i32
    %c0_i32_1 = arith.constant 0 : i32
    return %c0_i32, %c0_i32_0 : i32, i32
  }
  func.func @transform_10(%arg0: i32) -> (i32, i32, i32) {
    %c0_i32 = arith.constant 0 : i32
    %c0_i32_0 = arith.constant 0 : i32
    %c0_i32_1 = arith.constant 0 : i32
    return %arg0, %c0_i32, %c0_i32_0 : i32, i32, i32
  }
}

</mosaic_0001>

<bundles_post_ra>
// kernel: up_forward.1
= control target key start
LH: loop header
LB: loop body
LE: loop exit
PB: predicated region body
PF: predicated region fallthrough
CT: control target
= control target key end

     0   :  { %s7079_s13 = smov 0   ;;  %s12157_s0 = inlined_call_operand.vmem [shape: f32[2,4,8,8], index: 0, kind: input, shape index: {}]   ;;  %s12158_s1 = inlined_call_operand.vmem [shape: f32[2,4,16,16], index: 1, kind: input, shape index: {}]   ;;  %s12159_s2 = inlined_call_operand.vmem [shape: f32[18,8], index: 2, kind: input, shape index: {}]   ;;  %s12160_s3 = inlined_call_operand.vmem [shape: f32[8,18], index: 3, kind: input, shape index: {}]   ;;  %s12161_s4 = inlined_call_operand.vmem [shape: f32[4,72], index: 4, kind: input, shape index: {}]   ;;  %s12162_s5 = inlined_call_operand.vmem [shape: f32[4,1], index: 5, kind: input, shape index: {}]   ;;  %s12163_s6 = inlined_call_operand.vmem [shape: f32[4,1], index: 6, kind: input, shape index: {}]   ;;  %s12164_s7 = inlined_call_operand.vmem [shape: f32[4,36], index: 7, kind: input, shape index: {}]   ;;  %s12165_s8 = inlined_call_operand.vmem [shape: f32[4,1], index: 8, kind: input, shape index: {}]   ;;  %s12166_s9 = inlined_call_operand.vmem [shape: f32[4,1], index: 9, kind: input, shape index: {}]   ;;  %s12167_s10 = inlined_call_operand.vmem [shape: f32[2,4,256], index: 10, kind: output, shape index: {}]  }
   0x1 LB: > { %s6002_s14 = sadd.s32 4294967295, %s7008_s13   ;;  %p6006_p0 = scmp.ge.s32.totalorder %s7008_s13, 1  ;;  %s7008_s13 = sphi %s7079_s13, %s20_s13  }
   0x2   : > { %p322_p1 = scmp.lt.s32.totalorder %s7008_s13, 3 }
   0x4   : > { %p323_p2 = pnand %p6006_p0, %p322_p1 }
   0x6   : > { %326 = sbr.rel (%p323_p2) target bundleno = 1741 (0x6cd), region = 60 }
   0xb   : > { %v458_v0 = vld [vmem:[%s12160_s3] sm:$0xff]  ;;  %p365_p3 = scmp.lt.s32.totalorder %s6002_s14, 1  ;;  %vm380_vm0 = vcmask 146432   ;;  %v7010_v1 = vmov 0.0   ;;  %vm460_vm1 = vcmask 64512   ;;  %s7011_s25 = smov 1  }
   0xc   : > { %479 = vmatpush.msra.mxu3 %v458_v0  ;;  %543 = vmatpush.msra.mxu2 %v458_v0  ;;  %385 = vst.msk [vmem:[#allocation2 + $0x18] sm:$0xff] %vm380_vm0, %v7010_v1  ;;  %vm383_vm2 = vcmask 140288   ;;  %vm446_vm3 = vcmask 138248   ;;  %vm705_vm4 = vcmask 1047556   ;;  %s7012_s26 = smov 127   ;;  %v455_v27 = vld [vmem:[%s12159_s2] sm:$0xff] }
   0xd   : > { %598 = vmatpush.msra.mxu0 %v458_v0  ;;  %s13039_s14 = smov (!%p365_p3, %s6002_s14), 1  ;;  %386 = vst.msk [vmem:[#allocation2 + $0x20] sm:$0xff] %vm380_vm0, %v7010_v1  ;;  %s7013_s29 = smov 126   ;;  %v456_v45 = vld [vmem:[%s12159_s2 + $0x8] sm:$0xff]  ;;  %vm985_vm5 = vcmask 130048   ;;  %vm987_vm6 = vcmask 261120  }
   0xe   : > { %381 = vst.msk [vmem:[#allocation2] sm:$0xff] %vm380_vm0, %v7010_v1  ;;  %s6041_s17 = sshll.u32 %s13039_s14, 6  ;;  %s6040_s18 = sshll.u32 %s13039_s14, 5  ;;  %vm989_vm7 = vcmask 392192   ;;  %vm991_vm8 = vcmask 523264   ;;  %vm993_vm9 = vcmask 654336  }
   0xf   : > { %653 = vmatpush.msrb.mxu0 %v458_v0  ;;  %382 = vst.msk [vmem:[#allocation2 + $0x8] sm:$0xff] %vm380_vm0, %v7010_v1  ;;  %s7105_s21 = scalar_lea.vmem %s12158_s1, %s6041_s17  ;;  %s369_s24 = scalar_lea.vmem %s12157_s0, %s6040_s18  ;;  %vm995_vm10 = vcmask 785408   ;;  %vm997_vm11 = vcmask 916480   ;;  %vm3727_vm12 = vcmask 588800   ;;  %vm5851_vm13 = vcmask 1043456  }
  0x10   : > { %388 = vst.msk [vmem:[#allocation2 + $0x30] sm:$0xff] %vm380_vm0, %v7010_v1  ;;  %v408_v2 = vld [vmem:[%s7105_s21 + $0x10] sm:$0xff]  ;;  %v406_v3 = vld [vmem:[%s7105_s21] sm:$0xff]  ;;  %v6017_v5 = vld [vmem:[%s369_s24 + $0x8] sm:$0xff]  ;;  %s7016_s16 = smov 48   ;;  %s7017_s17 = smov 32  }
  0x11   : > { %v459_v4 = vld [vmem:[%s369_s24] sm:$0xff]  ;;  %389 = vst.msk [vmem:[#allocation2 + $0x38] sm:$0xff] %vm380_vm0, %v7010_v1  ;;  %426 = vrot.lane.b32.xlu1 %v408_v2, %s7011_s25  ;;  %422 = vrot.lane.b32.xlu0 %v406_v3, %s7011_s25  ;;  %v6022_v6 = vld [vmem:[%s369_s24 + $0x10] sm:$0xff]  ;;  %s7018_s18 = smov 16   ;;  %s7019_s19 = smov 96   ;;  %vm5861_vm14 = vcmask 293888  }
  0x12   : > { %391 = vst.msk [vmem:[#allocation2 + $0x48] sm:$0xff] %vm380_vm0, %v7010_v1  ;;  %6013 = vmatmul.msk.f32.vlgmr.msra.gmra.mxu3 %vm460_vm1, %v459_v4  ;;  %6018 = vmatmul.msk.f32.vlgmr.msra.gmra.mxu2 %vm460_vm1, %v6017_v5  ;;  %v410_v7 = vld [vmem:[%s7105_s21 + $0x20] sm:$0xff]  ;;  %v409_v8 = vld [vmem:[%s7105_s21 + $0x18] sm:$0xff]  ;;  %v407_v9 = vld [vmem:[%s7105_s21 + $0x8] sm:$0xff]  ;;  %s7020_s20 = smov 80   ;;  %s7022_s22 = smov 64  }
  0x13   : > { %392 = vst.msk [vmem:[#allocation2 + $0x50] sm:$0xff] %vm380_vm0, %v7010_v1  ;;  %6023 = vmatmul.msk.f32.vlgmr.msra.gmra.mxu0 %vm460_vm1, %v6022_v6  ;;  %430 = vrot.lane.b32.xlu2 %v410_v7, %s7011_s25  ;;  %v6027_v10 = vld [vmem:[%s369_s24 + $0x18] sm:$0xff]  ;;  %v411_v11 = vld [vmem:[%s7105_s21 + $0x28] sm:$0xff]  ;;  %v412_v13 = vld [vmem:[%s7105_s21 + $0x30] sm:$0xff] }
  0x14   : > { %394 = vst.msk [vmem:[#allocation2 + $0x60] sm:$0xff] %vm380_vm0, %v7010_v1  ;;  %v413_v12 = vld [vmem:[%s7105_s21 + $0x38] sm:$0xff]  ;;  %s7021_s21 = smov 112  }
  0x15   : > { %395 = vst.msk [vmem:[#allocation2 + $0x68] sm:$0xff] %vm380_vm0, %v7010_v1 }
  0x16   : > { %397 = vst.msk [vmem:[#allocation2 + $0x78] sm:$0xff] %vm380_vm0, %v7010_v1 }
  0x17   : > { %398 = vst.msk [vmem:[#allocation2 + $0x80] sm:$0xff] %vm380_vm0, %v7010_v1 }
  0x18   : > { %400 = vst.msk [vmem:[#allocation2 + $0x90] sm:$0xff] %vm380_vm0, %v7010_v1 }
  0x19   : > { %401 = vst.msk [vmem:[#allocation2 + $0x98] sm:$0xff] %vm380_vm0, %v7010_v1  ;;  %428 = vrot.lane.b32.xlu1 %v409_v8, %s7011_s25  ;;  %424 = vrot.lane.b32.xlu0 %v407_v9, %s7011_s25 }
  0x1a   : > { %403 = vst.msk [vmem:[#allocation2 + $0xa8] sm:$0xff] %vm380_vm0, %v7010_v1 }
  0x1b   : > { %404 = vst.msk [vmem:[#allocation2 + $0xb0] sm:$0xff] %vm380_vm0, %v7010_v1  ;;  %6028 = vmatmul.msk.f32.vlgmr.msrb.gmra.mxu0 %vm460_vm1, %v6027_v10  ;;  %432 = vrot.lane.b32.xlu2 %v411_v11, %s7011_s25 }
  0x1c   : > { %3789 = vst.msk [vmem:[#allocation3] sm:$0xff] %vm380_vm0, %v7010_v1 }
  0x1d   : > { %3790 = vst.msk [vmem:[#allocation3 + $0x8] sm:$0xff] %vm380_vm0, %v7010_v1 }
  0x1e   : > { %3792 = vst.msk [vmem:[#allocation3 + $0x18] sm:$0xff] %vm380_vm0, %v7010_v1 }
  0x1f   : > { %3793 = vst.msk [vmem:[#allocation3 + $0x20] sm:$0xff] %vm380_vm0, %v7010_v1 }
  0x20   : > { %3795 = vst.msk [vmem:[#allocation3 + $0x30] sm:$0xff] %vm380_vm0, %v7010_v1 }
  0x21   : > { %3796 = vst.msk [vmem:[#allocation3 + $0x38] sm:$0xff] %vm380_vm0, %v7010_v1  ;;  %436 = vrot.lane.b32.xlu1 %v413_v12, %s7011_s25  ;;  %434 = vrot.lane.b32.xlu0 %v412_v13, %s7011_s25 }
  0x22   : > { %3798 = vst.msk [vmem:[#allocation3 + $0x48] sm:$0xff] %vm380_vm0, %v7010_v1 }
  0x23   : > { %3799 = vst.msk [vmem:[#allocation3 + $0x50] sm:$0xff] %vm380_vm0, %v7010_v1 }
  0x24   : > { %387 = vst.msk [vmem:[#allocation2 + $0x28] sm:$0x3] %vm383_vm2, %v7010_v1 }
  0x25   : > { %384 = vst.msk [vmem:[#allocation2 + $0x10] sm:$0x3] %vm383_vm2, %v7010_v1 }
  0x26   : > { %390 = vst.msk [vmem:[#allocation2 + $0x40] sm:$0x3] %vm383_vm2, %v7010_v1 }
  0x27   : > { %393 = vst.msk [vmem:[#allocation2 + $0x58] sm:$0x3] %vm383_vm2, %v7010_v1 }
  0x28   : > { %396 = vst.msk [vmem:[#allocation2 + $0x70] sm:$0x3] %vm383_vm2, %v7010_v1 }
  0x29   : > { %399 = vst.msk [vmem:[#allocation2 + $0x88] sm:$0x3] %vm383_vm2, %v7010_v1 }
  0x2a   : > { %402 = vst.msk [vmem:[#allocation2 + $0xa0] sm:$0x3] %vm383_vm2, %v7010_v1 }
  0x2b   : > { %405 = vst.msk [vmem:[#allocation2 + $0xb8] sm:$0x3] %vm383_vm2, %v7010_v1 }
  0x2c   : > { %3791 = vst.msk [vmem:[#allocation3 + $0x10] sm:$0x3] %vm383_vm2, %v7010_v1 }
  0x2d   : > { %3794 = vst.msk [vmem:[#allocation3 + $0x28] sm:$0x3] %vm383_vm2, %v7010_v1 }
  0x2e   : > { %3797 = vst.msk [vmem:[#allocation3 + $0x40] sm:$0x3] %vm383_vm2, %v7010_v1 }
  0x2f   : > { %3800 = vst.msk [vmem:[#allocation3 + $0x58] sm:$0x3] %vm383_vm2, %v7010_v1 }
  0x6d   : > { %v431_v14 = vpop.permute.xlu2 %430 }
  0x6e   : > { %451 = vst.msk [vmem:[#allocation2 + $0x31] sm:$0xff] %vm446_vm3, %v431_v14  ;;  %v457_v14 = vld [vmem:[%s12159_s2 + $0x10] sm:$0x3] }
  0x75   : > { %v433_v15 = vpop.permute.xlu2 %432  ;;  %v692_v18 = vld [vmem:[#allocation2 + $0x30] sm:$0xff] }
  0x76   : > { %452 = vst.msk [vmem:[#allocation2 + $0x39] sm:$0xff] %vm446_vm3, %v433_v15  ;;  %v704_v22 = vrot.slane %v692_v18, 4  ;;  %v7231_v47 = vld [vmem:[#allocation2 + $0x31] sm:$0xff] }
  0x77   : > { %v1722_v50 = vrot.slane %v7231_v47, 4 }
  0x7d   : > { %v693_v19 = vld [vmem:[#allocation2 + $0x38] sm:$0xff] }
  0x7e   : > { %v6075_v23 = vpack.i.bf16 %v693_v19, %v692_v18  ;;  %v817_v31 = vrot.slane %v693_v19, 4  ;;  %v7239_v49 = vld [vmem:[#allocation2 + $0x39] sm:$0xff] }
  0x7f   : > { %v1834_v55 = vrot.slane %v7239_v49, 4 }
  0x80   : > { %6076 = vrot.lane.b32.xlu2 %v6075_v23, %s7012_s26 }
  0x83   : > { %v427_v16 = vpop.permute.xlu1 %426  ;;  %v423_v17 = vpop.permute.xlu0 %422 }
  0x84   : > { %449 = vst.msk [vmem:[#allocation2 + $0x19] sm:$0xff] %vm446_vm3, %v427_v16 }
  0x85   : > { %447 = vst.msk [vmem:[#allocation2 + $0x1] sm:$0xff] %vm446_vm3, %v423_v17 }
  0x88   : > { %6096 = vrot.lane.b32.xlu2 %v6075_v23, %s7013_s29 }
  0x8b   : > { %v429_v20 = vpop.permute.xlu1 %428  ;;  %v425_v21 = vpop.permute.xlu0 %424  ;;  %v7210_v30 = vld [vmem:[#allocation2 + $0x18] sm:$0xff] }
  0x8c   : > { %450 = vst.msk [vmem:[#allocation2 + $0x21] sm:$0xff] %vm446_vm3, %v429_v20  ;;  %v688_v24 = vld [vmem:[#allocation2] sm:$0xff]  ;;  %v719_v59 = vrot.slane %v7210_v30, 4 }
  0x8d   : > { %448 = vst.msk [vmem:[#allocation2 + $0x9] sm:$0xff] %vm446_vm3, %v425_v21  ;;  %v707_v25 = vrot.slane %v688_v24, 4  ;;  %v7202_v26 = vsel %vm705_vm4, %v704_v22, %v688_v24  ;;  %v7213_v35 = vld [vmem:[#allocation2 + $0x1] sm:$0xff]  ;;  %v1708_v51 = vld [vmem:[#allocation2 + $0x19] sm:$0xff] }
  0x8e   : > { %v1724_v39 = vrot.slane %v7213_v35, 4  ;;  %v7255_v58 = vsel %vm705_vm4, %v1722_v50, %v7213_v35  ;;  %v1736_v3 = vrot.slane %v1708_v51, 4  ;;  %v2721_v20 = vld [vmem:[#allocation2 + $0x3a] sm:$0xff] }
  0x8f   : > { %v7208_v28 = vsel %vm705_vm4, %v692_v18, %v707_v25  ;;  %v2844_v21 = vrot.slane %v2721_v20, 4 }
  0x90   : > { %v600_v29 = vpop.f32.mrf.mxu0  ;;  %v7246_v54 = vsel %vm705_vm4, %v7231_v47, %v1724_v39 }
  0x91   : > { %618 = vmatpush.msrb.mxu2 %v600_v29 }
  0x92   : > { %6024 = vmatmul.msk.f32.vlgmr.msrb.gmra.mxu2 %vm460_vm1, %v455_v27 }
  0x93   : > { %v437_v32 = vpop.permute.xlu1 %436  ;;  %v435_v33 = vpop.permute.xlu0 %434  ;;  %v691_v34 = vld [vmem:[#allocation2 + $0x20] sm:$0xff] }
  0x94   : > { %454 = vst.msk [vmem:[#allocation2 + $0x51] sm:$0xff] %vm446_vm3, %v437_v32  ;;  %v6070_v36 = vpack.i.bf16 %v691_v34, %v7210_v30  ;;  %v689_v37 = vld [vmem:[#allocation2 + $0x8] sm:$0xff]  ;;  %v831_v57 = vrot.slane %v691_v34, 4 }
  0x95   : > { %v7217_v38 = vld [vmem:[#allocation2 + $0x9] sm:$0xff]  ;;  %453 = vst.msk [vmem:[#allocation2 + $0x49] sm:$0xff] %vm446_vm3, %v435_v33  ;;  %v481_v40 = vpop.f32.mrf.mxu3  ;;  %v545_v41 = vpop.f32.mrf.mxu2  ;;  %v7221_v42 = vpack.i.bf16 %v689_v37, %v688_v24  ;;  %v819_v43 = vrot.slane %v689_v37, 4  ;;  %v7229_v46 = vsel %vm705_vm4, %v817_v31, %v689_v37  ;;  %v1709_v52 = vld [vmem:[#allocation2 + $0x21] sm:$0xff] }
  0x96   : > { %v1836_v44 = vrot.slane %v7217_v38, 4  ;;  %508 = vmatpush.msra.mxu1 %v481_v40  ;;  %563 = vmatpush.msrb.mxu3 %v545_v41  ;;  %v7262_v60 = vsel %vm705_vm4, %v1834_v55, %v7217_v38  ;;  %v6110_v61 = vpack.i.bf16 %v1709_v52, %v1708_v51  ;;  %v1848_v62 = vrot.slane %v1709_v52, 4  ;;  %v2716_v23 = vld [vmem:[#allocation2 + $0x2] sm:$0xff]  ;;  %v2717_v24 = vld [vmem:[#allocation2 + $0xa] sm:$0xff] }
  0x97   : > { %6071 = vrot.lane.b32.xlu1 %v6070_v36, %s7012_s26  ;;  %6066 = vrot.lane.b32.xlu0 %v7221_v42, %s7012_s26  ;;  %v7237_v48 = vsel %vm705_vm4, %v693_v19, %v819_v43  ;;  %v6105_v18 = vpack.i.bf16 %v7217_v38, %v7213_v35  ;;  %v2720_v19 = vld [vmem:[#allocation2 + $0x32] sm:$0xff]  ;;  %v7308_v25 = vsel %vm705_vm4, %v2844_v21, %v2717_v24  ;;  %v2734_v31 = vrot.slane %v2716_v23, 4 }
  0x98   : > { %6014 = vmatmul.msk.f32.vlgmr.msra.gmra.mxu1 %vm460_vm1, %v455_v27  ;;  %6019 = vmatmul.msk.f32.vlgmr.msrb.gmra.mxu3 %vm460_vm1, %v455_v27  ;;  %v655_v53 = vpop.f32.mrf.mxu0  ;;  %v7251_v56 = vsel %vm705_vm4, %v7239_v49, %v1836_v44  ;;  %v2732_v22 = vrot.slane %v2720_v19, 4 }
  0x99   : > { %673 = vmatpush.msra.mxu0 %v655_v53  ;;  %6111 = vrot.lane.b32.xlu2 %v6110_v61, %s7012_s26  ;;  %v7316_v35 = vsel %vm705_vm4, %v2720_v19, %v2734_v31  ;;  %v6155_v53 = vpack.i.bf16 %v2721_v20, %v2720_v19 }
  0x9a   : > { %6025 = vmatmul.msk.f32.gmra.mxu2 %vm460_vm1, %v456_v45  ;;  %6029 = vmatmul.msk.f32.vlgmr.msra.gmra.mxu0 %vm460_vm1, %v455_v27  ;;  %v2846_v27 = vrot.slane %v2717_v24, 4  ;;  %v2733_v29 = vsel %vm705_vm4, %v2732_v22, %v2716_v23 }
  0x9b   : > { %v1713_v63 = vld [vmem:[#allocation2 + $0x51] sm:$0xff] }
  0x9c   : > { %v694_v0 = vld [vmem:[#allocation2 + $0x48] sm:$0xff]  ;;  %v695_v1 = vld [vmem:[#allocation2 + $0x50] sm:$0xff]  ;;  %v1846_v2 = vrot.slane %v1713_v63, 4  ;;  %v7265_v4 = vsel %vm705_vm4, %v1713_v63, %v1848_v62  ;;  %v7313_v32 = vsel %vm705_vm4, %v2721_v20, %v2846_v27 }
  0x9d   : > { %v829_v5 = vrot.slane %v695_v1, 4  ;;  %v7268_v6 = vsel %vm705_vm4, %v695_v1, %v831_v57  ;;  %v6080_v7 = vpack.i.bf16 %v695_v1, %v694_v0  ;;  %v717_v8 = vrot.slane %v694_v0, 4  ;;  %v1712_v9 = vld [vmem:[#allocation2 + $0x49] sm:$0xff]  ;;  %v2723_v40 = vld [vmem:[#allocation2 + $0x52] sm:$0xff] }
  0x9e   : > { %v7272_v10 = vsel %vm705_vm4, %v694_v0, %v719_v59  ;;  %v1734_v11 = vrot.slane %v1712_v9, 4  ;;  %v7292_v16 = vsel %vm705_vm4, %v1712_v9, %v1736_v3  ;;  %v7295_v17 = vsel %vm705_vm4, %v1846_v2, %v1709_v52  ;;  %v2722_v39 = vld [vmem:[#allocation2 + $0x4a] sm:$0xff] }
  0x9f   : > { %6091 = vrot.lane.b32.xlu1 %v6070_v36, %s7013_s29  ;;  %v7276_v12 = vsel %vm705_vm4, %v829_v5, %v691_v34  ;;  %6081 = vrot.lane.b32.xlu0 %v6080_v7, %s7012_s26  ;;  %v7281_v13 = vsel %vm705_vm4, %v717_v8, %v7210_v30  ;;  %v6145_v30 = vpack.i.bf16 %v2717_v24, %v2716_v23  ;;  %v2719_v34 = vld [vmem:[#allocation2 + $0x22] sm:$0xff]  ;;  %v2718_v36 = vld [vmem:[#allocation2 + $0x1a] sm:$0xff]  ;;  %v2856_v41 = vrot.slane %v2723_v40, 4 }
  0xa0   : > { %6015 = vmatmul.msk.f32.gmra.mxu1 %vm460_vm1, %v456_v45  ;;  %6020 = vmatmul.msk.f32.gmra.mxu3 %vm460_vm1, %v456_v45  ;;  %v7289_v15 = vsel %vm705_vm4, %v1734_v11, %v1708_v51  ;;  %v6120_v33 = vpack.i.bf16 %v1713_v63, %v1712_v9  ;;  %v2858_v37 = vrot.slane %v2719_v34, 4  ;;  %v2746_v38 = vrot.slane %v2718_v36, 4 }
  0xa1   : > { %6131 = vrot.lane.b32.xlu2 %v6110_v61, %s7013_s29  ;;  %v2744_v43 = vrot.slane %v2722_v39, 4  ;;  %v6160_v44 = vpack.i.bf16 %v2723_v40, %v2722_v39  ;;  %v2857_v50 = vsel %vm705_vm4, %v2856_v41, %v2719_v34  ;;  %v6115_v52 = vpack.i.bf16 %v7239_v49, %v7231_v47 }
  0xa2   : > { %6026 = vmatmul.msk.f32.gmra.mxu2 %vm460_vm1, %v457_v14  ;;  %6030 = vmatmul.msk.f32.gmra.mxu0 %vm460_vm1, %v456_v45  ;;  %v7325_v45 = vsel %vm705_vm4, %v2722_v39, %v2746_v38  ;;  %v6150_v55 = vpack.i.bf16 %v2719_v34, %v2718_v36  ;;  %v7014_v47 = vmov 1983009808  }
  0xa3   : > { %v2745_v51 = vsel %vm705_vm4, %v2744_v43, %v2718_v36  ;;  %v710_v49 = vunpack.c.l.s4 %v7014_v47 }
  0xa5   : > { %v7342_v57 = vunpack.c.0.s8 %v710_v49 }
  0xa7   : > { %6106 = vrot.lane.b32.xlu1 %v6105_v18, %s7012_s26  ;;  %6086 = vrot.lane.b32.xlu0 %v7221_v42, %s7013_s29  ;;  %v7322_v42 = vsel %vm705_vm4, %v2723_v40, %v2858_v37  ;;  %12431 = vst [vmem:[#allocation4_spill] sm:$0xff] %v7342_v57  ;;  %v712_v59 = vperm.slane %v7202_v26, %v7342_v57 }
  0xa8   : > { %6016 = vmatmul.msk.f32.gmra.mxu1 %vm460_vm1, %v457_v14  ;;  %6021 = vmatmul.msk.f32.gmra.mxu3 %vm460_vm1, %v457_v14  ;;  %v824_v61 = vperm.slane %v7229_v46, %v7342_v57  ;;  %v724_v62 = vperm.slane %v7281_v13, %v7342_v57  ;;  %v836_v0 = vperm.slane %v7276_v12, %v7342_v57 }
  0xa9   : > { %6146 = vrot.lane.b32.xlu2 %v6145_v30, %s7012_s26  ;;  %v755_v63 = vrot.slane %v712_v59, 4  ;;  %v716_v26 = vperm.slane %v7208_v28, %v7342_v57  ;;  %v2739_v46 = vperm.slane %v2733_v29, %v7342_v57  ;;  %v840_v9 = vperm.slane %v7268_v6, %v7342_v57 }
  0xaa   : > { %6031 = vmatmul.msk.f32.gmra.mxu0 %vm460_vm1, %v457_v14  ;;  %v867_v1 = vrot.slane %v824_v61, 4  ;;  %v753_v5 = vrot.slane %v724_v62, 4  ;;  %v828_v11 = vperm.slane %v7237_v48, %v7342_v57  ;;  %v865_v12 = vrot.slane %v836_v0, 4 }
  0xab   : > { %v7353_v2 = vsel %vm705_vm4, %v724_v62, %v755_v63  ;;  %v767_v13 = vrot.slane %v716_v26, 4  ;;  %v1741_v28 = vperm.slane %v7289_v15, %v7342_v57  ;;  %v2782_v14 = vrot.slane %v2739_v46, 4 }
  0xac   : > { %v7356_v3 = vsel %vm705_vm4, %v836_v0, %v867_v1  ;;  %v7364_v8 = vsel %vm705_vm4, %v753_v5, %v712_v59  ;;  %v2751_v6 = vperm.slane %v2745_v51, %v7342_v57  ;;  %v877_v21 = vrot.slane %v840_v9, 4 }
  0xad   : > { %v2851_v22 = vperm.slane %v7308_v25, %v7342_v57  ;;  %v879_v23 = vrot.slane %v828_v11, 4  ;;  %v1770_v29 = vrot.slane %v1741_v28, 4  ;;  %v7400_v25 = vperm.slane %v7316_v35, %v7342_v57 }
  0xae   : > { %v7384_v15 = vsel %vm705_vm4, %v2751_v6, %v2782_v14  ;;  %v2780_v27 = vrot.slane %v2751_v6, 4  ;;  %v2863_v36 = vperm.slane %v2857_v50, %v7342_v57  ;;  %v1853_v37 = vperm.slane %v7295_v17, %v7342_v57 }
  0xaf   : > { %6121 = vrot.lane.b32.xlu1 %v6120_v33, %s7012_s26  ;;  %6101 = vrot.lane.b32.xlu0 %v6080_v7, %s7013_s29  ;;  %v728_v7 = vperm.slane %v7272_v10, %v7342_v57  ;;  %v7375_v10 = vsel %vm705_vm4, %v865_v12, %v824_v61  ;;  %v7390_v24 = vsel %vm705_vm4, %v840_v9, %v879_v23 }
  0xb0   : > { %12432 = vst [vmem:[#allocation5_spill] sm:$0xff] %v7400_v25  ;;  %v1841_v38 = vperm.slane %v7262_v60, %v7342_v57  ;;  %v7410_v39 = vsel %vm705_vm4, %v2780_v27, %v2739_v46  ;;  %v7420_v35 = vperm.slane %v7325_v45, %v7342_v57  ;;  %v2892_v50 = vrot.slane %v2863_v36, 4 }
  0xb1   : > { %6161 = vrot.lane.b32.xlu2 %v6160_v44, %s7012_s26  ;;  %v7378_v19 = vsel %vm705_vm4, %v728_v7, %v767_v13  ;;  %v765_v48 = vrot.slane %v728_v7, 4  ;;  %v7439_v45 = vperm.slane %v7313_v32, %v7342_v57  ;;  %v7443_v47 = vperm.slane %v7246_v54, %v7342_v57 }
  0xb2   : > { %12433 = vst [vmem:[#allocation6_spill] sm:$0xff] %v7420_v35  ;;  %v1884_v43 = vrot.slane %v1841_v38, 4  ;;  %v7429_v51 = vsel %vm705_vm4, %v2892_v50, %v2851_v22  ;;  %v7452_v61 = vperm.slane %v7251_v56, %v7342_v57  ;;  %v7456_v62 = vperm.slane %v7322_v42, %v7342_v57 }
  0xb3   : > { %v7393_v31 = vsel %vm705_vm4, %v765_v48, %v716_v26  ;;  %12435 = vst [vmem:[#allocation8_spill] sm:$0xff] %v7439_v45  ;;  %v2906_v32 = vrot.slane %v7439_v45, 4  ;;  %v1784_v63 = vrot.slane %v7443_v47, 4  ;;  %v7462_v1 = vperm.slane %v7292_v16, %v7342_v57 }
  0xb4   : > { %v7426_v60 = vsel %vm705_vm4, %v1853_v37, %v1884_v43  ;;  %12436 = vst [vmem:[#allocation9_spill] sm:$0xff] %v7443_v47  ;;  %v1896_v26 = vrot.slane %v7452_v61, 4  ;;  %v7482_v7 = vperm.slane %v7265_v4, %v7342_v57 }
  0xb5   : > { %12438 = vst [vmem:[#allocation11_spill] sm:$0xff] %v7452_v61  ;;  %v7472_v5 = vsel %vm705_vm4, %v7456_v62, %v2906_v32  ;;  %v7478_v16 = vsel %vm705_vm4, %v7462_v1, %v1784_v63 }
  0xb6   : > { %12439 = vst [vmem:[#allocation12_spill] sm:$0xff] %v7456_v62 }
  0xb7   : > { %6126 = vrot.lane.b32.xlu1 %v6105_v18, %s7013_s29  ;;  %6116 = vrot.lane.b32.xlu0 %v6115_v52, %s7012_s26  ;;  %v1729_v18 = vperm.slane %v7255_v58, %v7342_v57  ;;  %12442 = vst [vmem:[#allocation15_spill] sm:$0xff] %v7482_v7 }
  0xb9   : > { %6166 = vrot.lane.b32.xlu2 %v6145_v30, %s7013_s29  ;;  %v1772_v20 = vrot.slane %v1729_v18, 4  ;;  %v2894_v30 = vrot.slane %v2851_v22, 4  ;;  %v7416_v41 = vsel %vm705_vm4, %v1770_v29, %v1729_v18 }
  0xbb   : > { %v7387_v58 = vsel %vm705_vm4, %v1741_v28, %v1772_v20  ;;  %v7413_v40 = vsel %vm705_vm4, %v2863_v36, %v2894_v30  ;;  %v7015_v36 = vmov 1934713408  }
  0xbf   : > { %6141 = vrot.lane.b32.xlu1 %v6120_v33, %s7013_s29  ;;  %6136 = vrot.lane.b32.xlu0 %v6115_v52, %s7013_s29  ;;  %v7396_v33 = vsel %vm705_vm4, %v877_v21, %v828_v11  ;;  %v7486_v11 = vsel %vm705_vm4, %v7482_v7, %v1896_v26 }
  0xc1   : > { %6181 = vrot.lane.b32.xlu2 %v6160_v44, %s7013_s29  ;;  %v2794_v44 = vrot.slane %v7400_v25, 4 }
  0xc3   : > { %v7433_v52 = vsel %vm705_vm4, %v7420_v35, %v2794_v44 }
  0xc7   : > { %6156 = vrot.lane.b32.xlu1 %v6155_v53, %s7012_s26  ;;  %6151 = vrot.lane.b32.xlu0 %v6150_v55, %s7012_s26 }
  0xcf   : > { %6176 = vrot.lane.b32.xlu1 %v6155_v53, %s7013_s29  ;;  %6171 = vrot.lane.b32.xlu0 %v6150_v55, %s7013_s29  ;;  %v1882_v53 = vrot.slane %v1853_v37, 4  ;;  %v758_v37 = vunpack.c.l.s4 %v7015_v36 }
  0xd1   : > { %v7448_v59 = vsel %vm705_vm4, %v1882_v53, %v1841_v38  ;;  %v7520_v32 = vunpack.c.0.s8 %v758_v37 }
  0xd3   : > { %12446 = vst [vmem:[#allocation19_spill] sm:$0xff] %v7520_v32 }
  0xda   : > { %v7402_v34 = vpop.permute.xlu2 %6076 }
  0xe2   : > { %v7435_v55 = vpop.permute.xlu2 %6096 }
  0xe3   : > { %12434 = vst [vmem:[#allocation7_spill] sm:$0xff] %v7435_v55  ;;  %v12169_v26 = vunpack.i.h.bf16 %v7435_v55 }
  0xe5   : > { %v7556_v36 = vrot.slane %v12169_v26, 4  ;;  %v7573_v26 = vperm.slane %v7375_v10, %v7520_v32 }
  0xe7   : > { %12451 = vst [vmem:[#allocation24_spill] sm:$0xff] %v7573_v26 }
  0xf3   : > { %v7468_v42 = vpop.permute.xlu2 %6111 }
  0xf4   : > { %12440 = vst [vmem:[#allocation13_spill] sm:$0xff] %v7468_v42 }
  0xfb   : > { %v7503_v21 = vpop.permute.xlu2 %6131 }
  0xfc   : > { %12444 = vst [vmem:[#allocation17_spill] sm:$0xff] %v7503_v21 }
 0x103   : > { %v7522_v63 = vpop.permute.xlu2 %6146 }
 0x104   : > { %12447 = vst [vmem:[#allocation20_spill] sm:$0xff] %v7522_v63  ;;  %v12472_v25 = vunpack.i.h.bf16 %v7522_v63 }
 0x106   : > { %v7707_v62 = vrot.slane %v12472_v25, 4  ;;  %v12474_v25 = vunpack.i.l.bf16 %v7522_v63 }
 0x108   : > { %12473 = vst [vmem:[#allocation39_spill] sm:$0xff] %v7707_v62 }
 0x109   : > { %v7423_v17 = vpop.permute.xlu1 %6071 }
 0x10a   : > { %v12485_v35 = vunpack.i.h.bf16 %v7423_v17 }
 0x111   : > { %v7445_v49 = vpop.permute.xlu1 %6091 }
 0x112   : > { %12437 = vst [vmem:[#allocation10_spill] sm:$0xff] %v7445_v49 }
 0x115   : > { %v510_v0 = vpop.f32.mrf.mxu1  ;;  %v620_v54 = vpop.f32.mrf.mxu2 }
 0x116   : > { %520 = vst.msk [vmem:[#allocation2 + $0x60] sm:$0xff] %vm380_vm0, %v510_v0  ;;  %v12170_v0 = vunpack.i.h.bf16 %v7402_v34 }
 0x117   : > { %630 = vst.msk [vmem:[#allocation2 + $0x90] sm:$0xff] %vm380_vm0, %v620_v54  ;;  %v675_v56 = vpop.f32.mrf.mxu0  ;;  %v12168_v54 = vunpack.i.l.bf16 %v7402_v34 }
 0x118   : > { %685 = vst.msk [vmem:[#allocation2 + $0xa8] sm:$0xff] %vm380_vm0, %v675_v56 }
 0x119   : > { %v7474_v46 = vpop.permute.xlu1 %6106 }
 0x11a   : > { %12441 = vst [vmem:[#allocation14_spill] sm:$0xff] %v7474_v46 }
 0x11b   : > { %v565_v9 = vpop.f32.mrf.mxu3 }
 0x11c   : > { %575 = vst.msk [vmem:[#allocation2 + $0x78] sm:$0xff] %vm380_vm0, %v565_v9 }
 0x11d   : > { %v513_v12 = vpop.f32.mrf.mxu1  ;;  %v623_v13 = vpop.f32.mrf.mxu2  ;;  %v7489_v28 = vld [vmem:[#allocation2 + $0x60] sm:$0xff] }
 0x11e   : > { %521 = vst.msk [vmem:[#allocation2 + $0x68] sm:$0xff] %vm380_vm0, %v513_v12  ;;  %v731_v14 = vrot.slane %v7489_v28, 4  ;;  %v7494_v4 = vld [vmem:[#allocation2 + $0x90] sm:$0xff]  ;;  %v12171_v12 = vunpack.i.l.bf16 %v7435_v55 }
 0x11f   : > { %631 = vst.msk [vmem:[#allocation2 + $0x98] sm:$0xff] %vm380_vm0, %v623_v13  ;;  %v678_v18 = vpop.f32.mrf.mxu0  ;;  %v7638_v55 = vld [vmem:[#allocation2 + $0xa8] sm:$0xff] }
 0x120   : > { %686 = vst.msk [vmem:[#allocation2 + $0xb0] sm:$0xff] %vm380_vm0, %v678_v18  ;;  %v7499_v6 = vsel %vm705_vm4, %v7494_v4, %v731_v14  ;;  %v7541_v14 = vperm.slane %v7353_v2, %v7520_v32  ;;  %v12174_v18 = vunpack.i.h.bf16 %v7468_v42 }
 0x121   : > { %v7501_v20 = vpop.permute.xlu1 %6121 }
 0x122   : > { %12443 = vst [vmem:[#allocation16_spill] sm:$0xff] %v7501_v20 }
 0x123   : > { %v568_v48 = vpop.f32.mrf.mxu3  ;;  %v7537_v13 = vld [vmem:[#allocation2 + $0x78] sm:$0xff] }
 0x124   : > { %576 = vst.msk [vmem:[#allocation2 + $0x80] sm:$0xff] %vm380_vm0, %v568_v48 }
 0x125   : > { %v516_v22 = vpop.f32.mrf.mxu1  ;;  %v626_v23 = vpop.f32.mrf.mxu2  ;;  %v7510_v30 = vld [vmem:[#allocation2 + $0x68] sm:$0xff] }
 0x126   : > { %522 = vst.msk [vmem:[#allocation2 + $0x70] sm:$0x3] %vm383_vm2, %v516_v22  ;;  %v7508_v29 = vld [vmem:[#allocation2 + $0x98] sm:$0xff]  ;;  %v6185_v44 = vpack.i.bf16 %v7510_v30, %v7489_v28  ;;  %v843_v50 = vrot.slane %v7510_v30, 4  ;;  %v7548_v22 = vperm.slane %v7356_v3, %v7520_v32  ;;  %v7564_v3 = vperm.slane %v7364_v8, %v7520_v32  ;;  %v7691_v45 = vld [vmem:[#allocation2 + $0x61] sm:$0xff] }
 0x127   : > { %632 = vst.msk [vmem:[#allocation2 + $0xa0] sm:$0x3] %vm383_vm2, %v626_v23  ;;  %v681_v27 = vpop.f32.mrf.mxu0  ;;  %v6190_v43 = vpack.i.bf16 %v7508_v29, %v7494_v4  ;;  %v1182_v23 = vrot.slane %v12170_v0, 4  ;;  %v7577_v0 = vperm.slane %v7378_v19, %v7520_v32  ;;  %v7581_v8 = vrot.slane %v12174_v18, 4 }
 0x128   : > { %687 = vst.msk [vmem:[#allocation2 + $0xb8] sm:$0x3] %vm383_vm2, %v681_v27  ;;  %6186 = vrot.lane.b32.xlu1 %v6185_v44, %s7012_s26  ;;  %v7532_v56 = vsel %vm705_vm4, %v7508_v29, %v843_v50  ;;  %v1070_v27 = vrot.slane %v12168_v54, 4  ;;  %v6067_v50 = vpop.permute.xlu0 %6066  ;;  %v7588_v54 = vperm.slane %v7390_v24, %v7520_v32  ;;  %v12453_v18 = vunpack.i.l.bf16 %v7468_v42 }
 0x129   : > { %v7513_v38 = vpop.permute.xlu1 %6126  ;;  %6191 = vrot.lane.b32.xlu0 %v6190_v43, %s7012_s26  ;;  %12449 = vst [vmem:[#allocation22_spill] sm:$0xff] %v7564_v3  ;;  %v6069_v37 = vunpack.i.h.bf16 %v6067_v50  ;;  %v6068_v10 = vunpack.i.l.bf16 %v6067_v50  ;;  %v7605_v24 = vperm.slane %v7393_v31, %v7520_v32  ;;  %v7610_v19 = vperm.slane %v7396_v33, %v7520_v32 }
 0x12a   : > { %12445 = vst [vmem:[#allocation18_spill] sm:$0xff] %v7513_v38  ;;  %v7624_v31 = vperm.slane %v7410_v39, %v7520_v32  ;;  %v12457_v33 = vunpack.i.h.bf16 %v7503_v21  ;;  %v7640_v39 = vld [vmem:[#allocation2 + $0xb0] sm:$0xff]  ;;  %v12463_v42 = vunpack.i.h.bf16 %v7402_v34 }
 0x12b   : > { %v571_v53 = vpop.f32.mrf.mxu3  ;;  %v7534_v9 = vld [vmem:[#allocation2 + $0x80] sm:$0xff]  ;;  %12452 = vst [vmem:[#allocation25_spill] sm:$0xff] %v7581_v8  ;;  %v1184_v38 = vrot.slane %v6069_v37, 4  ;;  %v1072_v50 = vrot.slane %v6068_v10, 4  ;;  %v6073_v8 = vunpack.i.l.bf16 %v7423_v17 }
 0x12c   : > { %577 = vst.msk [vmem:[#allocation2 + $0x88] sm:$0x3] %vm383_vm2, %v571_v53  ;;  %v6215_v48 = vpack.i.bf16 %v7534_v9, %v7537_v13  ;;  %v7568_v53 = vrot.slane %v12171_v12, 4  ;;  %v7620_v12 = vperm.slane %v7413_v40, %v7520_v32  ;;  %v1183_v40 = vsel %vm705_vm4, %v1182_v23, %v6069_v37 }
 0x12d   : > { %12456 = vst [vmem:[#allocation28_spill] sm:$0xff] %v7624_v31  ;;  %v7642_v46 = vld [vmem:[#allocation2 + $0x6a] sm:$0xff]  ;;  %v1071_v23 = vsel %vm705_vm4, %v1070_v27, %v6068_v10  ;;  %v12465_v27 = vunpack.i.l.bf16 %v7402_v34  ;;  %v7683_v34 = vperm.slane %v7426_v60, %v7520_v32 }
 0x12e   : > { %6216 = vrot.lane.b32.xlu2 %v6215_v48, %s7012_s26  ;;  %12450 = vst [vmem:[#allocation23_spill] sm:$0xff] %v7568_v53  ;;  %v7665_v53 = vperm.slane %v1183_v40, %v7342_v57  ;;  %v1084_v40 = vrot.slane %v6073_v8, 4 }
 0x12f   : > { %v1073_v10 = vsel %vm705_vm4, %v12465_v27, %v1072_v50 }
 0x130   : > { %6196 = vrot.lane.b32.xlu1 %v6185_v44, %s7013_s29  ;;  %v7600_v44 = vpop.permute.xlu2 %6161  ;;  %12464 = vst [vmem:[#allocation33_spill] sm:$0xff] %v7665_v53  ;;  %v6082_v37 = vpop.permute.xlu0 %6081  ;;  %v7698_v60 = vperm.slane %v1073_v10, %v7342_v57  ;;  %v7722_v53 = vrot.slane %v12474_v25, 4  ;;  %v7735_v25 = vperm.slane %v7448_v59, %v7520_v32 }
 0x131   : > { %v7558_v2 = vpop.permute.xlu1 %6141  ;;  %6201 = vrot.lane.b32.xlu0 %v6190_v43, %s7013_s29  ;;  %v7598_v43 = vrot.slane %v12453_v18, 4  ;;  %12455 = vst [vmem:[#allocation27_spill] sm:$0xff] %v7600_v44  ;;  %v7615_v18 = vperm.slane %v7387_v58, %v7520_v32  ;;  %v6083_v50 = vunpack.i.l.bf16 %v6082_v37 }
 0x132   : > { %12448 = vst [vmem:[#allocation21_spill] sm:$0xff] %v7558_v2  ;;  %v7594_v2 = vperm.slane %v7384_v15, %v7520_v32  ;;  %v12459_v15 = vunpack.i.l.bf16 %v7503_v21 }
 0x133   : > { %12454 = vst [vmem:[#allocation26_spill] sm:$0xff] %v7598_v43  ;;  %v7628_v43 = vrot.slane %v12457_v33, 4  ;;  %v1082_v61 = vrot.slane %v6083_v50, 4  ;;  %v1085_v7 = vsel %vm705_vm4, %v6083_v50, %v1084_v40 }
 0x134   : > { %v7632_v58 = vrot.slane %v12459_v15, 4  ;;  %v7649_v15 = vperm.slane %v7416_v41, %v7520_v32  ;;  %v12466_v41 = vunpack.i.h.bf16 %v7423_v17  ;;  %12470 = vst [vmem:[#allocation37_spill] sm:$0xff] %v7698_v60 }
 0x135   : > { %12458 = vst [vmem:[#allocation29_spill] sm:$0xff] %v7628_v43  ;;  %v7679_v43 = vperm.slane %v1071_v23, %v7342_v57  ;;  %v7695_v23 = vperm.slane %v7429_v51, %v7520_v32  ;;  %v7712_v51 = vperm.slane %v7433_v52, %v7520_v32  ;;  %v12479_v52 = vunpack.i.h.bf16 %v7445_v49 }
 0x136   : > { %12460 = vst [vmem:[#allocation30_spill] sm:$0xff] %v7632_v58  ;;  %6221 = vrot.lane.b32.xlu2 %v6215_v48, %s7013_s29  ;;  %v6205_v48 = vpack.i.bf16 %v7640_v39, %v7638_v55  ;;  %v1185_v58 = vsel %vm705_vm4, %v12463_v42, %v1184_v38  ;;  %v7674_v38 = vld [vmem:[#allocation2 + $0x69] sm:$0xff]  ;;  %v1196_v21 = vrot.slane %v12466_v41, 4  ;;  %v6084_v41 = vunpack.i.h.bf16 %v6082_v37 }
 0x137   : > { %12462 = vst [vmem:[#allocation32_spill] sm:$0xff] %v7649_v15  ;;  %v7687_v27 = vperm.slane %v1185_v58, %v7342_v57  ;;  %v6225_v58 = vpack.i.bf16 %v7674_v38, %v7691_v45  ;;  %v7740_v10 = vrot.slane %v12479_v52, 4  ;;  %v1083_v52 = vsel %vm705_vm4, %v1082_v61, %v6073_v8  ;;  %v1718_v8 = vld [vmem:[#allocation2 + $0x91] sm:$0xff] }
 0x138   : > { %6206 = vrot.lane.b32.xlu1 %v6205_v48, %s7012_s26  ;;  %12467 = vst [vmem:[#allocation34_spill] sm:$0xff] %v7679_v43  ;;  %v7700_v15 = vpop.permute.xlu2 %6166  ;;  %v1194_v43 = vrot.slane %v6084_v41, 4  ;;  %v1197_v37 = vsel %vm705_vm4, %v6084_v41, %v1196_v21  ;;  %v12481_v21 = vunpack.i.l.bf16 %v7445_v49  ;;  %v1860_v61 = vrot.slane %v7674_v38, 4 }
 0x139   : > { %v7644_v33 = vpop.permute.xlu1 %6156  ;;  %12468 = vst [vmem:[#allocation35_spill] sm:$0xff] %v7687_v27  ;;  %v12477_v20 = vunpack.i.h.bf16 %v7700_v15  ;;  %v12483_v60 = vunpack.i.l.bf16 %v7700_v15  ;;  %v7749_v40 = vperm.slane %v1197_v37, %v7342_v57  ;;  %v729_v37 = vrot.slane %v7494_v4, 4 }
 0x13a   : > { %12461 = vst [vmem:[#allocation31_spill] sm:$0xff] %v7644_v33  ;;  %v7659_v33 = vld [vmem:[#allocation2 + $0x62] sm:$0xff]  ;;  %v7744_v41 = vrot.slane %v12481_v21, 4  ;;  %v1195_v63 = vsel %vm705_vm4, %v1194_v43, %v12485_v35  ;;  %v7762_v21 = vpop.permute.xlu0 %6086  ;;  %v7781_v4 = vperm.slane %v7472_v5, %v7520_v32  ;;  %v7817_v43 = vld [vmem:[#allocation2 + $0xb2] sm:$0xff]  ;;  %v7836_v5 = vperm.slane %v7532_v56, %v7342_v57 }
 0x13b   : > { %v6245_v42 = vpack.i.bf16 %v7642_v46, %v7659_v33  ;;  %12469 = vst [vmem:[#allocation36_spill] sm:$0xff] %v7695_v23  ;;  %v3546_v27 = vrot.slane %v12477_v20, 4  ;;  %v3434_v50 = vrot.slane %v12483_v60, 4  ;;  %v841_v20 = vrot.slane %v7508_v29, 4 }
 0x13c   : > { %12471 = vst [vmem:[#allocation38_spill] sm:$0xff] %v7700_v15  ;;  %v12206_v17 = vunpack.i.h.bf16 %v7762_v21  ;;  %v7784_v29 = vperm.slane %v1195_v63, %v7342_v57  ;;  %v12494_v63 = vunpack.i.h.bf16 %v7600_v44  ;;  %v1721_v44 = vld [vmem:[#allocation2 + $0xb1] sm:$0xff] }
 0x13d   : > { %6246 = vrot.lane.b32.xlu0 %v6245_v42, %s7012_s26  ;;  %12475 = vst [vmem:[#allocation40_spill] sm:$0xff] %v7722_v53  ;;  %v7758_v53 = vperm.slane %v1085_v7, %v7342_v57 }
 0x13e   : > { %6226 = vrot.lane.b32.xlu2 %v6225_v58, %s7012_s26  ;;  %12478 = vst [vmem:[#allocation42_spill] sm:$0xff] %v7735_v25 }
 0x13f   : > { %12480 = vst [vmem:[#allocation43_spill] sm:$0xff] %v7740_v10 }
 0x140   : > { %12482 = vst [vmem:[#allocation44_spill] sm:$0xff] %v7744_v41  ;;  %6211 = vrot.lane.b32.xlu1 %v6205_v48, %s7013_s29  ;;  %v7791_v48 = vperm.slane %v7478_v16, %v7520_v32  ;;  %v842_v16 = vsel %vm705_vm4, %v841_v20, %v7510_v30  ;;  %v7822_v20 = vperm.slane %v7486_v11, %v7520_v32 }
 0x141   : > { %v7728_v62 = vpop.permute.xlu1 %6176  ;;  %12484 = vst [vmem:[#allocation45_spill] sm:$0xff] %v7749_v40 }
 0x142   : > { %12476 = vst [vmem:[#allocation41_spill] sm:$0xff] %v7728_v62  ;;  %v12203_v59 = vunpack.i.h.bf16 %v7728_v62  ;;  %v12202_v60 = vunpack.i.l.bf16 %v7728_v62  ;;  %v853_v62 = vrot.slane %v7640_v39, 4 }
 0x143   : > { %12486 = vst [vmem:[#allocation46_spill] sm:$0xff] %v7758_v53  ;;  %v2728_v53 = vld [vmem:[#allocation2 + $0x92] sm:$0xff] }
 0x144   : > { %12487 = vst [vmem:[#allocation47_spill] sm:$0xff] %v7762_v21  ;;  %v7770_v35 = vsel %vm705_vm4, %v12203_v59, %v3546_v27  ;;  %v7777_v7 = vsel %vm705_vm4, %v12202_v60, %v3434_v50  ;;  %v7800_v50 = vrot.slane %v12494_v63, 4  ;;  %v1719_v60 = vld [vmem:[#allocation2 + $0x99] sm:$0xff]  ;;  %v743_v59 = vrot.slane %v7537_v13, 4 }
 0x145   : > { %6256 = vrot.lane.b32.xlu0 %v6245_v42, %s7013_s29  ;;  %12488 = vst [vmem:[#allocation48_spill] sm:$0xff] %v7770_v35  ;;  %v7794_v42 = vperm.slane %v1083_v52, %v7342_v57  ;;  %v855_v52 = vrot.slane %v7534_v9, 4  ;;  %v7812_v27 = vsel %vm705_vm4, %v7556_v36, %v12206_v17  ;;  %v1748_v63 = vrot.slane %v7691_v45, 4 }
 0x146   : > { %12489 = vst [vmem:[#allocation49_spill] sm:$0xff] %v7777_v7  ;;  %6236 = vrot.lane.b32.xlu2 %v6225_v58, %s7013_s29  ;;  %v730_v58 = vsel %vm705_vm4, %v729_v37, %v7489_v28  ;;  %v1746_v28 = vrot.slane %v1718_v8, 4  ;;  %v6230_v37 = vpack.i.bf16 %v1719_v60, %v1718_v8  ;;  %v7829_v36 = vperm.slane %v7499_v6, %v7342_v57  ;;  %v7844_v6 = vld [vmem:[#allocation2 + $0xaa] sm:$0xff] }
 0x147   : > { %12490 = vst [vmem:[#allocation50_spill] sm:$0xff] %v7781_v4  ;;  %v7825_v40 = vperm.slane %v730_v58, %v7342_v57  ;;  %v7832_v17 = vperm.slane %v842_v16, %v7342_v57  ;;  %v744_v30 = vsel %vm705_vm4, %v7638_v55, %v743_v59  ;;  %v856_v11 = vsel %vm705_vm4, %v7640_v39, %v855_v52  ;;  %v2729_v16 = vld [vmem:[#allocation2 + $0x9a] sm:$0xff] }
 0x148   : > { %12491 = vst [vmem:[#allocation51_spill] sm:$0xff] %v7784_v29  ;;  %v2758_v58 = vrot.slane %v7659_v33, 4  ;;  %v1858_v7 = vrot.slane %v1719_v60, 4  ;;  %6231 = vrot.lane.b32.xlu1 %v6230_v37, %s7012_s26  ;;  %v1747_v35 = vsel %vm705_vm4, %v1746_v28, %v7691_v45  ;;  %v1749_v56 = vsel %vm705_vm4, %v1718_v8, %v1748_v63 }
 0x149   : > { %12492 = vst [vmem:[#allocation52_spill] sm:$0xff] %v7791_v48  ;;  %v1861_v15 = vsel %vm705_vm4, %v1719_v60, %v1860_v61  ;;  %v6275_v59 = vpack.i.bf16 %v7817_v43, %v7844_v6  ;;  %v741_v52 = vrot.slane %v7638_v55, 4  ;;  %v2756_v41 = vrot.slane %v2728_v53, 4 }
 0x14a   : > { %12493 = vst [vmem:[#allocation53_spill] sm:$0xff] %v7794_v42  ;;  %v7857_v49 = vperm.slane %v744_v30, %v7342_v57  ;;  %v7860_v45 = vperm.slane %v856_v11, %v7342_v57  ;;  %v2870_v8 = vrot.slane %v7642_v46, 4  ;;  %v6250_v60 = vpack.i.bf16 %v2729_v16, %v2728_v53  ;;  %v1717_v11 = vld [vmem:[#allocation2 + $0x81] sm:$0xff] }
 0x14b   : > { %12495 = vst [vmem:[#allocation54_spill] sm:$0xff] %v7800_v50  ;;  %v1859_v50 = vsel %vm705_vm4, %v1858_v7, %v7674_v38  ;;  %v7865_v61 = vperm.slane %v1747_v35, %v7342_v57  ;;  %v7868_v55 = vperm.slane %v1749_v56, %v7342_v57  ;;  %v7871_v39 = vperm.slane %v1861_v15, %v7342_v57  ;;  %v1716_v35 = vld [vmem:[#allocation2 + $0x79] sm:$0xff] }
 0x14c   : > { %12496 = vst [vmem:[#allocation55_spill] sm:$0xff] %v7812_v27  ;;  %v2768_v38 = vrot.slane %v7844_v6, 4  ;;  %v7875_v7 = vperm.slane %v1859_v50, %v7342_v57  ;;  %v2880_v63 = vrot.slane %v7817_v43, 4  ;;  %v2759_v28 = vsel %vm705_vm4, %v2728_v53, %v2758_v58  ;;  %v1720_v50 = vld [vmem:[#allocation2 + $0xa9] sm:$0xff] }
 0x14d   : > { %6276 = vrot.lane.b32.xlu0 %v6275_v59, %s7012_s26  ;;  %v2868_v30 = vrot.slane %v2729_v16, 4  ;;  %v2757_v56 = vsel %vm705_vm4, %v2756_v41, %v7659_v33  ;;  %v742_v15 = vsel %vm705_vm4, %v741_v52, %v7537_v13  ;;  %v854_v42 = vsel %vm705_vm4, %v853_v62, %v7534_v9  ;;  %v7892_v13 = vld [vmem:[#allocation2 + $0x7a] sm:$0xff] }
 0x14e   : > { %6251 = vrot.lane.b32.xlu2 %v6250_v60, %s7012_s26  ;;  %v748_v10 = vperm.slane %v742_v15, %v7342_v57  ;;  %v779_v27 = vrot.slane %v7825_v40, 4  ;;  %v860_v53 = vperm.slane %v854_v42, %v7342_v57  ;;  %v891_v58 = vrot.slane %v7832_v17, 4 }
 0x14f   : > { %v2871_v29 = vsel %vm705_vm4, %v2729_v16, %v2870_v8  ;;  %v1760_v33 = vrot.slane %v1716_v35, 4  ;;  %v1872_v41 = vrot.slane %v1717_v11, 4  ;;  %v1758_v52 = vrot.slane %v1720_v50, 4 }
 0x150   : > { %6241 = vrot.lane.b32.xlu1 %v6230_v37, %s7013_s29  ;;  %v780_v62 = vsel %vm705_vm4, %v748_v10, %v779_v27  ;;  %v892_v9 = vsel %vm705_vm4, %v860_v53, %v891_v58  ;;  %v1870_v15 = vrot.slane %v1721_v44, 4  ;;  %v7897_v21 = vperm.slane %v2759_v28, %v7342_v57 }
 0x151   : > { %v2869_v42 = vsel %vm705_vm4, %v2868_v30, %v7642_v46  ;;  %v788_v16 = vperm.slane %v780_v62, %v7520_v32  ;;  %v900_v37 = vperm.slane %v892_v9, %v7520_v32  ;;  %v7904_v8 = vperm.slane %v2871_v29, %v7342_v57 }
 0x152   : > { %v7907_v27 = vpack.i.bf16 %v1717_v11, %v1716_v35  ;;  %v2769_v58 = vsel %vm705_vm4, %v2768_v38, %v7892_v13  ;;  %v12497_v28 = vrot.slane %v7541_v14, 4  ;;  %v12498_v46 = vrot.slane %v7548_v22, 4 }
 0x153   : > { %v7917_v62 = vpack.i.bf16 %v1721_v44, %v1720_v50  ;;  %v7920_v29 = vsel %vm705_vm4, %v1720_v50, %v1760_v33  ;;  %v1759_v9 = vsel %vm705_vm4, %v1758_v52, %v1716_v35  ;;  %v1871_v38 = vsel %vm705_vm4, %v1870_v15, %v1717_v11 }
 0x154   : > { %v808_v48 = vsel %vm705_vm4, %v788_v16, %v12497_v28  ;;  %v920_v30 = vsel %vm705_vm4, %v900_v37, %v12498_v46  ;;  %v7926_v4 = vsel %vm705_vm4, %v1721_v44, %v1872_v41  ;;  %v7928_v28 = vld [vmem:[#allocation2 + $0x82] sm:$0xff]  ;;  %v2770_v47 = vrot.slane %v7892_v13, 4 }
 0x155   : > { %6281 = vrot.lane.b32.xlu0 %v6275_v59, %s7013_s29  ;;  %v6285_v59 = vpack.i.bf16 %v920_v30, %v808_v48  ;;  %v7932_v46 = vperm.slane %v2769_v58, %v7342_v57  ;;  %v7936_v50 = vpack.i.bf16 %v7928_v28, %v7892_v13  ;;  %v917_v48 = vrot.slane %v900_v37, 4 }
 0x156   : > { %6261 = vrot.lane.b32.xlu2 %v6250_v60, %s7013_s29  ;;  %v805_v60 = vrot.slane %v788_v16, 4  ;;  %v777_v33 = vrot.slane %v748_v10, 4  ;;  %v889_v35 = vrot.slane %v860_v53, 4  ;;  %v791_v11 = vrot.slane %v7829_v36, 4 }
 0x157   : > { %v2881_v44 = vsel %vm705_vm4, %v2880_v63, %v7928_v28  ;;  %v789_v52 = vrot.slane %v7857_v49, 4  ;;  %v901_v15 = vrot.slane %v7860_v45, 4  ;;  %v7950_v10 = vsel %vm705_vm4, %v917_v48, %v7548_v22 }
 0x158   : > { %6286 = vrot.lane.b32.xlu1 %v6285_v59, %s7016_s16  ;;  %v7944_v41 = vsel %vm705_vm4, %v805_v60, %v7541_v14  ;;  %v778_v53 = vsel %vm705_vm4, %v777_v33, %v7825_v40  ;;  %v792_v16 = vsel %vm705_vm4, %v7857_v49, %v791_v11  ;;  %v903_v63 = vrot.slane %v7836_v5, 4 }
 0x159   : > { %v6315_v14 = vpack.i.bf16 %v7950_v10, %v7944_v41  ;;  %v890_v37 = vsel %vm705_vm4, %v889_v35, %v7832_v17  ;;  %v800_v58 = vperm.slane %v792_v16, %v7520_v32  ;;  %v790_v40 = vsel %vm705_vm4, %v789_v52, %v7829_v36 }
 0x15a   : > { %v904_v22 = vsel %vm705_vm4, %v7860_v45, %v903_v63  ;;  %v902_v49 = vsel %vm705_vm4, %v901_v15, %v7836_v5  ;;  %v2763_v30 = vperm.slane %v2757_v56, %v7342_v57  ;;  %v2887_v59 = vperm.slane %v2881_v44, %v7342_v57 }
 0x15b   : > { %v7973_v17 = vperm.slane %v778_v53, %v7520_v32  ;;  %v7978_v60 = vperm.slane %v890_v37, %v7520_v32  ;;  %v813_v45 = vrot.slane %v800_v58, 4  ;;  %v912_v48 = vperm.slane %v904_v22, %v7520_v32 }
 0x15c   : > { %v796_v36 = vperm.slane %v790_v40, %v7520_v32  ;;  %v908_v5 = vperm.slane %v902_v49, %v7520_v32  ;;  %v12501_v56 = vrot.slane %v7577_v0, 4  ;;  %v2806_v35 = vrot.slane %v2763_v30, 4 }
 0x15d   : > { %6291 = vrot.lane.b32.xlu0 %v7907_v27, %s7012_s26  ;;  %12499 = vst [vmem:[#allocation56_spill] sm:$0xff] %v7973_v17  ;;  %v2875_v11 = vperm.slane %v2869_v42, %v7342_v57  ;;  %v7991_v44 = vsel %vm705_vm4, %v813_v45, %v7577_v0  ;;  %v925_v52 = vrot.slane %v912_v48, 4  ;;  %v12502_v15 = vrot.slane %v7605_v24, 4 }
 0x15e   : > { %6266 = vrot.lane.b32.xlu2 %v7917_v62, %s7012_s26  ;;  %12500 = vst [vmem:[#allocation57_spill] sm:$0xff] %v7978_v60  ;;  %v7986_v33 = vsel %vm705_vm4, %v800_v58, %v12501_v56  ;;  %v12503_v16 = vrot.slane %v7588_v54, 4  ;;  %v12504_v42 = vrot.slane %v7610_v19, 4  ;;  %v2807_v58 = vsel %vm705_vm4, %v7932_v46, %v2806_v35 }
 0x15f   : > { %v7996_v53 = vsel %vm705_vm4, %v796_v36, %v12502_v15  ;;  %v2918_v22 = vrot.slane %v2875_v11, 4  ;;  %v8016_v40 = vsel %vm705_vm4, %v925_v52, %v7588_v54  ;;  %v8021_v45 = vperm.slane %v2807_v58, %v7520_v32 }
 0x160   : > { %v8001_v63 = vsel %vm705_vm4, %v912_v48, %v12503_v16  ;;  %6301 = vrot.lane.b32.xlu1 %v7936_v50, %s7012_s26  ;;  %v8008_v37 = vsel %vm705_vm4, %v908_v5, %v12504_v42  ;;  %v1765_v48 = vperm.slane %v1759_v9, %v7342_v57  ;;  %v1796_v35 = vrot.slane %v7865_v61, 4 }
 0x161   : > { %v2919_v15 = vsel %vm705_vm4, %v2887_v59, %v2918_v22  ;;  %v1877_v16 = vperm.slane %v1871_v38, %v7342_v57  ;;  %v12505_v54 = vrot.slane %v7594_v2, 4  ;;  %v1908_v42 = vrot.slane %v7875_v7, 4 }
 0x162   : > { %v8038_v9 = vperm.slane %v2919_v15, %v7520_v32  ;;  %v809_v58 = vrot.slane %v796_v36, 4  ;;  %v1797_v22 = vsel %vm705_vm4, %v1765_v48, %v1796_v35  ;;  %v921_v0 = vrot.slane %v908_v5, 4 }
 0x163   : > { %v8035_v52 = vsel %vm705_vm4, %v8021_v45, %v12505_v54  ;;  %v2804_v38 = vrot.slane %v7932_v46, 4  ;;  %v2916_v49 = vrot.slane %v2887_v59, 4  ;;  %v1805_v15 = vperm.slane %v1797_v22, %v7520_v32 }
 0x164   : > { %v1909_v56 = vsel %vm705_vm4, %v1877_v16, %v1908_v42  ;;  %v8055_v36 = vsel %vm705_vm4, %v809_v58, %v7605_v24  ;;  %v12507_v35 = vrot.slane %v7573_v26, 4  ;;  %v12513_v41 = vrot.slane %v7615_v18, 4 }
 0x165   : > { %6296 = vrot.lane.b32.xlu0 %v7907_v27, %s7013_s29  ;;  %v12506_v27 = vrot.slane %v7620_v12, 4  ;;  %v1917_v59 = vperm.slane %v1909_v56, %v7520_v32  ;;  %v2805_v5 = vsel %vm705_vm4, %v2804_v38, %v2763_v30  ;;  %v1822_v22 = vrot.slane %v1805_v15, 4 }
 0x166   : > { %6271 = vrot.lane.b32.xlu2 %v7917_v62, %s7013_s29  ;;  %v8062_v62 = vsel %vm705_vm4, %v921_v0, %v7610_v19  ;;  %v916_v42 = vsel %vm705_vm4, %v7978_v60, %v12507_v35  ;;  %v2917_v58 = vsel %vm705_vm4, %v2916_v49, %v2875_v11  ;;  %v1794_v0 = vrot.slane %v1765_v48, 4 }
 0x167   : > { %v8049_v54 = vsel %vm705_vm4, %v8038_v9, %v12506_v27  ;;  %v6335_v24 = vpack.i.bf16 %v8062_v62, %v8055_v36  ;;  %v1934_v56 = vrot.slane %v1917_v59, 4  ;;  %v8075_v19 = vperm.slane %v2917_v58, %v7520_v32  ;;  %v12533_v62 = vld [vmem:[#allocation47_spill] sm:$0xff] }
 0x168   : > { %v6345_v46 = vpack.i.bf16 %v8049_v54, %v8035_v52  ;;  %6306 = vrot.lane.b32.xlu1 %v7936_v50, %s7013_s29  ;;  %v1906_v30 = vrot.slane %v1877_v16, 4  ;;  %v8079_v38 = vperm.slane %v7920_v29, %v7342_v57  ;;  %v8083_v27 = vperm.slane %v7926_v4, %v7342_v57 }
 0x169   : > { %12508 = vst [vmem:[#allocation58_spill] sm:$0xff] %v8075_v19  ;;  %v12509_v35 = vrot.slane %v7564_v3, 4  ;;  %v8090_v50 = vperm.slane %v2805_v5, %v7520_v32  ;;  %v2882_v49 = vrot.slane %v7928_v28, 4  ;;  %v8095_v16 = vsel %vm705_vm4, %v1822_v22, %v7615_v18 }
 0x16a   : > { %v8099_v29 = vsel %vm705_vm4, %v1934_v56, %v7683_v34  ;;  %v12511_v28 = vrot.slane %v7695_v23, 4  ;;  %v1907_v22 = vsel %vm705_vm4, %v1906_v30, %v7875_v7  ;;  %v8123_v10 = vsel %vm705_vm4, %v1805_v15, %v12513_v41 }
 0x16b   : > { %v804_v11 = vsel %vm705_vm4, %v7973_v17, %v12509_v35  ;;  %12510 = vst [vmem:[#allocation59_spill] sm:$0xff] %v8090_v50  ;;  %v6355_v4 = vpack.i.bf16 %v8099_v29, %v8095_v16  ;;  %v8118_v58 = vperm.slane %v1907_v22, %v7520_v32  ;;  %v12515_v7 = vrot.slane %v7624_v31, 4  ;;  %v8160_v35 = vpop.permute.xlu0 %6101 }
 0x16c   : > { %v6310_v48 = vpack.i.bf16 %v916_v42, %v804_v11  ;;  %v8111_v5 = vsel %vm705_vm4, %v8075_v19, %v12511_v28  ;;  %v1795_v42 = vsel %vm705_vm4, %v1794_v0, %v7865_v61  ;;  %v2771_v61 = vsel %vm705_vm4, %v7844_v6, %v2770_v47  ;;  %v12608_v19 = vld [vmem:[#allocation38_spill] sm:$0xff] }
 0x16d   : > { %6316 = vrot.lane.b32.xlu0 %v6315_v14, %s7017_s17  ;;  %12512 = vst [vmem:[#allocation60_spill] sm:$0xff] %v8118_v58  ;;  %v12514_v14 = vrot.slane %v7683_v34, 4  ;;  %v8139_v18 = vsel %vm705_vm4, %v8090_v50, %v12515_v7  ;;  %v8144_v15 = vperm.slane %v2771_v61, %v7342_v57  ;;  %v2818_v13 = vrot.slane %v7897_v21, 4 }
 0x16e   : > { %6311 = vrot.lane.b32.xlu2 %v6310_v48, %s7018_s18  ;;  %v6365_v47 = vpack.i.bf16 %v8111_v5, %v8139_v18  ;;  %v8150_v6 = vperm.slane %v1795_v42, %v7520_v32  ;;  %v2883_v30 = vsel %vm705_vm4, %v7817_v43, %v2882_v49  ;;  %v2930_v16 = vrot.slane %v7904_v8, 4  ;;  %v12549_v18 = vld [vmem:[#allocation25_spill] sm:$0xff] }
 0x16f   : > { %v8128_v56 = vsel %vm705_vm4, %v1917_v59, %v12514_v14  ;;  %v12517_v59 = vrot.slane %v7735_v25, 4  ;;  %v2819_v11 = vsel %vm705_vm4, %v8144_v15, %v2818_v13  ;;  %v8165_v48 = vperm.slane %v2883_v30, %v7342_v57  ;;  %v12570_v25 = vld [vmem:[#allocation29_spill] sm:$0xff] }
 0x170   : > { %v6340_v34 = vpack.i.bf16 %v8128_v56, %v8123_v10  ;;  %12516 = vst [vmem:[#allocation61_spill] sm:$0xff] %v8150_v6  ;;  %v1808_v29 = vrot.slane %v7868_v55, 4  ;;  %v12518_v28 = vpack.i.bf16 %v8016_v40, %v7991_v44  ;;  %v2827_v43 = vperm.slane %v2819_v11, %v7520_v32 }
 0x171   : > { %v8156_v0 = vsel %vm705_vm4, %v8118_v58, %v12517_v59  ;;  %v1920_v49 = vrot.slane %v7871_v39, 4  ;;  %v1944_v42 = vrot.slane %v7822_v20, 4  ;;  %v2832_v22 = vrot.slane %v8021_v45, 4 }
 0x172   : > { %6331 = vrot.lane.b32.xlu1 %v12518_v28, %s7019_s19  ;;  %v2931_v41 = vsel %vm705_vm4, %v8165_v48, %v2930_v16  ;;  %v1809_v14 = vsel %vm705_vm4, %v8079_v38, %v1808_v29  ;;  %v2944_v61 = vrot.slane %v8038_v9, 4  ;;  %v1782_v7 = vrot.slane %v7462_v1, 4  ;;  %v12521_v16 = vld [vmem:[#allocation9_spill] sm:$0xff]  ;;  %v12522_v28 = vld [vmem:[#allocation50_spill] sm:$0xff] }
 0x173   : > { %v12519_v44 = vrot.slane %v7712_v51, 4  ;;  %v2939_v13 = vperm.slane %v2931_v41, %v7520_v32  ;;  %v1817_v59 = vperm.slane %v1809_v14, %v7520_v32  ;;  %v1921_v45 = vsel %vm705_vm4, %v8083_v27, %v1920_v49 }
 0x174   : > { %v12520_v30 = vpack.i.bf16 %v8008_v37, %v7996_v53  ;;  %v1929_v1 = vperm.slane %v1921_v45, %v7520_v32  ;;  %v8199_v9 = vsel %vm705_vm4, %v2832_v22, %v7594_v2  ;;  %v8203_v11 = vsel %vm705_vm4, %v2944_v61, %v7620_v12  ;;  %v12524_v53 = vld [vmem:[#allocation52_spill] sm:$0xff]  ;;  %v12527_v45 = vld [vmem:[#allocation15_spill] sm:$0xff] }
 0x175   : > { %v8186_v40 = vsel %vm705_vm4, %v2827_v43, %v12519_v44  ;;  %v1783_v29 = vsel %vm705_vm4, %v1782_v7, %v12521_v16  ;;  %v12523_v49 = vrot.slane %v12522_v28, 4  ;;  %v12525_v37 = vrot.slane %v12524_v53, 4 }
 0x176   : > { %6326 = vrot.lane.b32.xlu0 %v12520_v30, %s7020_s20  ;;  %v1789_v22 = vperm.slane %v1783_v29, %v7520_v32  ;;  %v12526_v12 = vpack.i.bf16 %v8001_v63, %v7986_v33  ;;  %v8227_v7 = vsel %vm705_vm4, %v1929_v1, %v1944_v42  ;;  %v1806_v44 = vrot.slane %v8079_v38, 4  ;;  %v12528_v63 = vld [vmem:[#allocation11_spill] sm:$0xff] }
 0x177   : > { %v8210_v41 = vsel %vm705_vm4, %v2939_v13, %v12523_v49  ;;  %v8215_v14 = vsel %vm705_vm4, %v1817_v59, %v12525_v37  ;;  %v1894_v30 = vrot.slane %v12527_v45, 4  ;;  %v1918_v49 = vrot.slane %v8083_v27, 4 }
 0x178   : > { %6321 = vrot.lane.b32.xlu2 %v12526_v12, %s7021_s21  ;;  %v6375_v61 = vpack.i.bf16 %v8210_v41, %v8186_v40  ;;  %v1828_v29 = vrot.slane %v1789_v22, 4  ;;  %v2840_v37 = vrot.slane %v2827_v43, 4  ;;  %v1807_v33 = vsel %vm705_vm4, %v1806_v44, %v7868_v55  ;;  %v8247_v43 = vpop.permute.xlu0 %6116 }
 0x179   : > { %v1895_v12 = vsel %vm705_vm4, %v1894_v30, %v12528_v63  ;;  %v2952_v2 = vrot.slane %v2939_v13, 4  ;;  %v1830_v42 = vrot.slane %v1817_v59, 4  ;;  %v1813_v38 = vperm.slane %v1807_v33, %v7520_v32  ;;  %v12529_v30 = vld [vmem:[#allocation6_spill] sm:$0xff]  ;;  %v12531_v33 = vld [vmem:[#allocation5_spill] sm:$0xff] }
 0x17a   : > { %6356 = vrot.lane.b32.xlu1 %v6355_v4, %s7017_s17  ;;  %v1901_v45 = vperm.slane %v1895_v12, %v7520_v32  ;;  %v1919_v16 = vsel %vm705_vm4, %v1918_v49, %v7871_v39  ;;  %v8245_v27 = vsel %vm705_vm4, %v2840_v37, %v7712_v51  ;;  %v1942_v59 = vrot.slane %v1929_v1, 4  ;;  %v12554_v37 = vld [vmem:[#allocation13_spill] sm:$0xff] }
 0x17b   : > { %v1925_v55 = vperm.slane %v1919_v16, %v7520_v32  ;;  %v8252_v13 = vsel %vm705_vm4, %v2952_v2, %v12522_v28  ;;  %v8256_v4 = vsel %vm705_vm4, %v1830_v42, %v12524_v53  ;;  %v8259_v44 = vsel %vm705_vm4, %v1813_v38, %v1828_v29  ;;  %v12530_v53 = vld [vmem:[#allocation12_spill] sm:$0xff] }
 0x17c   : > { %v1940_v39 = vrot.slane %v1901_v45, 4  ;;  %v2792_v49 = vrot.slane %v12529_v30, 4  ;;  %v8270_v28 = vsel %vm705_vm4, %v1942_v59, %v7822_v20  ;;  %v2816_v1 = vrot.slane %v8144_v15, 4 }
 0x17d   : > { %v2904_v2 = vrot.slane %v12530_v53, 4  ;;  %v2928_v16 = vrot.slane %v8165_v48, 4  ;;  %v1826_v54 = vrot.slane %v1813_v38, 4  ;;  %v12532_v48 = vld [vmem:[#allocation8_spill] sm:$0xff]  ;;  %v1938_v30 = vrot.slane %v1925_v55, 4 }
 0x17e   : > { %6346 = vrot.lane.b32.xlu0 %v6345_v46, %s7016_s16  ;;  %v8276_v29 = vsel %vm705_vm4, %v1925_v55, %v1940_v39  ;;  %v2793_v52 = vsel %vm705_vm4, %v2792_v49, %v12531_v33  ;;  %v2817_v15 = vsel %vm705_vm4, %v2816_v1, %v7897_v21  ;;  %v12535_v49 = vunpack.i.l.bf16 %v12533_v62  ;;  %v12536_v53 = vld [vmem:[#allocation32_spill] sm:$0xff] }
 0x17f   : > { %v2799_v46 = vperm.slane %v2793_v52, %v7520_v32  ;;  %v2905_v63 = vsel %vm705_vm4, %v2904_v2, %v12532_v48  ;;  %v2823_v12 = vperm.slane %v2817_v15, %v7520_v32  ;;  %v2929_v38 = vsel %vm705_vm4, %v2928_v16, %v7904_v8  ;;  %v12538_v15 = vld [vmem:[#allocation16_spill] sm:$0xff] }
 0x180   : > { %6336 = vrot.lane.b32.xlu2 %v6335_v24, %s7022_s22  ;;  %v2911_v42 = vperm.slane %v2905_v63, %v7520_v32  ;;  %v8298_v36 = vsel %vm705_vm4, %v1826_v54, %v1789_v22  ;;  %v12534_v24 = vunpack.i.h.bf16 %v12533_v62  ;;  %v2935_v39 = vperm.slane %v2929_v38, %v7520_v32 }
 0x181   : > { %v2838_v21 = vrot.slane %v2799_v46, 4  ;;  %v1414_v1 = vrot.slane %v12535_v49, 4  ;;  %v12537_v8 = vrot.slane %v12536_v53, 4  ;;  %v2836_v2 = vrot.slane %v2823_v12, 4 }
 0x182   : > { %v1526_v59 = vrot.slane %v12534_v24, 4  ;;  %6366 = vrot.lane.b32.xlu1 %v6365_v47, %s7018_s18  ;;  %v2950_v16 = vrot.slane %v2911_v42, 4  ;;  %v2948_v52 = vrot.slane %v2935_v39, 4  ;;  %v8315_v55 = vsel %vm705_vm4, %v1938_v30, %v1901_v45  ;;  %v8331_v45 = vpop.permute.xlu0 %6136  ;;  %v12540_v24 = vld [vmem:[#allocation23_spill] sm:$0xff] }
 0x183   : > { %v1821_v22 = vsel %vm705_vm4, %v8150_v6, %v12537_v8  ;;  %v8318_v54 = vsel %vm705_vm4, %v2823_v12, %v2838_v21  ;;  %v6124_v48 = vunpack.i.h.bf16 %v12538_v15  ;;  %v8322_v5 = vsel %vm705_vm4, %v2836_v2, %v2799_v46  ;;  %v12541_v21 = vld [vmem:[#allocation27_spill] sm:$0xff] }
 0x184   : > { %v6350_v33 = vpack.i.bf16 %v8156_v0, %v1821_v22  ;;  %v8327_v47 = vsel %vm705_vm4, %v2935_v39, %v2950_v16  ;;  %v6123_v0 = vunpack.i.l.bf16 %v12538_v15  ;;  %v6104_v63 = vunpack.i.h.bf16 %v8160_v35  ;;  %v12543_v2 = vld [vmem:[#allocation51_spill] sm:$0xff]  ;;  %v12544_v16 = vld [vmem:[#allocation14_spill] sm:$0xff] }
 0x185   : > { %v8335_v12 = vsel %vm705_vm4, %v2948_v52, %v2911_v42  ;;  %v12539_v38 = vmov %v12535_v49  ;;  %v6103_v30 = vunpack.i.l.bf16 %v8160_v35  ;;  %v12542_v49 = vunpack.i.l.bf16 %v12541_v21  ;;  %v12545_v52 = vld [vmem:[#allocation7_spill] sm:$0xff] }
 0x186   : > { %6351 = vrot.lane.b32.xlu0 %v6350_v33, %s7018_s18  ;;  %v1413_v39 = vsel %vm705_vm4, %v12540_v24, %v12539_v38  ;;  %v6109_v33 = vunpack.i.h.bf16 %v12544_v16  ;;  %v12546_v15 = vunpack.i.h.bf16 %v12545_v52  ;;  %v12547_v46 = vunpack.i.l.bf16 %v12545_v52  ;;  %v12548_v24 = vld [vmem:[#allocation55_spill] sm:$0xff] }
 0x187   : > { %v8346_v8 = vrot.slane %v12542_v49, 4  ;;  %v6108_v35 = vunpack.i.l.bf16 %v12544_v16  ;;  %v8365_v49 = vperm.slane %v12548_v24, %v7342_v57  ;;  %v2204_v42 = vrot.slane %v6124_v48, 4 }
 0x188   : > { %v1527_v62 = vsel %vm705_vm4, %v12546_v15, %v1526_v59  ;;  %v1415_v38 = vsel %vm705_vm4, %v12547_v46, %v1414_v1  ;;  %6341 = vrot.lane.b32.xlu2 %v6340_v34, %s7016_s16  ;;  %v2207_v22 = vsel %vm705_vm4, %v6124_v48, %v12549_v18  ;;  %v8370_v59 = vperm.slane %v1413_v39, %v7342_v57  ;;  %v12550_v1 = vld [vmem:[#allocation26_spill] sm:$0xff]  ;;  %v12551_v34 = vld [vmem:[#allocation43_spill] sm:$0xff]  ;;  %v12552_v48 = vld [vmem:[#allocation53_spill] sm:$0xff] }
 0x189   : > { %v2092_v52 = vrot.slane %v6123_v0, 4  ;;  %v2095_v46 = vsel %vm705_vm4, %v6123_v0, %v12550_v1  ;;  %v1536_v15 = vrot.slane %v6104_v63, 4  ;;  %v8375_v10 = vperm.slane %v1527_v62, %v7342_v57 }
 0x18a   : > { %v8378_v56 = vperm.slane %v1415_v38, %v7342_v57  ;;  %v1539_v16 = vsel %vm705_vm4, %v6104_v63, %v12551_v34  ;;  %v1424_v24 = vrot.slane %v6103_v30, 4  ;;  %6376 = vrot.lane.b32.xlu1 %v6375_v61, %s7021_s21  ;;  %v2194_v39 = vrot.slane %v6109_v33, 4  ;;  %v12558_v61 = vld [vmem:[#allocation10_spill] sm:$0xff] }
 0x18b   : > { %v8388_v0 = vperm.slane %v2207_v22, %v7342_v57  ;;  %v6119_v62 = vunpack.i.h.bf16 %v8247_v43  ;;  %v2082_v1 = vrot.slane %v6108_v35, 4  ;;  %v12555_v51 = vunpack.i.h.bf16 %v12554_v37 }
 0x18c   : > { %v8396_v34 = vperm.slane %v2095_v46, %v7342_v57  ;;  %v12557_v40 = vunpack.i.l.bf16 %v12554_v37  ;;  %v12559_v18 = vunpack.i.h.bf16 %v12558_v61  ;;  %v8405_v20 = vperm.slane %v1539_v16, %v7342_v57 }
 0x18d   : > { %12553 = vst [vmem:[#allocation9_spill] sm:$0xff] %v8388_v0  ;;  %v2205_v63 = vsel %vm705_vm4, %v2204_v42, %v12555_v51  ;;  %v6118_v38 = vunpack.i.l.bf16 %v8247_v43  ;;  %v12560_v51 = vpack.i.bf16 %v8227_v7, %v8215_v14  ;;  %v12561_v46 = vunpack.i.l.bf16 %v12558_v61  ;;  %v8424_v7 = vpop.permute.xlu0 %6151 }
 0x18e   : > { %12556 = vst [vmem:[#allocation50_spill] sm:$0xff] %v8396_v34  ;;  %v2093_v41 = vsel %vm705_vm4, %v2092_v52, %v12557_v40  ;;  %v1537_v22 = vsel %vm705_vm4, %v1536_v15, %v12559_v18  ;;  %v8419_v16 = vperm.slane %v2205_v63, %v7342_v57  ;;  %v12562_v18 = vld [vmem:[#allocation44_spill] sm:$0xff]  ;;  %v2192_v14 = vrot.slane %v6119_v62, 4 }
 0x18f   : > { %6361 = vrot.lane.b32.xlu0 %v12560_v51, %s7021_s21  ;;  %v1425_v15 = vsel %vm705_vm4, %v1424_v24, %v12561_v46  ;;  %v1427_v40 = vsel %vm705_vm4, %v6103_v30, %v12562_v18  ;;  %v12563_v51 = vpack.i.bf16 %v8203_v11, %v8199_v9  ;;  %v8431_v61 = vperm.slane %v2093_v41, %v7342_v57  ;;  %v12564_v46 = vld [vmem:[#allocation21_spill] sm:$0xff]  ;;  %v8443_v9 = vpop.permute.xlu2 %6181  ;;  %v12566_v30 = vld [vmem:[#allocation18_spill] sm:$0xff] }
 0x190   : > { %v8435_v63 = vperm.slane %v1537_v22, %v7342_v57  ;;  %v6144_v43 = vunpack.i.h.bf16 %v12564_v46  ;;  %v8440_v18 = vperm.slane %v1425_v15, %v7342_v57  ;;  %v2080_v42 = vrot.slane %v6118_v38, 4 }
 0x191   : > { %6371 = vrot.lane.b32.xlu2 %v12563_v51, %s7017_s17  ;;  %v6143_v52 = vunpack.i.l.bf16 %v12564_v46  ;;  %v8446_v11 = vperm.slane %v1427_v40, %v7342_v57  ;;  %v2195_v41 = vsel %vm705_vm4, %v6119_v62, %v2194_v39  ;;  %v2083_v22 = vsel %vm705_vm4, %v6118_v38, %v2082_v1 }
 0x192   : > { %v6139_v51 = vunpack.i.h.bf16 %v8331_v45  ;;  %v12565_v24 = vpack.i.bf16 %v8276_v29, %v8259_v44  ;;  %v6129_v46 = vunpack.i.h.bf16 %v12566_v30  ;;  %v2193_v37 = vsel %vm705_vm4, %v2192_v14, %v6109_v33  ;;  %v12573_v14 = vld [vmem:[#allocation17_spill] sm:$0xff] }
 0x193   : > { %v6138_v40 = vunpack.i.l.bf16 %v8331_v45  ;;  %v6128_v62 = vunpack.i.l.bf16 %v12566_v30  ;;  %v2546_v1 = vrot.slane %v6144_v43, 4  ;;  %v8463_v38 = vperm.slane %v2195_v41, %v7342_v57 }
 0x194   : > { %6381 = vrot.lane.b32.xlu1 %v12565_v24, %s7020_s20  ;;  %v2081_v44 = vsel %vm705_vm4, %v2080_v42, %v6108_v35  ;;  %v8467_v29 = vperm.slane %v2083_v22, %v7342_v57  ;;  %v2434_v24 = vrot.slane %v6143_v52, 4  ;;  %v12569_v45 = vpack.i.bf16 %v8252_v13, %v8245_v27  ;;  %v12571_v42 = vld [vmem:[#allocation30_spill] sm:$0xff] }
 0x195   : > { %12567 = vst [vmem:[#allocation52_spill] sm:$0xff] %v8463_v38  ;;  %v8476_v30 = vperm.slane %v2193_v37, %v7342_v57  ;;  %v2534_v41 = vrot.slane %v6139_v51, 4  ;;  %v2536_v15 = vrot.slane %v6129_v46, 4  ;;  %v2549_v35 = vsel %vm705_vm4, %v6144_v43, %v12570_v25  ;;  %v12575_v25 = vld [vmem:[#allocation31_spill] sm:$0xff] }
 0x196   : > { %12568 = vst [vmem:[#allocation15_spill] sm:$0xff] %v8467_v29  ;;  %v2437_v22 = vsel %vm705_vm4, %v6143_v52, %v12571_v42  ;;  %v2422_v39 = vrot.slane %v6138_v40, 4  ;;  %v12572_v27 = vpack.i.bf16 %v8270_v28, %v8256_v4  ;;  %v8489_v37 = vperm.slane %v2081_v44, %v7342_v57  ;;  %v12600_v42 = vld [vmem:[#allocation41_spill] sm:$0xff] }
 0x197   : > { %6396 = vrot.lane.b32.xlu0 %v12569_v45, %s7019_s19  ;;  %v2424_v45 = vrot.slane %v6128_v62, 4  ;;  %v12574_v33 = vunpack.i.h.bf16 %v12573_v14  ;;  %v6159_v43 = vunpack.i.h.bf16 %v12575_v25  ;;  %v12576_v23 = vunpack.i.l.bf16 %v12573_v14  ;;  %v8503_v44 = vpop.permute.xlu2 %6216 }
 0x198   : > { %v6158_v28 = vunpack.i.l.bf16 %v12575_v25  ;;  %v2535_v52 = vsel %vm705_vm4, %v2534_v41, %v6129_v46  ;;  %v2537_v14 = vsel %vm705_vm4, %v6139_v51, %v2536_v15  ;;  %v2423_v25 = vsel %vm705_vm4, %v2422_v39, %v6128_v62 }
 0x199   : > { %6386 = vrot.lane.b32.xlu2 %v12572_v27, %s7019_s19  ;;  %v2547_v53 = vsel %vm705_vm4, %v2546_v1, %v12574_v33  ;;  %v2435_v4 = vsel %vm705_vm4, %v2434_v24, %v12576_v23  ;;  %v8501_v27 = vpop.permute.xlu0 %6171  ;;  %v8507_v1 = vperm.slane %v2549_v35, %v7342_v57  ;;  %v8510_v33 = vperm.slane %v2437_v22, %v7342_v57 }
 0x19a   : > { %v8486_v13 = vpop.permute.xlu1 %6186  ;;  %v12579_v23 = vpack.i.bf16 %v8335_v12, %v8322_v5  ;;  %v8518_v24 = vperm.slane %v2547_v53, %v7342_v57  ;;  %v6154_v35 = vunpack.i.h.bf16 %v8424_v7  ;;  %v8525_v22 = vperm.slane %v2435_v4, %v7342_v57  ;;  %v12583_v12 = vld [vmem:[#allocation39_spill] sm:$0xff] }
 0x19b   : > { %12577 = vst [vmem:[#allocation11_spill] sm:$0xff] %v8507_v1  ;;  %v2425_v46 = vsel %vm705_vm4, %v6138_v40, %v2424_v45  ;;  %v3202_v41 = vrot.slane %v6159_v43, 4  ;;  %v8529_v5 = vperm.slane %v2535_v52, %v7342_v57  ;;  %v3205_v53 = vsel %vm705_vm4, %v6159_v43, %v12583_v12 }
 0x19c   : > { %12578 = vst [vmem:[#allocation6_spill] sm:$0xff] %v8510_v33  ;;  %6406 = vrot.lane.b32.xlu1 %v12579_v23, %s7022_s22  ;;  %v3090_v23 = vrot.slane %v6158_v28, 4  ;;  %v6153_v51 = vunpack.i.l.bf16 %v8424_v7  ;;  %v12584_v15 = vpack.i.bf16 %v8315_v55, %v8298_v36  ;;  %v8541_v40 = vperm.slane %v2537_v14, %v7342_v57  ;;  %v12588_v7 = vld [vmem:[#allocation40_spill] sm:$0xff]  ;;  %v12589_v36 = vld [vmem:[#allocation54_spill] sm:$0xff] }
 0x19d   : > { %12580 = vst [vmem:[#allocation12_spill] sm:$0xff] %v8518_v24  ;;  %v8544_v45 = vperm.slane %v2423_v25, %v7342_v57  ;;  %v8548_v52 = vperm.slane %v2425_v46, %v7342_v57  ;;  %v3093_v4 = vsel %vm705_vm4, %v6158_v28, %v12588_v7  ;;  %v3215_v55 = vsel %vm705_vm4, %v12589_v36, %v6154_v35 }
 0x19e   : > { %12581 = vst [vmem:[#allocation5_spill] sm:$0xff] %v8525_v22  ;;  %v12590_v12 = vpack.i.bf16 %v8327_v47, %v8318_v54  ;;  %v8565_v62 = vperm.slane %v3205_v53, %v7342_v57  ;;  %v3216_v28 = vrot.slane %v6154_v35, 4  ;;  %v3104_v54 = vrot.slane %v6153_v51, 4 }
 0x19f   : > { %12582 = vst [vmem:[#allocation8_spill] sm:$0xff] %v8529_v5  ;;  %6401 = vrot.lane.b32.xlu0 %v12584_v15, %s7022_s22  ;;  %v12591_v15 = vld [vmem:[#allocation20_spill] sm:$0xff]  ;;  %v6184_v47 = vunpack.i.h.bf16 %v8443_v9  ;;  %v8580_v35 = vperm.slane %v3215_v55, %v7342_v57  ;;  %v12598_v55 = vunpack.i.h.bf16 %v12541_v21  ;;  %v12601_v3 = vunpack.i.h.bf16 %v12600_v42 }
 0x1a0   : > { %12585 = vst [vmem:[#allocation47_spill] sm:$0xff] %v8541_v40  ;;  %v12592_v39 = vunpack.i.h.bf16 %v12591_v15  ;;  %v12594_v36 = vunpack.i.l.bf16 %v12591_v15  ;;  %v6183_v15 = vunpack.i.l.bf16 %v8443_v9  ;;  %v6174_v9 = vunpack.i.h.bf16 %v8501_v27 }
 0x1a1   : > { %12586 = vst [vmem:[#allocation16_spill] sm:$0xff] %v8544_v45  ;;  %6391 = vrot.lane.b32.xlu2 %v12590_v12, %s7020_s20  ;;  %v8572_v12 = vpop.permute.xlu0 %6191  ;;  %v3217_v7 = vsel %vm705_vm4, %v12598_v55, %v3216_v28  ;;  %v3544_v58 = vrot.slane %v12601_v3, 4  ;;  %v12602_v28 = vunpack.i.l.bf16 %v12600_v42  ;;  %v6188_v17 = vunpack.i.l.bf16 %v8486_v13 }
 0x1a2   : > { %12587 = vst [vmem:[#allocation23_spill] sm:$0xff] %v8548_v52  ;;  %v8558_v14 = vpop.permute.xlu1 %6196  ;;  %v3203_v46 = vsel %vm705_vm4, %v3202_v41, %v12592_v39  ;;  %v3091_v43 = vsel %vm705_vm4, %v3090_v23, %v12594_v36  ;;  %v8577_v41 = vperm.slane %v3093_v4, %v7342_v57  ;;  %v3103_v23 = vsel %vm705_vm4, %v8346_v8, %v6153_v51  ;;  %v8589_v36 = vpop.permute.xlu2 %6221 }
 0x1a3   : > { %12593 = vst [vmem:[#allocation27_spill] sm:$0xff] %v8565_v62  ;;  %v8584_v39 = vperm.slane %v3203_v46, %v7342_v57  ;;  %v8593_v4 = vperm.slane %v3091_v43, %v7342_v57  ;;  %v12599_v46 = vunpack.i.l.bf16 %v12541_v21  ;;  %v3556_v8 = vrot.slane %v6184_v47, 4 }
 0x1a4   : > { %12595 = vst [vmem:[#allocation51_spill] sm:$0xff] %v8577_v41  ;;  %v3432_v55 = vrot.slane %v12602_v28, 4  ;;  %v8612_v21 = vperm.slane %v3103_v23, %v7342_v57  ;;  %v8617_v25 = vperm.slane %v3217_v7, %v7342_v57  ;;  %v12606_v3 = vunpack.i.l.bf16 %v8572_v12 }
 0x1a5   : > { %12596 = vst [vmem:[#allocation14_spill] sm:$0xff] %v8580_v35  ;;  %v3105_v31 = vsel %vm705_vm4, %v12599_v46, %v3104_v54  ;;  %v3444_v54 = vrot.slane %v6183_v15, 4  ;;  %v6173_v46 = vunpack.i.l.bf16 %v8501_v27  ;;  %v3557_v53 = vsel %vm705_vm4, %v3556_v8, %v6174_v9 }
 0x1a6   : > { %12597 = vst [vmem:[#allocation7_spill] sm:$0xff] %v8584_v39  ;;  %v8620_v43 = vperm.slane %v3105_v31, %v7342_v57  ;;  %v1094_v42 = vrot.slane %v12606_v3, 4  ;;  %v12607_v23 = vunpack.i.h.bf16 %v8572_v12  ;;  %v12609_v7 = vunpack.i.h.bf16 %v12608_v19 }
 0x1a7   : > { %12603 = vst [vmem:[#allocation55_spill] sm:$0xff] %v8612_v21  ;;  %v12610_v31 = vunpack.i.l.bf16 %v12608_v19  ;;  %v3558_v3 = vrot.slane %v6174_v9, 4  ;;  %v3445_v8 = vsel %vm705_vm4, %v3444_v54, %v6173_v46  ;;  %v6189_v60 = vunpack.i.h.bf16 %v8486_v13 }
 0x1a8   : > { %12604 = vst [vmem:[#allocation25_spill] sm:$0xff] %v8617_v25  ;;  %v1206_v6 = vrot.slane %v12607_v23, 4  ;;  %v3545_v26 = vsel %vm705_vm4, %v3544_v58, %v12609_v7  ;;  %v3446_v58 = vrot.slane %v6173_v46, 4  ;;  %v6218_v19 = vunpack.i.l.bf16 %v8503_v44 }
 0x1a9   : > { %12605 = vst [vmem:[#allocation26_spill] sm:$0xff] %v8620_v43  ;;  %v3433_v50 = vsel %vm705_vm4, %v3432_v55, %v12610_v31  ;;  %v1095_v55 = vsel %vm705_vm4, %v1094_v42, %v6188_v17  ;;  %v8648_v9 = vperm.slane %v3545_v26, %v7342_v57  ;;  %v8651_v54 = vperm.slane %v3557_v53, %v7342_v57  ;;  %v6202_v53 = vpop.permute.xlu0 %6201 }
 0x1aa   : > { %v8624_v28 = vpop.permute.xlu1 %6206  ;;  %v6219_v13 = vunpack.i.h.bf16 %v8503_v44  ;;  %v8654_v7 = vpop.permute.xlu2 %6226  ;;  %v1207_v31 = vsel %vm705_vm4, %v1206_v6, %v6189_v60  ;;  %v3559_v46 = vsel %vm705_vm4, %v6184_v47, %v3558_v3  ;;  %v8662_v40 = vperm.slane %v3445_v8, %v7342_v57  ;;  %v12615_v6 = vld [vmem:[#allocation48_spill] sm:$0xff]  ;;  %v12617_v47 = vld [vmem:[#allocation49_spill] sm:$0xff] }
 0x1ab   : > { %v12242_v27 = vunpack.i.h.bf16 %v8624_v28  ;;  %v12241_v51 = vunpack.i.l.bf16 %v8624_v28  ;;  %12611 = vst [vmem:[#allocation43_spill] sm:$0xff] %v8648_v9  ;;  %v8668_v44 = vperm.slane %v1095_v55, %v7342_v57  ;;  %v8677_v3 = vperm.slane %v12617_v47, %v7342_v57 }
 0x1ac   : > { %12612 = vst [vmem:[#allocation53_spill] sm:$0xff] %v8651_v54  ;;  %v3447_v8 = vsel %vm705_vm4, %v6183_v15, %v3446_v58  ;;  %v8685_v55 = vperm.slane %v3559_v46, %v7342_v57  ;;  %v6203_v52 = vunpack.i.l.bf16 %v6202_v53  ;;  %v1208_v34 = vrot.slane %v6189_v60, 4 }
 0x1ad   : > { %v1218_v23 = vrot.slane %v12242_v27, 4  ;;  %v1106_v1 = vrot.slane %v12241_v51, 4  ;;  %v8658_v51 = vperm.slane %v3433_v50, %v7342_v57  ;;  %12614 = vst [vmem:[#allocation10_spill] sm:$0xff] %v8662_v40  ;;  %v8673_v50 = vperm.slane %v12615_v6, %v7342_v57 }
 0x1ae   : > { %12618 = vst [vmem:[#allocation21_spill] sm:$0xff] %v8677_v3  ;;  %v8696_v58 = vperm.slane %v3447_v8, %v7342_v57  ;;  %v1144_v46 = vrot.slane %v8668_v44, 4  ;;  %v6204_v3 = vunpack.i.h.bf16 %v6202_v53  ;;  %v6199_v53 = vunpack.i.h.bf16 %v8558_v14 }
 0x1af   : > { %12613 = vst [vmem:[#allocation13_spill] sm:$0xff] %v8658_v51  ;;  %v1107_v26 = vsel %vm705_vm4, %v1106_v1, %v6218_v19  ;;  %v1219_v27 = vsel %vm705_vm4, %v1218_v23, %v6219_v13  ;;  %v8681_v1 = vperm.slane %v1207_v31, %v7342_v57  ;;  %v6223_v31 = vunpack.i.l.bf16 %v8589_v36  ;;  %v12621_v23 = vld [vmem:[#allocation34_spill] sm:$0xff] }
 0x1b0   : > { %12616 = vst [vmem:[#allocation44_spill] sm:$0xff] %v8673_v50  ;;  %v1113_v6 = vperm.slane %v1107_v26, %v7342_v57  ;;  %v8693_v15 = vperm.slane %v1219_v27, %v7342_v57  ;;  %v12622_v42 = vrot.slane %v12621_v23, 4  ;;  %v8704_v50 = vrot.slane %v6219_v13, 4 }
 0x1b1   : > { %12619 = vst [vmem:[#allocation18_spill] sm:$0xff] %v8685_v55  ;;  %v1256_v47 = vrot.slane %v8681_v1, 4  ;;  %v12623_v55 = vld [vmem:[#allocation33_spill] sm:$0xff]  ;;  %v12625_v13 = vunpack.i.h.bf16 %v8589_v36  ;;  %v6198_v33 = vunpack.i.l.bf16 %v8558_v14  ;;  %v1548_v60 = vrot.slane %v6204_v3, 4  ;;  %v8756_v24 = vpop.permute.xlu0 %6246 }
 0x1b2   : > { %12620 = vst [vmem:[#allocation29_spill] sm:$0xff] %v8696_v58  ;;  %v1121_v26 = vsel %vm705_vm4, %v12552_v48, %v12622_v42  ;;  %v12624_v27 = vrot.slane %v12623_v55, 4  ;;  %v8711_v58 = vrot.slane %v6218_v19, 4  ;;  %v8714_v0 = vpop.permute.xlu1 %6211  ;;  %v1145_v38 = vsel %vm705_vm4, %v1113_v6, %v1144_v46  ;;  %v8728_v25 = vpop.permute.xlu2 %6236 }
 0x1b3   : > { %v8719_v42 = vrot.slane %v12625_v13, 4  ;;  %v8722_v29 = vperm.slane %v1121_v26, %v7520_v32  ;;  %v8726_v19 = vrot.slane %v6223_v31, 4  ;;  %v8738_v62 = vperm.slane %v1145_v38, %v7520_v32 }
 0x1b4   : > { %v1233_v8 = vsel %vm705_vm4, %v12543_v2, %v12624_v27  ;;  %v1257_v27 = vsel %vm705_vm4, %v8693_v15, %v1256_v47  ;;  %v12626_v47 = vunpack.i.h.bf16 %v8654_v7  ;;  %v1096_v41 = vrot.slane %v6188_v17, 4 }
 0x1b5   : > { %v8733_v46 = vperm.slane %v1233_v8, %v7520_v32  ;;  %v1436_v54 = vrot.slane %v6203_v52, 4  ;;  %v1265_v9 = vperm.slane %v1257_v27, %v7520_v32  ;;  %v12628_v14 = vunpack.i.h.bf16 %v8572_v12 }
 0x1b6   : > { %v8742_v43 = vrot.slane %v12626_v47, 4  ;;  %v1172_v40 = vrot.slane %v8722_v29, 4  ;;  %v12629_v38 = vrot.slane %v12552_v48, 4  ;;  %v1550_v51 = vrot.slane %v6199_v53, 4 }
 0x1b7   : > { %v1209_v8 = vsel %vm705_vm4, %v12628_v14, %v1208_v34  ;;  %v1438_v47 = vrot.slane %v6198_v33, 4  ;;  %v1284_v17 = vrot.slane %v8733_v46, 4  ;;  %v1549_v27 = vsel %vm705_vm4, %v1548_v60, %v6199_v53 }
 0x1b8   : > { %12627 = vst [vmem:[#allocation30_spill] sm:$0xff] %v8742_v43  ;;  %v1119_v26 = vsel %vm705_vm4, %v12629_v38, %v12621_v23  ;;  %v1142_v43 = vrot.slane %v1113_v6, 4  ;;  %v12630_v34 = vunpack.i.l.bf16 %v8714_v0  ;;  %v1173_v13 = vsel %vm705_vm4, %v8738_v62, %v1172_v40 }
 0x1b9   : > { %v12631_v48 = vrot.slane %v12543_v2, 4  ;;  %v1437_v38 = vsel %vm705_vm4, %v1436_v54, %v6198_v33  ;;  %v1254_v6 = vrot.slane %v8693_v15, 4  ;;  %v1285_v5 = vsel %vm705_vm4, %v1265_v9, %v1284_v17 }
 0x1ba   : > { %v1448_v14 = vrot.slane %v12630_v34, 4  ;;  %v8770_v53 = vperm.slane %v1119_v26, %v7520_v32  ;;  %v8773_v60 = vperm.slane %v1209_v8, %v7342_v57  ;;  %v12633_v34 = vunpack.i.l.bf16 %v8572_v12 }
 0x1bb   : > { %v1231_v23 = vsel %vm705_vm4, %v12631_v48, %v12623_v55  ;;  %v12634_v2 = vunpack.i.h.bf16 %v8714_v0  ;;  %v6410_v55 = vpack.i.bf16 %v1285_v5, %v1173_v13  ;;  %v1551_v33 = vsel %vm705_vm4, %v6204_v3, %v1550_v51 }
 0x1bc   : > { %12632 = vst [vmem:[#allocation17_spill] sm:$0xff] %v8770_v53  ;;  %v1097_v40 = vsel %vm705_vm4, %v12633_v34, %v1096_v41  ;;  %v1439_v54 = vsel %vm705_vm4, %v6203_v52, %v1438_v47  ;;  %v1143_v15 = vsel %vm705_vm4, %v1142_v43, %v8668_v44  ;;  %v8785_v26 = vperm.slane %v1231_v23, %v7520_v32  ;;  %v8802_v43 = vpop.permute.xlu2 %6251 }
 0x1bd   : > { %v1560_v22 = vrot.slane %v12634_v2, 4  ;;  %v8788_v8 = vperm.slane %v1549_v27, %v7342_v57  ;;  %v8791_v12 = vperm.slane %v1437_v38, %v7342_v57  ;;  %v1449_v41 = vsel %vm705_vm4, %v1448_v14, %v6223_v31  ;;  %6411 = vrot.lane.b32.xlu1 %v6410_v55, %s7016_s16 }
 0x1be   : > { %12635 = vst [vmem:[#allocation31_spill] sm:$0xff] %v8785_v26  ;;  %v8796_v5 = vperm.slane %v1143_v15, %v7520_v32  ;;  %v8799_v52 = vperm.slane %v1097_v40, %v7342_v57  ;;  %v12282_v51 = vunpack.i.h.bf16 %v8728_v25  ;;  %v1168_v44 = vrot.slane %v8770_v53, 4 }
 0x1bf   : > { %v1255_v3 = vsel %vm705_vm4, %v1254_v6, %v8681_v1  ;;  %v12284_v13 = vunpack.i.l.bf16 %v8728_v25  ;;  %v8809_v31 = vperm.slane %v1551_v33, %v7342_v57  ;;  %v8812_v47 = vperm.slane %v1439_v54, %v7342_v57 }
 0x1c0   : > { %12636 = vst [vmem:[#allocation39_spill] sm:$0xff] %v8796_v5  ;;  %v12637_v17 = vunpack.i.h.bf16 %v8589_v36  ;;  %v8818_v14 = vperm.slane %v1449_v41, %v7342_v57  ;;  %v1169_v48 = vsel %vm705_vm4, %v8796_v5, %v1168_v44  ;;  %v8823_v1 = vperm.slane %v1255_v3, %v7520_v32 }
 0x1c1   : > { %v1280_v23 = vrot.slane %v8785_v26, 4  ;;  %v1598_v38 = vrot.slane %v8788_v8, 4  ;;  %v1486_v6 = vrot.slane %v8791_v12, 4  ;;  %v6253_v34 = vunpack.i.l.bf16 %v8802_v43 }
 0x1c2   : > { %v1561_v27 = vsel %vm705_vm4, %v1560_v22, %v12637_v17  ;;  %12638 = vst [vmem:[#allocation40_spill] sm:$0xff] %v8823_v1  ;;  %v12639_v36 = vrot.slane %v8370_v59, 4  ;;  %v1170_v55 = vrot.slane %v8738_v62, 4  ;;  %v1282_v33 = vrot.slane %v1265_v9, 4  ;;  %v8848_v17 = vpop.permute.xlu0 %6256 }
 0x1c3   : > { %v8834_v40 = vperm.slane %v1561_v27, %v7342_v57  ;;  %v1281_v2 = vsel %vm705_vm4, %v8823_v1, %v1280_v23  ;;  %v6254_v54 = vunpack.i.h.bf16 %v8802_v43  ;;  %v12640_v15 = vunpack.i.h.bf16 %v8624_v28 }
 0x1c4   : > { %v1463_v22 = vsel %vm705_vm4, %v8440_v18, %v12639_v36  ;;  %v12641_v44 = vunpack.i.l.bf16 %v8624_v28  ;;  %v6420_v27 = vpack.i.bf16 %v1281_v2, %v1169_v48  ;;  %v1171_v23 = vsel %vm705_vm4, %v1170_v55, %v8722_v29  ;;  %v8896_v26 = vpop.permute.xlu2 %6261 }
 0x1c5   : > { %v1221_v41 = vsel %vm705_vm4, %v12640_v15, %v8704_v50  ;;  %v1283_v62 = vsel %vm705_vm4, %v1282_v33, %v8733_v46  ;;  %v1471_v9 = vperm.slane %v1463_v22, %v7520_v32  ;;  %v1487_v43 = vsel %vm705_vm4, %v8818_v14, %v1486_v6  ;;  %12647 = vst [vmem:[#allocation38_spill] sm:$0xff] %v8896_v26 }
 0x1c6   : > { %v1109_v3 = vsel %vm705_vm4, %v12641_v44, %v8711_v58  ;;  %v3114_v50 = vrot.slane %v6253_v34, 4  ;;  %v6248_v36 = vunpack.i.l.bf16 %v8756_v24  ;;  %6421 = vrot.lane.b32.xlu2 %v6420_v27, %s7018_s18  ;;  %v6425_v28 = vpack.i.bf16 %v1283_v62, %v1171_v23 }
 0x1c7   : > { %v1495_v58 = vperm.slane %v1487_v43, %v7520_v32  ;;  %v8861_v48 = vperm.slane %v1221_v41, %v7342_v57  ;;  %v8864_v29 = vperm.slane %v1109_v3, %v7342_v57  ;;  %v12642_v46 = vrot.slane %v8365_v49, 4 }
 0x1c8   : > { %v1599_v6 = vsel %vm705_vm4, %v8834_v40, %v1598_v38  ;;  %v6249_v2 = vunpack.i.h.bf16 %v8756_v24  ;;  %6426 = vrot.lane.b32.xlu0 %v6425_v28, %s7017_s17  ;;  %v1514_v55 = vrot.slane %v1471_v9, 4  ;;  %v12643_v41 = vunpack.i.l.bf16 %v8654_v7 }
 0x1c9   : > { %v1575_v22 = vsel %vm705_vm4, %v8435_v63, %v12642_v46  ;;  %v1607_v15 = vperm.slane %v1599_v6, %v7520_v32  ;;  %v1268_v3 = vrot.slane %v8773_v60, 4  ;;  %v1156_v27 = vrot.slane %v8799_v52, 4  ;;  %v12650_v6 = vld [vmem:[#allocation46_spill] sm:$0xff] }
 0x1ca   : > { %v1583_v33 = vperm.slane %v1575_v22, %v7520_v32  ;;  %v8878_v44 = vrot.slane %v12643_v41, 4  ;;  %v3226_v23 = vrot.slane %v6254_v54, 4  ;;  %v3115_v38 = vsel %vm705_vm4, %v3114_v50, %v6248_v36  ;;  %v12648_v22 = vld [vmem:[#allocation37_spill] sm:$0xff] }
 0x1cb   : > { %v3116_v62 = vrot.slane %v6248_v36, 4  ;;  %v1515_v24 = vsel %vm705_vm4, %v1495_v58, %v1514_v55  ;;  %v8886_v28 = vrot.slane %v12282_v51, 4  ;;  %v8890_v46 = vrot.slane %v12284_v13, 4  ;;  %v8903_v13 = vpop.permute.xlu1 %6231 }
 0x1cc   : > { %12644 = vst [vmem:[#allocation54_spill] sm:$0xff] %v8878_v44  ;;  %v1626_v43 = vrot.slane %v1583_v33, 4  ;;  %v3228_v36 = vrot.slane %v6249_v2, 4  ;;  %v8900_v51 = vperm.slane %v3115_v38, %v7342_v57  ;;  %v3227_v53 = vsel %vm705_vm4, %v3226_v23, %v6249_v2  ;;  %v12653_v2 = vld [vmem:[#allocation45_spill] sm:$0xff] }
 0x1cd   : > { %12645 = vst [vmem:[#allocation20_spill] sm:$0xff] %v8886_v28  ;;  %v12649_v1 = vrot.slane %v12648_v22, 4  ;;  %v3117_v50 = vsel %vm705_vm4, %v6253_v34, %v3116_v62  ;;  %v8910_v28 = vpop.permute.xlu0 %6276  ;;  %v1157_v38 = vsel %vm705_vm4, %v8864_v29, %v1156_v27  ;;  %v1269_v62 = vsel %vm705_vm4, %v8861_v48, %v1268_v3 }
 0x1ce   : > { %12646 = vst [vmem:[#allocation41_spill] sm:$0xff] %v8890_v46  ;;  %v1627_v55 = vsel %vm705_vm4, %v1607_v15, %v1626_v43  ;;  %v12651_v43 = vld [vmem:[#allocation35_spill] sm:$0xff]  ;;  %v1512_v27 = vrot.slane %v1495_v58, 4  ;;  %v1624_v45 = vrot.slane %v1607_v15, 4  ;;  %v3229_v35 = vsel %vm705_vm4, %v6254_v54, %v3228_v36 }
 0x1cf   : > { %v6415_v5 = vpack.i.bf16 %v1627_v55, %v1515_v24  ;;  %v1133_v41 = vsel %vm705_vm4, %v12650_v6, %v12649_v1  ;;  %v12652_v44 = vrot.slane %v12651_v43, 4  ;;  %v1165_v1 = vperm.slane %v1157_v38, %v7520_v32 }
 0x1d0   : > { %v1141_v46 = vperm.slane %v1133_v41, %v7520_v32  ;;  %v1277_v55 = vperm.slane %v1269_v62, %v7520_v32  ;;  %v1484_v38 = vrot.slane %v8818_v14, 4  ;;  %v1513_v39 = vsel %vm705_vm4, %v1512_v27, %v1471_v9 }
 0x1d1   : > { %v1245_v23 = vsel %vm705_vm4, %v12653_v2, %v12652_v44  ;;  %6416 = vrot.lane.b32.xlu1 %v6415_v5, %s7016_s16  ;;  %v8928_v44 = vperm.slane %v3227_v53, %v7342_v57  ;;  %v1625_v3 = vsel %vm705_vm4, %v1624_v45, %v1583_v33  ;;  %v8936_v62 = vperm.slane %v3117_v50, %v7342_v57 }
 0x1d2   : > { %v1253_v34 = vperm.slane %v1245_v23, %v7520_v32  ;;  %v1180_v41 = vrot.slane %v1141_v46, 4  ;;  %v6440_v54 = vpack.i.bf16 %v1625_v3, %v1513_v39  ;;  %v1178_v15 = vrot.slane %v1165_v1, 4 }
 0x1d3   : > { %v12654_v53 = vunpack.i.l.bf16 %v8896_v26  ;;  %v12297_v24 = vunpack.i.l.bf16 %v8848_v17  ;;  %v1290_v14 = vrot.slane %v1277_v55, 4  ;;  %v12655_v9 = vunpack.i.h.bf16 %v8896_v26 }
 0x1d4   : > { %v1292_v5 = vrot.slane %v1253_v34, 4  ;;  %v1181_v23 = vsel %vm705_vm4, %v1165_v1, %v1180_v41  ;;  %v8943_v41 = vperm.slane %v3229_v35, %v7342_v57  ;;  %v12298_v33 = vunpack.i.h.bf16 %v8848_v17  ;;  %6441 = vrot.lane.b32.xlu0 %v6440_v54, %s7017_s17 }
 0x1d5   : > { %v3456_v36 = vrot.slane %v12654_v53, 4  ;;  %v3568_v45 = vrot.slane %v12655_v9, 4  ;;  %v1179_v39 = vsel %vm705_vm4, %v1178_v15, %v1141_v46  ;;  %v1291_v50 = vsel %vm705_vm4, %v1290_v14, %v1253_v34 }
 0x1d6   : > { %v1293_v58 = vsel %vm705_vm4, %v1277_v55, %v1292_v5  ;;  %v12656_v1 = vrot.slane %v8440_v18, 4  ;;  %v1485_v35 = vsel %vm705_vm4, %v1484_v38, %v8791_v12  ;;  %v12657_v27 = vrot.slane %v8435_v63, 4  ;;  %v8977_v38 = vpop.permute.xlu0 %6281 }
 0x1d7   : > { %v6430_v21 = vpack.i.bf16 %v1293_v58, %v1181_v23  ;;  %v12658_v46 = vunpack.i.h.bf16 %v8714_v0  ;;  %v1596_v34 = vrot.slane %v8834_v40, 4  ;;  %v12659_v18 = vunpack.i.l.bf16 %v8714_v0  ;;  %v8971_v23 = vpop.permute.xlu1 %6241  ;;  %12660 = vst [vmem:[#allocation48_spill] sm:$0xff] %v8977_v38 }
 0x1d8   : > { %v1461_v55 = vsel %vm705_vm4, %v12656_v1, %v8370_v59  ;;  %v1573_v5 = vsel %vm705_vm4, %v12657_v27, %v8365_v49  ;;  %v6455_v12 = vpack.i.bf16 %v1291_v50, %v1179_v39  ;;  %v3457_v63 = vsel %vm705_vm4, %v3456_v36, %v12297_v24 }
 0x1d9   : > { %6431 = vrot.lane.b32.xlu2 %v6430_v21, %s7021_s21  ;;  %v1563_v21 = vsel %vm705_vm4, %v12658_v46, %v8719_v42  ;;  %v1451_v59 = vsel %vm705_vm4, %v12659_v18, %v8726_v19  ;;  %v12300_v49 = vunpack.i.h.bf16 %v8903_v13  ;;  %v8980_v42 = vperm.slane %v1461_v55, %v7520_v32 }
 0x1da   : > { %v8983_v40 = vperm.slane %v1485_v35, %v7520_v32  ;;  %6456 = vrot.lane.b32.xlu1 %v6455_v12, %s7019_s19  ;;  %v8990_v58 = vperm.slane %v1573_v5, %v7520_v32  ;;  %v8994_v15 = vperm.slane %v1563_v21, %v7342_v57  ;;  %v12299_v53 = vunpack.i.l.bf16 %v8903_v13  ;;  %v9017_v5 = vpop.permute.xlu2 %6266 }
 0x1db   : > { %12661 = vst [vmem:[#allocation49_spill] sm:$0xff] %v8980_v42  ;;  %v1510_v36 = vrot.slane %v8980_v42, 4  ;;  %v8999_v14 = vperm.slane %v1451_v59, %v7342_v57  ;;  %v9002_v9 = vperm.slane %v3457_v63, %v7342_v57  ;;  %v3569_v39 = vsel %vm705_vm4, %v3568_v45, %v12298_v33 }
 0x1dc   : > { %12662 = vst [vmem:[#allocation34_spill] sm:$0xff] %v8983_v40  ;;  %v1597_v50 = vsel %vm705_vm4, %v1596_v34, %v8788_v8  ;;  %v2216_v1 = vrot.slane %v12300_v49, 4  ;;  %v1622_v27 = vrot.slane %v8990_v58, 4  ;;  %v12665_v46 = vrot.slane %v12650_v6, 4 }
 0x1dd   : > { %12663 = vst [vmem:[#allocation33_spill] sm:$0xff] %v8990_v58  ;;  %v1511_v55 = vsel %vm705_vm4, %v8983_v40, %v1510_v36  ;;  %v9014_v35 = vperm.slane %v1597_v50, %v7520_v32  ;;  %v12666_v8 = vrot.slane %v8864_v29, 4  ;;  %v12667_v34 = vrot.slane %v12653_v2, 4 }
 0x1de   : > { %v1131_v45 = vsel %vm705_vm4, %v12665_v46, %v12648_v22  ;;  %v12668_v59 = vrot.slane %v8861_v48, 4  ;;  %v2104_v6 = vrot.slane %v12299_v53, 4  ;;  %v9046_v2 = vperm.slane %v3569_v39, %v7342_v57 }
 0x1df   : > { %12664 = vst [vmem:[#allocation37_spill] sm:$0xff] %v9014_v35  ;;  %v1155_v21 = vsel %vm705_vm4, %v12666_v8, %v8799_v52  ;;  %v1243_v18 = vsel %vm705_vm4, %v12667_v34, %v12651_v43  ;;  %v1623_v22 = vsel %vm705_vm4, %v9014_v35, %v1622_v27  ;;  %v9040_v29 = vperm.slane %v1131_v45, %v7520_v32 }
 0x1e0   : > { %v1267_v12 = vsel %vm705_vm4, %v12668_v59, %v8773_v60  ;;  %v9043_v52 = vperm.slane %v1155_v21, %v7520_v32  ;;  %v6435_v43 = vpack.i.bf16 %v1623_v22, %v1511_v55  ;;  %v9049_v48 = vperm.slane %v1243_v18, %v7520_v32  ;;  %v9068_v21 = vpop.permute.xlu1 %6286  ;;  %v9076_v22 = vpop.permute.xlu0 %6291 }
 0x1e1   : > { %v9052_v60 = vperm.slane %v1267_v12, %v7520_v32  ;;  %v12302_v63 = vunpack.i.h.bf16 %v9017_v5  ;;  %v1176_v36 = vrot.slane %v9040_v29, 4  ;;  %v12669_v50 = vrot.slane %v8378_v56, 4  ;;  %12672 = vst [vmem:[#allocation46_spill] sm:$0xff] %v9068_v21 }
 0x1e2   : > { %v12670_v46 = vrot.slane %v8812_v47, 4  ;;  %v12301_v55 = vunpack.i.l.bf16 %v9017_v5  ;;  %v12671_v45 = vunpack.i.h.bf16 %v8654_v7  ;;  %6436 = vrot.lane.b32.xlu2 %v6435_v43, %s7018_s18  ;;  %v1288_v34 = vrot.slane %v9049_v48, 4 }
 0x1e3   : > { %v1475_v27 = vsel %vm705_vm4, %v8446_v11, %v12669_v50  ;;  %v12673_v59 = vunpack.i.l.bf16 %v8654_v7  ;;  %v1177_v50 = vsel %vm705_vm4, %v9043_v52, %v1176_v36  ;;  %v12675_v43 = vrot.slane %v8809_v31, 4 }
 0x1e4   : > { %v1499_v39 = vsel %vm705_vm4, %v8999_v14, %v12670_v46  ;;  %v2217_v8 = vsel %vm705_vm4, %v2216_v1, %v12671_v45  ;;  %v12674_v46 = vrot.slane %v8375_v10, 4  ;;  %v1289_v7 = vsel %vm705_vm4, %v9052_v60, %v1288_v34 }
 0x1e5   : > { %v1507_v18 = vperm.slane %v1499_v39, %v7520_v32  ;;  %v2105_v12 = vsel %vm705_vm4, %v2104_v6, %v12673_v59  ;;  %v1611_v45 = vsel %vm705_vm4, %v8994_v15, %v12675_v43  ;;  %v1483_v6 = vperm.slane %v1475_v27, %v7520_v32 }
 0x1e6   : > { %v1587_v1 = vsel %vm705_vm4, %v8405_v20, %v12674_v46  ;;  %v1619_v59 = vperm.slane %v1611_v45, %v7520_v32  ;;  %v12305_v36 = vunpack.i.h.bf16 %v8910_v28  ;;  %v12304_v24 = vunpack.i.l.bf16 %v8910_v28 }
 0x1e7   : > { %v1520_v39 = vrot.slane %v1507_v18, 4  ;;  %v12303_v33 = vunpack.i.h.bf16 %v8971_v23  ;;  %v6450_v46 = vpack.i.bf16 %v1289_v7, %v1177_v50  ;;  %v12306_v54 = vunpack.i.l.bf16 %v9076_v22 }
 0x1e8   : > { %v1595_v43 = vperm.slane %v1587_v1, %v7520_v32  ;;  %v1632_v53 = vrot.slane %v1619_v59, 4  ;;  %v1608_v34 = vrot.slane %v8994_v15, 4  ;;  %v9100_v27 = vperm.slane %v2105_v12, %v7342_v57 }
 0x1e9   : > { %v1521_v19 = vsel %vm705_vm4, %v1520_v39, %v1483_v6  ;;  %v9103_v45 = vperm.slane %v2217_v8, %v7342_v57  ;;  %v12309_v49 = vunpack.i.h.bf16 %v9076_v22  ;;  %6451 = vrot.lane.b32.xlu0 %v6450_v46, %s7020_s20  ;;  %v1496_v50 = vrot.slane %v8999_v14, 4  ;;  %v9111_v39 = vpop.permute.xlu2 %6271  ;;  %v9136_v14 = vpop.permute.xlu1 %6301 }
 0x1ea   : > { %v2116_v1 = vrot.slane %v12301_v55, 4  ;;  %v1633_v15 = vsel %vm705_vm4, %v1632_v53, %v1595_v43  ;;  %v2228_v12 = vrot.slane %v12302_v63, 4  ;;  %v2558_v8 = vrot.slane %v12303_v33, 4 }
 0x1eb   : > { %v12310_v3 = vunpack.i.l.bf16 %v8971_v23  ;;  %v6465_v46 = vpack.i.bf16 %v1633_v15, %v1521_v19  ;;  %v3238_v7 = vrot.slane %v12305_v36, 4  ;;  %v3126_v55 = vrot.slane %v12304_v24, 4 }
 0x1ec   : > { %v2117_v53 = vsel %vm705_vm4, %v2116_v1, %v12306_v54  ;;  %v2154_v63 = vrot.slane %v9100_v27, 4  ;;  %v2266_v0 = vrot.slane %v9103_v45, 4  ;;  %v2229_v19 = vsel %vm705_vm4, %v2228_v12, %v12309_v49 }
 0x1ed   : > { %6466 = vrot.lane.b32.xlu1 %v6465_v46, %s7019_s19  ;;  %v12312_v15 = vunpack.i.l.bf16 %v9111_v39  ;;  %v12317_v24 = vunpack.i.h.bf16 %v8977_v38  ;;  %v1522_v36 = vrot.slane %v1483_v6, 4  ;;  %v1634_v1 = vrot.slane %v1595_v43, 4 }
 0x1ee   : > { %v2446_v54 = vrot.slane %v12310_v3, 4  ;;  %v12676_v58 = vunpack.i.h.bf16 %v8728_v25  ;;  %v9144_v42 = vperm.slane %v2117_v53, %v7342_v57  ;;  %v12677_v12 = vrot.slane %v8446_v11, 4 }
 0x1ef   : > { %v9151_v49 = vperm.slane %v2229_v19, %v7342_v57  ;;  %v1523_v6 = vsel %vm705_vm4, %v1507_v18, %v1522_v36  ;;  %v1635_v43 = vsel %vm705_vm4, %v1619_v59, %v1634_v1  ;;  %v1497_v53 = vsel %vm705_vm4, %v1496_v50, %v8812_v47 }
 0x1f0   : > { %v2559_v33 = vsel %vm705_vm4, %v2558_v8, %v12676_v58  ;;  %v1473_v46 = vsel %vm705_vm4, %v12677_v12, %v8378_v56  ;;  %v12311_v58 = vunpack.i.l.bf16 %v9136_v14  ;;  %v6445_v8 = vpack.i.bf16 %v1635_v43, %v1523_v6 }
 0x1f1   : > { %v9156_v3 = vperm.slane %v1473_v46, %v7520_v32  ;;  %v12678_v11 = vrot.slane %v8405_v20, 4  ;;  %v9166_v19 = vperm.slane %v1497_v53, %v7520_v32  ;;  %v1609_v36 = vsel %vm705_vm4, %v1608_v34, %v8809_v31 }
 0x1f2   : > { %v12679_v1 = vunpack.i.l.bf16 %v8728_v25  ;;  %v9178_v50 = vperm.slane %v2559_v33, %v7342_v57  ;;  %v12319_v20 = vunpack.i.l.bf16 %v8977_v38  ;;  %6446 = vrot.lane.b32.xlu2 %v6445_v8, %s7021_s21  ;;  %v9185_v12 = vperm.slane %v1609_v36, %v7520_v32 }
 0x1f3   : > { %v1585_v56 = vsel %vm705_vm4, %v12678_v11, %v8375_v10  ;;  %v1518_v18 = vrot.slane %v9156_v3, 4  ;;  %v9181_v10 = vpop.permute.xlu0 %6296  ;;  %v12681_v25 = vrot.slane %v8489_v37, 4  ;;  %v6304_v34 = vunpack.i.h.bf16 %v9136_v14 }
 0x1f4   : > { %v9170_v59 = vperm.slane %v1585_v56, %v7520_v32  ;;  %v2447_v47 = vsel %vm705_vm4, %v2446_v54, %v12679_v1  ;;  %12680 = vst [vmem:[#allocation35_spill] sm:$0xff] %v9178_v50  ;;  %v2155_v54 = vsel %vm705_vm4, %v9144_v42, %v2154_v63  ;;  %v12682_v43 = vrot.slane %v8476_v30, 4 }
 0x1f5   : > { %v1519_v46 = vsel %vm705_vm4, %v9166_v19, %v1518_v18  ;;  %v2131_v33 = vsel %vm705_vm4, %v8431_v61, %v12681_v25  ;;  %v9198_v6 = vperm.slane %v2155_v54, %v7520_v32  ;;  %v2267_v53 = vsel %vm705_vm4, %v9151_v49, %v2266_v0 }
 0x1f6   : > { %v1630_v31 = vrot.slane %v9170_v59, 4  ;;  %v2243_v8 = vsel %vm705_vm4, %v8419_v16, %v12682_v43  ;;  %v3127_v11 = vsel %vm705_vm4, %v3126_v55, %v12311_v58  ;;  %v9213_v18 = vperm.slane %v2267_v53, %v7520_v32  ;;  %v9229_v53 = vpop.permute.xlu1 %6306 }
 0x1f7   : > { %v12320_v36 = vunpack.i.l.bf16 %v9181_v10  ;;  %v9217_v25 = vperm.slane %v2131_v33, %v7520_v32  ;;  %v2180_v0 = vrot.slane %v9198_v6, 4  ;;  %v12683_v54 = vunpack.i.h.bf16 %v9111_v39  ;;  %12685 = vst [vmem:[#allocation62_spill] sm:$0xff] %v9229_v53 }
 0x1f8   : > { %v1631_v63 = vsel %vm705_vm4, %v9185_v12, %v1630_v31  ;;  %v9223_v55 = vperm.slane %v2447_v47, %v7342_v57  ;;  %v9226_v58 = vperm.slane %v2243_v8, %v7520_v32  ;;  %v2292_v31 = vrot.slane %v9213_v18, 4 }
 0x1f9   : > { %v6460_v1 = vpack.i.bf16 %v1631_v63, %v1519_v46  ;;  %v2570_v43 = vrot.slane %v12683_v54, 4  ;;  %v2458_v46 = vrot.slane %v12312_v15, 4  ;;  %v9234_v33 = vperm.slane %v3127_v11, %v7342_v57 }
 0x1fa   : > { %12684 = vst [vmem:[#allocation45_spill] sm:$0xff] %v9223_v55  ;;  %v3239_v63 = vsel %vm705_vm4, %v3238_v7, %v6304_v34  ;;  %v2181_v47 = vsel %vm705_vm4, %v2180_v0, %v9217_v25  ;;  %v2608_v8 = vrot.slane %v9178_v50, 4  ;;  %v3580_v54 = vrot.slane %v12317_v24, 4 }
 0x1fb   : > { %6461 = vrot.lane.b32.xlu0 %v6460_v1, %s7020_s20  ;;  %v3468_v56 = vrot.slane %v12319_v20, 4  ;;  %v2293_v15 = vsel %vm705_vm4, %v2292_v31, %v9226_v58  ;;  %v2459_v7 = vsel %vm705_vm4, %v2458_v46, %v12320_v36  ;;  %v12686_v11 = vunpack.i.h.bf16 %v9181_v10  ;;  %v9259_v31 = vpop.permute.xlu2 %6311 }
 0x1fc   : > { %v6505_v0 = vpack.i.bf16 %v2293_v15, %v2181_v47  ;;  %v12326_v40 = vunpack.i.l.bf16 %v9229_v53  ;;  %v2496_v35 = vrot.slane %v9223_v55, 4  ;;  %v3240_v24 = vrot.slane %v6304_v34, 4  ;;  %12687 = vst [vmem:[#allocation63_spill] sm:$0xff] %v9259_v31 }
 0x1fd   : > { %v2571_v1 = vsel %vm705_vm4, %v2570_v43, %v12686_v11  ;;  %v9256_v21 = vperm.slane %v3239_v63, %v7342_v57  ;;  %v1174_v20 = vrot.slane %v9043_v52, 4  ;;  %v1286_v36 = vrot.slane %v9052_v60, 4  ;;  %v12689_v43 = vld [vmem:[#allocation55_spill] sm:$0xff] }
 0x1fe   : > { %6506 = vrot.lane.b32.xlu1 %v6505_v0, %s7017_s17  ;;  %v12688_v15 = vrot.slane %v8593_v4, 4  ;;  %v12690_v34 = vrot.slane %v8900_v51, 4  ;;  %v9273_v52 = vperm.slane %v2459_v7, %v7342_v57  ;;  %v9276_v11 = vperm.slane %v2571_v1, %v7342_v57  ;;  %v12694_v7 = vld [vmem:[#allocation7_spill] sm:$0xff]  ;;  %v12696_v1 = vld [vmem:[#allocation14_spill] sm:$0xff] }
 0x1ff   : > { %v1175_v0 = vsel %vm705_vm4, %v1174_v20, %v9040_v29  ;;  %v1287_v46 = vsel %vm705_vm4, %v1286_v36, %v9049_v48  ;;  %v12695_v31 = vrot.slane %v12694_v7, 4  ;;  %v12699_v48 = vunpack.i.l.bf16 %v9136_v14  ;;  %v12704_v14 = vld [vmem:[#allocation5_spill] sm:$0xff] }
 0x200   : > { %v3141_v47 = vsel %vm705_vm4, %v12689_v43, %v12688_v15  ;;  %v3165_v63 = vsel %vm705_vm4, %v9234_v33, %v12690_v34  ;;  %12691 = vst [vmem:[#allocation55_spill] sm:$0xff] %v9276_v11  ;;  %v3469_v15 = vsel %vm705_vm4, %v3468_v56, %v12326_v40  ;;  %v6470_v38 = vpack.i.bf16 %v1287_v46, %v1175_v0 }
 0x201   : > { %v9281_v60 = vperm.slane %v3141_v47, %v7520_v32  ;;  %v9289_v34 = vperm.slane %v3165_v63, %v7520_v32  ;;  %v3253_v26 = vsel %vm705_vm4, %v12696_v1, %v12695_v31  ;;  %v12698_v47 = vrot.slane %v8928_v44, 4 }
 0x202   : > { %v9297_v20 = vperm.slane %v3253_v26, %v7520_v32  ;;  %v3128_v36 = vrot.slane %v12699_v48, 4  ;;  %v3162_v63 = vrot.slane %v9234_v33, 4  ;;  %v12700_v40 = vunpack.i.h.bf16 %v9229_v53  ;;  %6471 = vrot.lane.b32.xlu2 %v6470_v38, %s7022_s22  ;;  %v12705_v38 = vld [vmem:[#allocation8_spill] sm:$0xff] }
 0x203   : > { %12692 = vst [vmem:[#allocation64_spill] sm:$0xff] %v9281_v60  ;;  %v3192_v29 = vrot.slane %v9281_v60, 4  ;;  %v3277_v56 = vsel %vm705_vm4, %v9256_v21, %v12698_v47  ;;  %v12702_v47 = vld [vmem:[#allocation16_spill] sm:$0xff]  ;;  %v2497_v33 = vsel %vm705_vm4, %v9273_v52, %v2496_v35  ;;  %v2609_v55 = vsel %vm705_vm4, %v9276_v11, %v2608_v8  ;;  %v12710_v11 = vld [vmem:[#allocation10_spill] sm:$0xff]  ;;  %v12715_v60 = vld [vmem:[#allocation53_spill] sm:$0xff] }
 0x204   : > { %12693 = vst [vmem:[#allocation65_spill] sm:$0xff] %v9289_v34  ;;  %v3581_v31 = vsel %vm705_vm4, %v3580_v54, %v12700_v40  ;;  %v9310_v46 = vperm.slane %v3277_v56, %v7520_v32  ;;  %v3304_v0 = vrot.slane %v9297_v20, 4  ;;  %v12703_v50 = vrot.slane %v12702_v47, 4  ;;  %v12707_v53 = vld [vmem:[#allocation12_spill] sm:$0xff] }
 0x205   : > { %12697 = vst [vmem:[#allocation7_spill] sm:$0xff] %v9297_v20  ;;  %v3193_v26 = vsel %vm705_vm4, %v9289_v34, %v3192_v29  ;;  %v9323_v40 = vperm.slane %v3469_v15, %v7342_v57  ;;  %v9326_v54 = vperm.slane %v2497_v33, %v7520_v32  ;;  %v12706_v56 = vrot.slane %v12705_v38, 4 }
 0x206   : > { %12701 = vst [vmem:[#allocation14_spill] sm:$0xff] %v9310_v46  ;;  %v2473_v48 = vsel %vm705_vm4, %v12704_v14, %v12703_v50  ;;  %v3274_v47 = vrot.slane %v9256_v21, 4  ;;  %v9336_v50 = vperm.slane %v3581_v31, %v7342_v57  ;;  %v3305_v35 = vsel %vm705_vm4, %v9310_v46, %v3304_v0  ;;  %v12708_v14 = vld [vmem:[#allocation13_spill] sm:$0xff] }
 0x207   : > { %v2585_v29 = vsel %vm705_vm4, %v12707_v53, %v12706_v56  ;;  %v9341_v15 = vperm.slane %v2609_v55, %v7520_v32  ;;  %v6490_v33 = vpack.i.bf16 %v3305_v35, %v3193_v26  ;;  %v9344_v38 = vperm.slane %v2473_v48, %v7520_v32  ;;  %v9357_v26 = vpop.permute.xlu2 %6321 }
 0x208   : > { %v2522_v56 = vrot.slane %v9326_v54, 4  ;;  %v9348_v53 = vperm.slane %v2585_v29, %v7520_v32  ;;  %v1516_v8 = vrot.slane %v9166_v19, 4  ;;  %v1628_v31 = vrot.slane %v9185_v12, 4  ;;  %12711 = vst [vmem:[#allocation13_spill] sm:$0xff] %v9357_v26  ;;  %v12713_v12 = vld [vmem:[#allocation43_spill] sm:$0xff] }
 0x209   : > { %v2634_v21 = vrot.slane %v9341_v15, 4  ;;  %v12709_v0 = vrot.slane %v12708_v14, 4  ;;  %6491 = vrot.lane.b32.xlu0 %v6490_v33, %s7016_s16  ;;  %v12712_v35 = vrot.slane %v9002_v9, 4  ;;  %v12714_v20 = vrot.slane %v12713_v12, 4 }
 0x20a   : > { %v2523_v48 = vsel %vm705_vm4, %v2522_v56, %v9344_v38  ;;  %v1517_v33 = vsel %vm705_vm4, %v1516_v8, %v9156_v3  ;;  %v1629_v56 = vsel %vm705_vm4, %v1628_v31, %v9170_v59  ;;  %v12717_v3 = vrot.slane %v9046_v2, 4 }
 0x20b   : > { %v3483_v55 = vsel %vm705_vm4, %v12710_v11, %v12709_v0  ;;  %v3507_v19 = vsel %vm705_vm4, %v9323_v40, %v12712_v35  ;;  %v3595_v0 = vsel %vm705_vm4, %v12715_v60, %v12714_v20  ;;  %v2635_v26 = vsel %vm705_vm4, %v2634_v21, %v9348_v53 }
 0x20c   : > { %v9363_v29 = vperm.slane %v3483_v55, %v7520_v32  ;;  %v9380_v55 = vperm.slane %v3507_v19, %v7520_v32  ;;  %v6520_v46 = vpack.i.bf16 %v2635_v26, %v2523_v48  ;;  %v6475_v34 = vpack.i.bf16 %v1629_v56, %v1517_v33 }
 0x20d   : > { %v9384_v12 = vperm.slane %v3595_v0, %v7520_v32  ;;  %v2152_v20 = vrot.slane %v9144_v42, 4  ;;  %v12716_v21 = vunpack.i.h.bf16 %v8910_v28  ;;  %v3619_v59 = vsel %vm705_vm4, %v9336_v50, %v12717_v3 }
 0x20e   : > { %v3534_v35 = vrot.slane %v9363_v29, 4  ;;  %v12718_v8 = vrot.slane %v12689_v43, 4  ;;  %6521 = vrot.lane.b32.xlu1 %v6520_v46, %s7017_s17  ;;  %6476 = vrot.lane.b32.xlu2 %v6475_v34, %s7022_s22  ;;  %v9403_v26 = vperm.slane %v3619_v59, %v7520_v32  ;;  %v12720_v19 = vunpack.i.l.bf16 %v8910_v28 }
 0x20f   : > { %v3241_v60 = vsel %vm705_vm4, %v12716_v21, %v3240_v24  ;;  %v3646_v24 = vrot.slane %v9384_v12, 4  ;;  %v12721_v34 = vrot.slane %v12696_v1, 4  ;;  %v3275_v0 = vsel %vm705_vm4, %v3274_v47, %v8928_v44 }
 0x210   : > { %v3139_v31 = vsel %vm705_vm4, %v12718_v8, %v8593_v4  ;;  %v3535_v42 = vsel %vm705_vm4, %v9380_v55, %v3534_v35  ;;  %v3129_v43 = vsel %vm705_vm4, %v12720_v19, %v3128_v36  ;;  %v3163_v4 = vsel %vm705_vm4, %v3162_v63, %v8900_v51  ;;  %v12724_v51 = vld [vmem:[#allocation30_spill] sm:$0xff]  ;;  %v9455_v19 = vpop.permute.xlu0 %6316 }
 0x211   : > { %v9407_v48 = vperm.slane %v3139_v31, %v7520_v32  ;;  %v3251_v46 = vsel %vm705_vm4, %v12721_v34, %v12694_v7  ;;  %v3647_v33 = vsel %vm705_vm4, %v9403_v26, %v3646_v24  ;;  %v9423_v56 = vperm.slane %v3163_v4, %v7520_v32 }
 0x212   : > { %v9427_v36 = vperm.slane %v3251_v46, %v7520_v32  ;;  %v12725_v63 = vunpack.i.h.bf16 %v8903_v13  ;;  %v6495_v7 = vpack.i.bf16 %v3647_v33, %v3535_v42  ;;  %v9434_v35 = vperm.slane %v3275_v0, %v7520_v32 }
 0x213   : > { %12719 = vst [vmem:[#allocation10_spill] sm:$0xff] %v9407_v48  ;;  %v3188_v28 = vrot.slane %v9407_v48, 4  ;;  %v2182_v44 = vrot.slane %v9217_v25, 4  ;;  %v2264_v47 = vrot.slane %v9151_v49, 4  ;;  %v2294_v59 = vrot.slane %v9226_v58, 4  ;;  %v9453_v25 = vpop.permute.xlu2 %6336  ;;  %v12769_v48 = vld [vmem:[#allocation53_spill] sm:$0xff] }
 0x214   : > { %12722 = vst [vmem:[#allocation66_spill] sm:$0xff] %v9423_v56  ;;  %v2219_v1 = vsel %vm705_vm4, %v12725_v63, %v12724_v51  ;;  %v3300_v3 = vrot.slane %v9427_v36, 4  ;;  %v12727_v8 = vunpack.i.l.bf16 %v9076_v22  ;;  %v9445_v24 = vperm.slane %v3129_v43, %v7342_v57  ;;  %6496 = vrot.lane.b32.xlu0 %v6495_v7, %s7016_s16 }
 0x215   : > { %12723 = vst [vmem:[#allocation67_spill] sm:$0xff] %v9427_v36  ;;  %v3189_v21 = vsel %vm705_vm4, %v9423_v56, %v3188_v28  ;;  %v9448_v42 = vperm.slane %v3241_v60, %v7342_v57  ;;  %v2183_v49 = vsel %vm705_vm4, %v9198_v6, %v2182_v44  ;;  %v2295_v4 = vsel %vm705_vm4, %v9213_v18, %v2294_v59  ;;  %v12732_v28 = vld [vmem:[#allocation54_spill] sm:$0xff]  ;;  %v12743_v59 = vld [vmem:[#allocation27_spill] sm:$0xff] }
 0x216   : > { %12726 = vst [vmem:[#allocation30_spill] sm:$0xff] %v9434_v35  ;;  %v2118_v31 = vrot.slane %v12727_v8, 4  ;;  %v3301_v58 = vsel %vm705_vm4, %v9434_v35, %v3300_v3  ;;  %v12729_v43 = vrot.slane %v8431_v61, 4  ;;  %v2153_v34 = vsel %vm705_vm4, %v2152_v20, %v9100_v27  ;;  %v12741_v3 = vld [vmem:[#allocation26_spill] sm:$0xff] }
 0x217   : > { %12728 = vst [vmem:[#allocation68_spill] sm:$0xff] %v9453_v25  ;;  %v6530_v46 = vpack.i.bf16 %v3301_v58, %v3189_v21  ;;  %v6480_v6 = vpack.i.bf16 %v2295_v4, %v2183_v49  ;;  %v9471_v33 = vperm.slane %v2153_v34, %v7520_v32  ;;  %v12733_v51 = vunpack.i.l.bf16 %v8903_v13  ;;  %v12745_v49 = vld [vmem:[#allocation25_spill] sm:$0xff]  ;;  %v12845_v25 = vld [vmem:[#allocation28_spill] sm:$0xff] }
 0x218   : > { %v2129_v60 = vsel %vm705_vm4, %v12729_v43, %v8489_v37  ;;  %v9478_v61 = vperm.slane %v2219_v1, %v7342_v57  ;;  %v9480_v37 = vpop.permute.xlu1 %6331  ;;  %v12735_v27 = vrot.slane %v8419_v16, 4  ;;  %v2265_v63 = vsel %vm705_vm4, %v2264_v47, %v9103_v45  ;;  %v12739_v16 = vld [vmem:[#allocation51_spill] sm:$0xff] }
 0x219   : > { %v9468_v0 = vperm.slane %v2129_v60, %v7520_v32  ;;  %12731 = vst [vmem:[#allocation70_spill] sm:$0xff] %v9471_v33  ;;  %v2107_v18 = vsel %vm705_vm4, %v12733_v51, %v12732_v28  ;;  %v12736_v7 = vunpack.i.h.bf16 %v9076_v22  ;;  %6531 = vrot.lane.b32.xlu1 %v6530_v46, %s7018_s18  ;;  %6481 = vrot.lane.b32.xlu2 %v6480_v6, %s7016_s16  ;;  %v12742_v22 = vrot.slane %v8936_v62, 4 }
 0x21a   : > { %12734 = vst [vmem:[#allocation54_spill] sm:$0xff] %v9480_v37  ;;  %v2241_v20 = vsel %vm705_vm4, %v12735_v27, %v8476_v30  ;;  %v9497_v21 = vperm.slane %v2265_v63, %v7520_v32  ;;  %v12740_v30 = vrot.slane %v12739_v16, 4  ;;  %v12744_v8 = vrot.slane %v12743_v59, 4  ;;  %v12847_v37 = vld [vmem:[#allocation32_spill] sm:$0xff] }
 0x21b   : > { %12730 = vst [vmem:[#allocation69_spill] sm:$0xff] %v9468_v0  ;;  %v2230_v44 = vrot.slane %v12736_v7, 4  ;;  %v2178_v13 = vrot.slane %v9468_v0, 4  ;;  %v9494_v1 = vperm.slane %v2241_v20, %v7520_v32  ;;  %v3177_v47 = vsel %vm705_vm4, %v9445_v24, %v12742_v22 }
 0x21c   : > { %12738 = vst [vmem:[#allocation72_spill] sm:$0xff] %v9497_v21  ;;  %v3153_v45 = vsel %vm705_vm4, %v12741_v3, %v12740_v30  ;;  %v3265_v58 = vsel %vm705_vm4, %v12745_v49, %v12744_v8  ;;  %v12746_v4 = vrot.slane %v8943_v41, 4  ;;  %v12747_v60 = vunpack.i.l.bf16 %v9017_v5 }
 0x21d   : > { %12737 = vst [vmem:[#allocation71_spill] sm:$0xff] %v9494_v1  ;;  %v2179_v46 = vsel %vm705_vm4, %v9471_v33, %v2178_v13  ;;  %v2290_v6 = vrot.slane %v9494_v1, 4  ;;  %v9522_v28 = vperm.slane %v3153_v45, %v7520_v32  ;;  %v9525_v51 = vperm.slane %v3177_v47, %v7520_v32 }
 0x21e   : > { %v3289_v43 = vsel %vm705_vm4, %v9448_v42, %v12746_v4  ;;  %v2119_v34 = vsel %vm705_vm4, %v12747_v60, %v2118_v31  ;;  %v9528_v27 = vperm.slane %v3265_v58, %v7520_v32  ;;  %v2524_v63 = vrot.slane %v9344_v38, 4 }
 0x21f   : > { %v9531_v20 = vperm.slane %v3289_v43, %v7520_v32  ;;  %v9535_v31 = vperm.slane %v2107_v18, %v7342_v57  ;;  %v2291_v7 = vsel %vm705_vm4, %v9497_v21, %v2290_v6  ;;  %v3200_v13 = vrot.slane %v9522_v28, 4 }
 0x220   : > { %v2636_v30 = vrot.slane %v9348_v53, 4  ;;  %v12748_v45 = vunpack.i.h.bf16 %v9017_v5  ;;  %v6500_v47 = vpack.i.bf16 %v2291_v7, %v2179_v46  ;;  %v3312_v8 = vrot.slane %v9528_v27, 4  ;;  %v12752_v46 = vld [vmem:[#allocation20_spill] sm:$0xff] }
 0x221   : > { %v2525_v38 = vsel %vm705_vm4, %v9326_v54, %v2524_v63  ;;  %v12749_v18 = vunpack.i.h.bf16 %v8848_v17  ;;  %v9552_v4 = vperm.slane %v2119_v34, %v7342_v57  ;;  %v3201_v53 = vsel %vm705_vm4, %v9525_v51, %v3200_v13  ;;  %v9566_v63 = vpop.permute.xlu2 %6341  ;;  %v9568_v34 = vpop.permute.xlu0 %6326 }
 0x222   : > { %v2231_v22 = vsel %vm705_vm4, %v12748_v45, %v2230_v44  ;;  %v2637_v5 = vsel %vm705_vm4, %v9341_v15, %v2636_v30  ;;  %v12750_v44 = vld [vmem:[#allocation41_spill] sm:$0xff]  ;;  %v12751_v43 = vunpack.i.l.bf16 %v8971_v23  ;;  %v12753_v54 = vunpack.i.h.bf16 %v8971_v23  ;;  %12754 = vst [vmem:[#allocation51_spill] sm:$0xff] %v9568_v34  ;;  %6501 = vrot.lane.b32.xlu0 %v6500_v47, %s7018_s18  ;;  %v12848_v34 = vld [vmem:[#allocation42_spill] sm:$0xff] }
 0x223   : > { %v9549_v58 = vrot.slane %v12749_v18, 4  ;;  %v3313_v7 = vsel %vm705_vm4, %v9531_v20, %v3312_v8  ;;  %v6485_v15 = vpack.i.bf16 %v2637_v5, %v2525_v38  ;;  %v2166_v13 = vrot.slane %v9535_v31, 4  ;;  %v12758_v8 = vld [vmem:[#allocation15_spill] sm:$0xff] }
 0x224   : > { %v2449_v60 = vsel %vm705_vm4, %v12751_v43, %v12750_v44  ;;  %v2561_v6 = vsel %vm705_vm4, %v12753_v54, %v12752_v46  ;;  %v9575_v30 = vperm.slane %v2231_v22, %v7342_v57  ;;  %v12755_v45 = vunpack.i.h.bf16 %v9181_v10  ;;  %v9585_v54 = vpop.permute.xlu1 %6356  ;;  %v12760_v22 = vld [vmem:[#allocation50_spill] sm:$0xff] }
 0x225   : > { %v6540_v18 = vpack.i.bf16 %v3313_v7, %v3201_v53  ;;  %v12756_v44 = vunpack.i.l.bf16 %v8848_v17  ;;  %v2278_v46 = vrot.slane %v9478_v61, 4  ;;  %v3504_v47 = vrot.slane %v9323_v40, 4  ;;  %12757 = vst [vmem:[#allocation26_spill] sm:$0xff] %v9585_v54  ;;  %6486 = vrot.lane.b32.xlu2 %v6485_v15, %s7016_s16 }
 0x226   : > { %v2572_v23 = vrot.slane %v12755_v45, 4  ;;  %v12759_v38 = vrot.slane %v12758_v8, 4  ;;  %v9593_v45 = vperm.slane %v2449_v60, %v7342_v57  ;;  %v9596_v17 = vperm.slane %v2561_v6, %v7342_v57  ;;  %v12762_v60 = vld [vmem:[#allocation52_spill] sm:$0xff]  ;;  %v12764_v6 = vld [vmem:[#allocation9_spill] sm:$0xff] }
 0x227   : > { %v9581_v43 = vrot.slane %v12756_v44, 4  ;;  %6541 = vrot.lane.b32.xlu1 %v6540_v18, %s7021_s21  ;;  %v2167_v40 = vsel %vm705_vm4, %v9552_v4, %v2166_v13  ;;  %v12761_v7 = vunpack.i.l.bf16 %v9181_v10  ;;  %v3616_v44 = vrot.slane %v9336_v50, 4 }
 0x228   : > { %v2143_v5 = vsel %vm705_vm4, %v12760_v22, %v12759_v38  ;;  %v9608_v38 = vperm.slane %v2167_v40, %v7520_v32  ;;  %v12763_v1 = vrot.slane %v12762_v60, 4  ;;  %v12765_v18 = vunpack.i.h.bf16 %v9111_v39 }
 0x229   : > { %v9600_v53 = vperm.slane %v2143_v5, %v7520_v32  ;;  %v2460_v15 = vrot.slane %v12761_v7, 4  ;;  %v2279_v10 = vsel %vm705_vm4, %v9575_v30, %v2278_v46  ;;  %v2494_v50 = vrot.slane %v9273_v52, 4 }
 0x22a   : > { %v2255_v0 = vsel %vm705_vm4, %v12764_v6, %v12763_v1  ;;  %v2573_v5 = vsel %vm705_vm4, %v12765_v18, %v2572_v23  ;;  %v9625_v40 = vperm.slane %v2279_v10, %v7520_v32  ;;  %v12766_v1 = vrot.slane %v12710_v11, 4  ;;  %v12768_v10 = vld [vmem:[#allocation43_spill] sm:$0xff] }
 0x22b   : > { %v2190_v36 = vrot.slane %v9600_v53, 4  ;;  %v9619_v13 = vperm.slane %v2255_v0, %v7520_v32  ;;  %v3505_v23 = vsel %vm705_vm4, %v3504_v47, %v9002_v9  ;;  %v12770_v21 = vrot.slane %v12769_v48, 4  ;;  %v12771_v9 = vld [vmem:[#allocation65_spill] sm:$0xff] }
 0x22c   : > { %v3481_v7 = vsel %vm705_vm4, %v12766_v1, %v12708_v14  ;;  %v9640_v52 = vperm.slane %v3505_v23, %v7520_v32  ;;  %v3617_v14 = vsel %vm705_vm4, %v3616_v44, %v9046_v2  ;;  %v3190_v47 = vrot.slane %v12771_v9, 4  ;;  %v12772_v1 = vld [vmem:[#allocation14_spill] sm:$0xff]  ;;  %v9662_v2 = vpop.permute.xlu0 %6346 }
 0x22d   : > { %v2191_v0 = vsel %vm705_vm4, %v9608_v38, %v2190_v36  ;;  %v2302_v18 = vrot.slane %v9619_v13, 4  ;;  %v9637_v46 = vperm.slane %v3481_v7, %v7520_v32  ;;  %v3593_v11 = vsel %vm705_vm4, %v12770_v21, %v12768_v10  ;;  %v9660_v21 = vpop.permute.xlu2 %6371  ;;  %12775 = vst [vmem:[#allocation20_spill] sm:$0xff] %v9662_v2  ;;  %v12776_v10 = vld [vmem:[#allocation64_spill] sm:$0xff] }
 0x22e   : > { %v3302_v36 = vrot.slane %v12772_v1, 4  ;;  %v9654_v23 = vperm.slane %v3593_v11, %v7520_v32  ;;  %v9657_v54 = vperm.slane %v3617_v14, %v7520_v32  ;;  %v2164_v48 = vrot.slane %v9552_v4, 4  ;;  %12774 = vst [vmem:[#allocation41_spill] sm:$0xff] %v9660_v21  ;;  %v12777_v1 = vld [vmem:[#allocation7_spill] sm:$0xff] }
 0x22f   : > { %12767 = vst [vmem:[#allocation27_spill] sm:$0xff] %v9637_v46  ;;  %v2303_v33 = vsel %vm705_vm4, %v9625_v40, %v2302_v18  ;;  %v3530_v7 = vrot.slane %v9637_v46, 4  ;;  %v3191_v9 = vsel %vm705_vm4, %v3190_v47, %v12776_v10  ;;  %v12778_v46 = vld [vmem:[#allocation55_spill] sm:$0xff]  ;;  %v2620_v4 = vrot.slane %v9596_v17, 4  ;;  %v12781_v10 = vld [vmem:[#allocation5_spill] sm:$0xff] }
 0x230   : > { %12773 = vst [vmem:[#allocation25_spill] sm:$0xff] %v9654_v23  ;;  %v6510_v44 = vpack.i.bf16 %v2303_v33, %v2191_v0  ;;  %v3303_v18 = vsel %vm705_vm4, %v3302_v36, %v12777_v1  ;;  %v2606_v56 = vrot.slane %v12778_v46, 4  ;;  %v3642_v14 = vrot.slane %v9654_v23, 4  ;;  %v9680_v36 = vpop.permute.xlu1 %6366  ;;  %v12784_v1 = vld [vmem:[#allocation8_spill] sm:$0xff] }
 0x231   : > { %v3531_v11 = vsel %vm705_vm4, %v9640_v52, %v3530_v7  ;;  %v6535_v35 = vpack.i.bf16 %v3303_v18, %v3191_v9  ;;  %v2276_v21 = vrot.slane %v9575_v30, 4  ;;  %v12779_v33 = vunpack.i.l.bf16 %v9111_v39  ;;  %v12780_v7 = vld [vmem:[#allocation16_spill] sm:$0xff]  ;;  %v12783_v39 = vld [vmem:[#allocation45_spill] sm:$0xff] }
 0x232   : > { %v9678_v47 = vperm.slane %v2573_v5, %v7342_v57  ;;  %6511 = vrot.lane.b32.xlu0 %v6510_v44, %s7021_s21  ;;  %v3643_v46 = vsel %vm705_vm4, %v9657_v54, %v3642_v14  ;;  %v12782_v9 = vrot.slane %v12781_v10, 4  ;;  %v12785_v5 = vld [vmem:[#allocation12_spill] sm:$0xff]  ;;  %v12790_v10 = vld [vmem:[#allocation35_spill] sm:$0xff] }
 0x233   : > { %v2461_v0 = vsel %vm705_vm4, %v12779_v33, %v2460_v15  ;;  %6536 = vrot.lane.b32.xlu2 %v6535_v35, %s7017_s17  ;;  %v2495_v15 = vsel %vm705_vm4, %v2494_v50, %v12783_v39  ;;  %v12786_v18 = vrot.slane %v12785_v5, 4  ;;  %v6545_v23 = vpack.i.bf16 %v3643_v46, %v3531_v11 }
 0x234   : > { %v2471_v30 = vsel %vm705_vm4, %v12782_v9, %v12780_v7  ;;  %v9700_v14 = vperm.slane %v2495_v15, %v7520_v32  ;;  %v2607_v7 = vsel %vm705_vm4, %v2606_v56, %v12790_v10  ;;  %v12791_v50 = vrot.slane %v12760_v22, 4 }
 0x235   : > { %v2583_v33 = vsel %vm705_vm4, %v12786_v18, %v12784_v1  ;;  %v9697_v44 = vperm.slane %v2471_v30, %v7520_v32  ;;  %v2165_v11 = vsel %vm705_vm4, %v2164_v48, %v9535_v31  ;;  %v12792_v46 = vrot.slane %v12764_v6, 4  ;;  %6546 = vrot.lane.b32.xlu1 %v6545_v23, %s7018_s18 }
 0x236   : > { %12788 = vst [vmem:[#allocation50_spill] sm:$0xff] %v9700_v14  ;;  %v9703_v35 = vperm.slane %v2583_v33, %v7520_v32  ;;  %v2141_v9 = vsel %vm705_vm4, %v12791_v50, %v12758_v8  ;;  %v2469_v39 = vperm.slane %v2461_v0, %v7342_v57  ;;  %v9721_v56 = vperm.slane %v2607_v7, %v7520_v32 }
 0x237   : > { %12787 = vst [vmem:[#allocation15_spill] sm:$0xff] %v9697_v44  ;;  %v2253_v30 = vsel %vm705_vm4, %v12792_v46, %v12762_v60  ;;  %v2520_v15 = vrot.slane %v9697_v44, 4  ;;  %v9725_v8 = vperm.slane %v2141_v9, %v7520_v32  ;;  %v9728_v31 = vperm.slane %v2165_v11, %v7520_v32  ;;  %v9749_v11 = vpop.permute.xlu2 %6386  ;;  %v9751_v46 = vpop.permute.xlu0 %6351 }
 0x238   : > { %12789 = vst [vmem:[#allocation52_spill] sm:$0xff] %v9703_v35  ;;  %v2632_v22 = vrot.slane %v9703_v35, 4  ;;  %v9731_v6 = vperm.slane %v2253_v30, %v7520_v32  ;;  %v2277_v60 = vsel %vm705_vm4, %v2276_v21, %v9478_v61  ;;  %v2508_v23 = vrot.slane %v9593_v45, 4  ;;  %v12794_v21 = vld [vmem:[#allocation62_spill] sm:$0xff]  ;;  %v12799_v35 = vld [vmem:[#allocation23_spill] sm:$0xff] }
 0x239   : > { %12793 = vst [vmem:[#allocation9_spill] sm:$0xff] %v9721_v56  ;;  %v2521_v48 = vsel %vm705_vm4, %v9700_v14, %v2520_v15  ;;  %v9741_v1 = vperm.slane %v2277_v60, %v7520_v32  ;;  %v2186_v18 = vrot.slane %v9725_v8, 4  ;;  %v3532_v10 = vrot.slane %v9380_v55, 4 }
 0x23a   : > { %v2633_v0 = vsel %vm705_vm4, %v9721_v56, %v2632_v22  ;;  %v2298_v33 = vrot.slane %v9731_v6, 4  ;;  %v2506_v7 = vrot.slane %v2469_v39, 4  ;;  %v2618_v61 = vrot.slane %v9678_v47, 4  ;;  %12796 = vst [vmem:[#allocation43_spill] sm:$0xff] %v9749_v11 }
 0x23b   : > { %v6515_v5 = vpack.i.bf16 %v2633_v0, %v2521_v48  ;;  %v12795_v50 = vunpack.i.h.bf16 %v12794_v21  ;;  %v3644_v30 = vrot.slane %v9403_v26, 4  ;;  %v12797_v15 = vunpack.i.l.bf16 %v12794_v21  ;;  %v9763_v0 = vpop.permute.xlu1 %6376 }
 0x23c   : > { %v2187_v55 = vsel %vm705_vm4, %v9728_v31, %v2186_v18  ;;  %v2299_v60 = vsel %vm705_vm4, %v9741_v1, %v2298_v33  ;;  %v3533_v48 = vsel %vm705_vm4, %v3532_v10, %v9363_v29  ;;  %12798 = vst [vmem:[#allocation53_spill] sm:$0xff] %v9763_v0  ;;  %v12800_v21 = vrot.slane %v12799_v35, 4  ;;  %v12802_v29 = vld [vmem:[#allocation47_spill] sm:$0xff]  ;;  %v12863_v0 = vld [vmem:[#allocation33_spill] sm:$0xff] }
 0x23d   : > { %v3582_v9 = vrot.slane %v12795_v50, 4  ;;  %v3470_v22 = vrot.slane %v12797_v15, 4  ;;  %6516 = vrot.lane.b32.xlu0 %v6515_v5, %s7018_s18  ;;  %v6555_v50 = vpack.i.bf16 %v2299_v60, %v2187_v55  ;;  %v3645_v26 = vsel %vm705_vm4, %v3644_v30, %v9384_v12  ;;  %v12801_v15 = vld [vmem:[#allocation6_spill] sm:$0xff]  ;;  %v12804_v55 = vld [vmem:[#allocation11_spill] sm:$0xff] }
 0x23e   : > { %v2485_v5 = vsel %vm705_vm4, %v12801_v15, %v12800_v21  ;;  %v2509_v44 = vsel %vm705_vm4, %v2469_v39, %v2508_v23  ;;  %v6550_v18 = vpack.i.bf16 %v3645_v26, %v3533_v48  ;;  %v12803_v10 = vrot.slane %v12802_v29, 4 }
 0x23f   : > { %v9773_v14 = vperm.slane %v2485_v5, %v7520_v32  ;;  %v9776_v33 = vperm.slane %v2509_v44, %v7520_v32  ;;  %6556 = vrot.lane.b32.xlu1 %v6555_v50, %s7020_s20  ;;  %v2621_v39 = vsel %vm705_vm4, %v9678_v47, %v2620_v4  ;;  %v12805_v23 = vrot.slane %v12801_v15, 4 }
 0x240   : > { %v2597_v60 = vsel %vm705_vm4, %v12804_v55, %v12803_v10  ;;  %v2507_v44 = vsel %vm705_vm4, %v2506_v7, %v9593_v45  ;;  %6551 = vrot.lane.b32.xlu2 %v6550_v18, %s7017_s17  ;;  %v2629_v50 = vperm.slane %v2621_v39, %v7520_v32  ;;  %v12806_v47 = vrot.slane %v12804_v55, 4 }
 0x241   : > { %v9784_v12 = vperm.slane %v2597_v60, %v7520_v32  ;;  %v2483_v30 = vsel %vm705_vm4, %v12805_v23, %v12799_v35  ;;  %v2532_v48 = vrot.slane %v9773_v14, 4  ;;  %v9801_v21 = vperm.slane %v2507_v44, %v7520_v32  ;;  %v12807_v60 = vld [vmem:[#allocation48_spill] sm:$0xff] }
 0x242   : > { %v9798_v26 = vperm.slane %v2483_v30, %v7520_v32  ;;  %v2595_v35 = vsel %vm705_vm4, %v12806_v47, %v12802_v29  ;;  %v2619_v45 = vsel %vm705_vm4, %v2618_v61, %v9596_v17  ;;  %v2188_v7 = vrot.slane %v9608_v38, 4 }
 0x243   : > { %v2644_v4 = vrot.slane %v9784_v12, 4  ;;  %v2533_v15 = vsel %vm705_vm4, %v9776_v33, %v2532_v48  ;;  %v9815_v18 = vperm.slane %v2595_v35, %v7520_v32  ;;  %v9818_v10 = vperm.slane %v2619_v45, %v7520_v32  ;;  %v12809_v48 = vld [vmem:[#allocation18_spill] sm:$0xff]  ;;  %v12810_v35 = vld [vmem:[#allocation29_spill] sm:$0xff] }
 0x244   : > { %v2528_v5 = vrot.slane %v9798_v26, 4  ;;  %v12808_v55 = vunpack.i.l.bf16 %v12807_v60  ;;  %v2189_v17 = vsel %vm705_vm4, %v2188_v7, %v9600_v53  ;;  %v2300_v38 = vrot.slane %v9625_v40, 4  ;;  %v9838_v53 = vpop.permute.xlu0 %6361 }
 0x245   : > { %v2645_v39 = vsel %vm705_vm4, %v2629_v50, %v2644_v4  ;;  %v3174_v61 = vrot.slane %v9445_v24, 4  ;;  %v2640_v44 = vrot.slane %v9815_v18, 4  ;;  %v3604_v47 = vrot.slane %v12809_v48, 4  ;;  %12812 = vst [vmem:[#allocation65_spill] sm:$0xff] %v9838_v53 }
 0x246   : > { %v3471_v29 = vsel %vm705_vm4, %v12808_v55, %v3470_v22  ;;  %v6525_v23 = vpack.i.bf16 %v2645_v39, %v2533_v15  ;;  %v2529_v30 = vsel %vm705_vm4, %v9801_v21, %v2528_v5  ;;  %v3492_v45 = vrot.slane %v12810_v35, 4  ;;  %v9836_v55 = vpop.permute.xlu2 %6391 }
 0x247   : > { %v12811_v22 = vunpack.i.h.bf16 %v12807_v60  ;;  %v2301_v24 = vsel %vm705_vm4, %v2300_v38, %v9619_v13  ;;  %v3286_v40 = vrot.slane %v9448_v42, 4  ;;  %v9844_v7 = vperm.slane %v3471_v29, %v7342_v57 }
 0x248   : > { %6526 = vrot.lane.b32.xlu0 %v6525_v23, %s7021_s21  ;;  %v2641_v15 = vsel %vm705_vm4, %v9818_v10, %v2640_v44  ;;  %v6560_v5 = vpack.i.bf16 %v2301_v24, %v2189_v17  ;;  %v3198_v13 = vrot.slane %v9525_v51, 4  ;;  %v3310_v42 = vrot.slane %v9531_v20, 4 }
 0x249   : > { %v3583_v4 = vsel %vm705_vm4, %v12811_v22, %v3582_v9  ;;  %v12813_v9 = vld [vmem:[#allocation38_spill] sm:$0xff]  ;;  %v9853_v22 = vpop.permute.xlu1 %6381  ;;  %v6565_v56 = vpack.i.bf16 %v2641_v15, %v2529_v30  ;;  %v3175_v51 = vsel %vm705_vm4, %v3174_v61, %v8936_v62  ;;  %v12818_v44 = vrot.slane %v12745_v49, 4 }
 0x24a   : > { %v12814_v60 = vunpack.i.l.bf16 %v12813_v9  ;;  %12815 = vst [vmem:[#allocation14_spill] sm:$0xff] %v9853_v22  ;;  %v12816_v29 = vunpack.i.h.bf16 %v12813_v9  ;;  %v9862_v23 = vperm.slane %v3583_v4, %v7342_v57  ;;  %6561 = vrot.lane.b32.xlu2 %v6560_v5, %s7019_s19  ;;  %v3199_v20 = vsel %vm705_vm4, %v3198_v13, %v9522_v28 }
 0x24b   : > { %6566 = vrot.lane.b32.xlu1 %v6565_v56, %s7020_s20  ;;  %v3181_v30 = vperm.slane %v3175_v51, %v7520_v32  ;;  %v3516_v4 = vrot.slane %v9844_v7, 4  ;;  %v3287_v62 = vsel %vm705_vm4, %v3286_v40, %v8943_v41  ;;  %v2530_v56 = vrot.slane %v9776_v33, 4 }
 0x24c   : > { %v3459_v39 = vsel %vm705_vm4, %v12814_v60, %v9581_v43  ;;  %v3571_v38 = vsel %vm705_vm4, %v12816_v29, %v9549_v58  ;;  %v12817_v43 = vrot.slane %v12741_v3, 4  ;;  %v3311_v58 = vsel %vm705_vm4, %v3310_v42, %v9528_v27 }
 0x24d   : > { %v3263_v3 = vsel %vm705_vm4, %v12818_v44, %v12743_v59  ;;  %v3194_v61 = vrot.slane %v3181_v30, 4  ;;  %v3293_v27 = vperm.slane %v3287_v62, %v7520_v32  ;;  %v2642_v24 = vrot.slane %v2629_v50, 4 }
 0x24e   : > { %v3151_v17 = vsel %vm705_vm4, %v12817_v43, %v12739_v16  ;;  %v3467_v16 = vperm.slane %v3459_v39, %v7342_v57  ;;  %v3628_v15 = vrot.slane %v9862_v23, 4  ;;  %v6580_v49 = vpack.i.bf16 %v3311_v58, %v3199_v20  ;;  %v9895_v33 = vpop.permute.xlu2 %6421  ;;  %v12819_v39 = vld [vmem:[#allocation44_spill] sm:$0xff] }
 0x24f   : > { %v3157_v28 = vperm.slane %v3151_v17, %v7520_v32  ;;  %v3269_v59 = vperm.slane %v3263_v3, %v7520_v32  ;;  %v2531_v5 = vsel %vm705_vm4, %v2530_v56, %v9773_v14  ;;  %v3306_v60 = vrot.slane %v3293_v27, 4  ;;  %v9902_v14 = vpop.permute.xlu0 %6396  ;;  %v12820_v17 = vld [vmem:[#allocation21_spill] sm:$0xff] }
 0x250   : > { %v2643_v41 = vsel %vm705_vm4, %v2642_v24, %v9784_v12  ;;  %v2184_v40 = vrot.slane %v9728_v31, 4  ;;  %v3606_v50 = vrot.slane %v12819_v39, 4  ;;  %6581 = vrot.lane.b32.xlu0 %v6580_v49, %s7019_s19  ;;  %v2296_v42 = vrot.slane %v9741_v1, 4 }
 0x251   : > { %v3195_v9 = vsel %vm705_vm4, %v3194_v61, %v3157_v28  ;;  %v6570_v13 = vpack.i.bf16 %v2643_v41, %v2531_v5  ;;  %v3579_v29 = vperm.slane %v3571_v38, %v7342_v57  ;;  %v3307_v43 = vsel %vm705_vm4, %v3306_v60, %v3269_v59  ;;  %v9915_v44 = vpop.permute.xlu1 %6406  ;;  %v12836_v57 = vld [vmem:[#allocation39_spill] sm:$0xff] }
 0x252   : > { %v3493_v12 = vsel %vm705_vm4, %v3492_v45, %v12820_v17  ;;  %v3517_v51 = vsel %vm705_vm4, %v3516_v4, %v3467_v16  ;;  %v6605_v20 = vpack.i.bf16 %v3307_v43, %v3195_v9  ;;  %v2185_v31 = vsel %vm705_vm4, %v2184_v40, %v9725_v8 }
 0x253   : > { %6571 = vrot.lane.b32.xlu2 %v6570_v13, %s7019_s19  ;;  %v2297_v1 = vsel %vm705_vm4, %v2296_v42, %v9731_v6  ;;  %v3523_v38 = vperm.slane %v3517_v51, %v7520_v32  ;;  %v3494_v58 = vrot.slane %v12820_v17, 4  ;;  %v3605_v45 = vsel %vm705_vm4, %v3604_v47, %v12819_v39 }
 0x254   : > { %v3629_v3 = vsel %vm705_vm4, %v3628_v15, %v3579_v29  ;;  %v3196_v4 = vrot.slane %v3157_v28, 4  ;;  %6606 = vrot.lane.b32.xlu1 %v6605_v20, %s7022_s22  ;;  %v3499_v62 = vperm.slane %v3493_v12, %v7520_v32  ;;  %v3308_v6 = vrot.slane %v3269_v59, 4 }
 0x255   : > { %v3536_v8 = vrot.slane %v3523_v38, 4  ;;  %v3635_v56 = vperm.slane %v3629_v3, %v7520_v32  ;;  %v3518_v61 = vrot.slane %v3467_v16, 4  ;;  %v3630_v24 = vrot.slane %v3579_v29, 4 }
 0x256   : > { %v6590_v49 = vpack.i.bf16 %v2297_v1, %v2185_v31  ;;  %v3197_v5 = vsel %vm705_vm4, %v3181_v30, %v3196_v4  ;;  %v3611_v47 = vperm.slane %v3605_v45, %v7520_v32  ;;  %v3309_v28 = vsel %vm705_vm4, %v3293_v27, %v3308_v6  ;;  %v9937_v42 = vpop.permute.xlu2 %6431 }
 0x257   : > { %v3537_v9 = vsel %vm705_vm4, %v3536_v8, %v3499_v62  ;;  %v3648_v60 = vrot.slane %v3635_v56, 4  ;;  %v2526_v15 = vrot.slane %v9801_v21, 4  ;;  %v2638_v41 = vrot.slane %v9818_v10, 4  ;;  %12821 = vst [vmem:[#allocation64_spill] sm:$0xff] %v9937_v42  ;;  %v9946_v17 = vpop.permute.xlu0 %6401 }
 0x258   : > { %v3495_v40 = vsel %vm705_vm4, %v12810_v35, %v3494_v58  ;;  %v3519_v16 = vsel %vm705_vm4, %v9844_v7, %v3518_v61  ;;  %6591 = vrot.lane.b32.xlu0 %v6590_v49, %s7022_s22  ;;  %v6575_v59 = vpack.i.bf16 %v3309_v28, %v3197_v5  ;;  %v3607_v21 = vsel %vm705_vm4, %v12809_v48, %v3606_v50 }
 0x259   : > { %v3649_v30 = vsel %vm705_vm4, %v3648_v60, %v3611_v47  ;;  %v3503_v39 = vperm.slane %v3495_v40, %v7520_v32  ;;  %v3527_v13 = vperm.slane %v3519_v16, %v7520_v32  ;;  %v3631_v10 = vsel %vm705_vm4, %v9862_v23, %v3630_v24  ;;  %v9952_v50 = vpop.permute.xlu1 %6411 }
 0x25a   : > { %v6610_v27 = vpack.i.bf16 %v3649_v30, %v3537_v9  ;;  %v3615_v7 = vperm.slane %v3607_v21, %v7520_v32  ;;  %v3639_v29 = vperm.slane %v3631_v10, %v7520_v32  ;;  %v3538_v43 = vrot.slane %v3499_v62, 4  ;;  %v12825_v10 = vld [vmem:[#allocation57_spill] sm:$0xff] }
 0x25b   : > { %6576 = vrot.lane.b32.xlu2 %v6575_v59, %s7020_s20  ;;  %v3542_v35 = vrot.slane %v3503_v39, 4  ;;  %v2527_v12 = vsel %vm705_vm4, %v2526_v15, %v9798_v26  ;;  %v2639_v51 = vsel %vm705_vm4, %v2638_v41, %v9815_v18  ;;  %v3650_v48 = vrot.slane %v3611_v47, 4 }
 0x25c   : > { %6611 = vrot.lane.b32.xlu1 %v6610_v27, %s7022_s22  ;;  %v3654_v20 = vrot.slane %v3615_v7, 4  ;;  %v3539_v31 = vsel %vm705_vm4, %v3523_v38, %v3538_v43  ;;  %v3540_v58 = vrot.slane %v3527_v13, 4  ;;  %v3652_v45 = vrot.slane %v3639_v29, 4 }
 0x25d   : > { %v3543_v23 = vsel %vm705_vm4, %v3527_v13, %v3542_v35  ;;  %v3651_v1 = vsel %vm705_vm4, %v3635_v56, %v3650_v48  ;;  %v6595_v3 = vpack.i.bf16 %v2639_v51, %v2527_v12  ;;  %v913_v35 = vrot.slane %v12825_v10, 4  ;;  %v12828_v12 = vld [vmem:[#allocation56_spill] sm:$0xff]  ;;  %v12834_v10 = vld [vmem:[#allocation22_spill] sm:$0xff] }
 0x25e   : > { %v3655_v26 = vsel %vm705_vm4, %v3639_v29, %v3654_v20  ;;  %v6585_v4 = vpack.i.bf16 %v3651_v1, %v3539_v31  ;;  %v3541_v18 = vsel %vm705_vm4, %v3540_v58, %v3503_v39  ;;  %v3653_v8 = vsel %vm705_vm4, %v3652_v45, %v3615_v7  ;;  %v9963_v61 = vpop.permute.xlu2 %6436  ;;  %v12826_v7 = vld [vmem:[#allocation63_spill] sm:$0xff]  ;;  %v12830_v1 = vld [vmem:[#allocation24_spill] sm:$0xff]  ;;  %v12831_v45 = vld [vmem:[#allocation58_spill] sm:$0xff] }
 0x25f   : > { %v6615_v62 = vpack.i.bf16 %v3655_v26, %v3543_v23  ;;  %v6600_v6 = vpack.i.bf16 %v3653_v8, %v3541_v18  ;;  %v9965_v38 = vpop.permute.xlu0 %6426  ;;  %v6314_v29 = vunpack.i.h.bf16 %v12826_v7  ;;  %v801_v51 = vrot.slane %v12828_v12, 4  ;;  %v12829_v20 = vld [vmem:[#allocation59_spill] sm:$0xff]  ;;  %v12832_v26 = vld [vmem:[#allocation61_spill] sm:$0xff]  ;;  %v12833_v8 = vld [vmem:[#allocation60_spill] sm:$0xff] }
 0x260   : > { %6596 = vrot.lane.b32.xlu0 %v6595_v3, %s7022_s22  ;;  %v6319_v48 = vunpack.i.h.bf16 %v9455_v19  ;;  %v6313_v23 = vunpack.i.l.bf16 %v12826_v7  ;;  %v2828_v31 = vrot.slane %v12829_v20, 4  ;;  %v914_v58 = vsel %vm705_vm4, %v913_v35, %v12830_v1  ;;  %v12835_v20 = vld [vmem:[#allocation40_spill] sm:$0xff]  ;;  %v12844_v35 = vld [vmem:[#allocation41_spill] sm:$0xff] }
 0x261   : > { %v9968_v56 = vpop.permute.xlu1 %6416  ;;  %v2940_v3 = vrot.slane %v12831_v45, 4  ;;  %v6318_v18 = vunpack.i.l.bf16 %v9455_v19  ;;  %v802_v12 = vsel %vm705_vm4, %v801_v51, %v12834_v10  ;;  %v12837_v45 = vld [vmem:[#allocation46_spill] sm:$0xff]  ;;  %v6353_v51 = vunpack.i.l.bf16 %v9751_v46 }
 0x262   : > { %v986_v1 = vsel %vm985_vm5, %v802_v12, %v6313_v23  ;;  %v6374_v19 = vunpack.i.h.bf16 %v12844_v35  ;;  %v6373_v23 = vunpack.i.l.bf16 %v12844_v35 }
 0x263   : > { %6586 = vrot.lane.b32.xlu2 %v6585_v4, %s7020_s20  ;;  %v1818_v4 = vrot.slane %v12832_v26, 4  ;;  %v6289_v26 = vunpack.i.h.bf16 %v12837_v45 }
 0x264   : > { %6616 = vrot.lane.b32.xlu1 %v6615_v62, %s7021_s21  ;;  %v999_v62 = vsel %vm985_vm5, %v914_v58, %v6314_v29  ;;  %v12839_v29 = vld [vmem:[#allocation37_spill] sm:$0xff]  ;;  %v6369_v58 = vunpack.i.h.bf16 %v9680_v36 }
 0x265   : > { %v1000_v7 = vsel %vm987_vm6, %v999_v62, %v6319_v48  ;;  %v10035_v62 = vsel %vm987_vm6, %v986_v1, %v6318_v18  ;;  %v2829_v48 = vsel %vm705_vm4, %v2828_v31, %v12845_v25  ;;  %v12846_v18 = vld [vmem:[#allocation36_spill] sm:$0xff]  ;;  %v12851_v25 = vld [vmem:[#allocation26_spill] sm:$0xff] }
 0x266   : > { %v9971_v24 = vpop.permute.xlu2 %6446  ;;  %12841 = vst [vmem:[#allocation8_spill] sm:$0xff] %v10035_v62  ;;  %v10038_v10 = vsel %vm989_vm7, %v1000_v7, %v6289_v26  ;;  %v6354_v7 = vunpack.i.h.bf16 %v9751_v46  ;;  %v2941_v1 = vsel %vm705_vm4, %v2940_v3, %v12846_v18  ;;  %v1819_v46 = vsel %vm705_vm4, %v1818_v4, %v12847_v37  ;;  %v12852_v37 = vld [vmem:[#allocation70_spill] sm:$0xff] }
 0x267   : > { %12822 = vst [vmem:[#allocation7_spill] sm:$0xff] %v9971_v24  ;;  %v9973_v49 = vpop.permute.xlu0 %6441  ;;  %v3019_v62 = vsel %vm985_vm5, %v2941_v1, %v6369_v58  ;;  %v2002_v45 = vsel %vm985_vm5, %v1819_v46, %v6353_v51  ;;  %v6358_v31 = vunpack.i.l.bf16 %v12851_v25  ;;  %v6359_v18 = vunpack.i.h.bf16 %v12851_v25 }
 0x268   : > { %6601 = vrot.lane.b32.xlu0 %v6600_v6, %s7019_s19  ;;  %v1930_v6 = vrot.slane %v12833_v8, 4  ;;  %v12840_v8 = vld [vmem:[#allocation34_spill] sm:$0xff]  ;;  %12842 = vst [vmem:[#allocation12_spill] sm:$0xff] %v10038_v10  ;;  %v3020_v51 = vsel %vm987_vm6, %v3019_v62, %v6374_v19  ;;  %v6409_v25 = vunpack.i.h.bf16 %v9915_v44  ;;  %v6439_v10 = vunpack.i.h.bf16 %v9963_v61 }
 0x269   : > { %v9975_v5 = vpop.permute.xlu1 %6456  ;;  %v10085_v46 = vsel %vm987_vm6, %v2002_v45, %v6358_v31  ;;  %v12854_v31 = vld [vmem:[#allocation9_spill] sm:$0xff]  ;;  %v12856_v19 = vunpack.i.h.bf16 %v9566_v63  ;;  %v6444_v4 = vunpack.i.h.bf16 %v9973_v49  ;;  %v12862_v22 = vrot.slane %v12840_v8, 4 }
 0x26a   : > { %12823 = vst [vmem:[#allocation55_spill] sm:$0xff] %v9975_v5  ;;  %v1931_v35 = vsel %vm705_vm4, %v1930_v6, %v12848_v34  ;;  %v12853_v34 = vld [vmem:[#allocation72_spill] sm:$0xff]  ;;  %v6414_v8 = vunpack.i.h.bf16 %v9952_v50 }
 0x26b   : > { %v2009_v3 = vsel %vm985_vm5, %v1931_v35, %v6354_v7  ;;  %v6423_v35 = vunpack.i.l.bf16 %v9895_v33 }
 0x26c   : > { %v2010_v7 = vsel %vm987_vm6, %v2009_v3, %v6359_v18  ;;  %v12855_v18 = vld [vmem:[#allocation50_spill] sm:$0xff] }
 0x26d   : > { %v2011_v58 = vsel %vm989_vm7, %v2010_v7, %v12856_v19  ;;  %v12861_v19 = vld [vmem:[#allocation49_spill] sm:$0xff] }
 0x26e   : > { %v9977_v9 = vpop.permute.xlu2 %6471  ;;  %v1509_v53 = vsel %vm705_vm4, %v12862_v22, %v12861_v19 }
 0x26f   : > { %v9979_v47 = vpop.permute.xlu0 %6451 }
 0x270   : > { %12824 = vst [vmem:[#allocation16_spill] sm:$0xff] %v9979_v47 }
 0x271   : > { %v9981_v60 = vpop.permute.xlu1 %6466 }
 0x276   : > { %v9983_v28 = vpop.permute.xlu2 %6476 }
 0x277   : > { %v9985_v15 = vpop.permute.xlu0 %6461 }
 0x279   : > { %v9987_v41 = vpop.permute.xlu1 %6506 }
 0x27e   : > { %v9991_v16 = vpop.permute.xlu2 %6481 }
 0x27f   : > { %v9989_v40 = vpop.permute.xlu0 %6491 }
 0x281   : > { %v9993_v30 = vpop.permute.xlu1 %6521 }
 0x286   : > { %v9997_v39 = vpop.permute.xlu2 %6486 }
 0x287   : > { %v9995_v59 = vpop.permute.xlu0 %6496 }
 0x28b   : > { %v9999_v13 = vpop.permute.xlu1 %6531 }
 0x28e   : > { %v10003_v21 = vpop.permute.xlu2 %6536 }
 0x294   : > { %v10001_v27 = vpop.permute.xlu0 %6501 }
 0x299   : > { %v10007_v43 = vpop.permute.xlu1 %6541 }
 0x29a   : > { %12827 = vst [vmem:[#allocation5_spill] sm:$0xff] %v10007_v43  ;;  %v10041_v12 = vpop.permute.xlu2 %6551  ;;  %v6368_v43 = vunpack.i.l.bf16 %v9680_v36  ;;  %v6349_v36 = vunpack.i.h.bf16 %v9662_v2  ;;  %v12850_v2 = vld [vmem:[#allocation66_spill] sm:$0xff] }
 0x29b   : > { %12843 = vst [vmem:[#allocation35_spill] sm:$0xff] %v10041_v12  ;;  %v6429_v12 = vunpack.i.h.bf16 %v9965_v38 }
 0x29c   : > { %v3012_v32 = vsel %vm985_vm5, %v2829_v48, %v6368_v43  ;;  %v3021_v3 = vsel %vm989_vm7, %v3020_v51, %v6349_v36  ;;  %v6438_v43 = vunpack.i.l.bf16 %v9963_v61  ;;  %v12858_v51 = vrot.slane %v12836_v57, 4 }
 0x29d   : > { %v10082_v1 = vsel %vm987_vm6, %v3012_v32, %v6373_v23  ;;  %v6404_v32 = vunpack.i.h.bf16 %v9946_v17  ;;  %v6424_v23 = vunpack.i.h.bf16 %v9895_v33  ;;  %v10115_v6 = vsel %vm991_vm8, %v3021_v3, %v6409_v25  ;;  %v12857_v33 = vld [vmem:[#allocation17_spill] sm:$0xff]  ;;  %v12859_v25 = vld [vmem:[#allocation31_spill] sm:$0xff] }
 0x29e   : > { %v1167_v61 = vsel %vm705_vm4, %v12858_v51, %v12857_v33  ;;  %v12860_v3 = vrot.slane %v12835_v20, 4  ;;  %v6428_v57 = vunpack.i.l.bf16 %v9965_v38 }
 0x29f   : > { %v10124_v36 = vsel %vm991_vm8, %v2011_v58, %v6404_v32  ;;  %v12864_v58 = vrot.slane %v12839_v29, 4  ;;  %v1350_v20 = vsel %vm985_vm5, %v1167_v61, %v6423_v35  ;;  %v6474_v29 = vunpack.i.h.bf16 %v9977_v9 }
 0x2a0   : > { %v1279_v11 = vsel %vm705_vm4, %v12860_v3, %v12859_v25  ;;  %v6419_v35 = vunpack.i.h.bf16 %v9968_v56  ;;  %v12876_v25 = vld [vmem:[#allocation25_spill] sm:$0xff] }
 0x2a1   : > { %v1357_v7 = vsel %vm985_vm5, %v1279_v11, %v6424_v23  ;;  %v1621_v32 = vsel %vm705_vm4, %v12864_v58, %v12863_v0  ;;  %v1692_v11 = vsel %vm985_vm5, %v1509_v53, %v6438_v43  ;;  %v6443_v23 = vunpack.i.l.bf16 %v9973_v49 }
 0x2a2   : > { %v1699_v51 = vsel %vm985_vm5, %v1621_v32, %v6439_v10  ;;  %v1358_v22 = vsel %vm987_vm6, %v1357_v7, %v6429_v12  ;;  %v6479_v10 = vunpack.i.h.bf16 %v9983_v28  ;;  %v10164_v12 = vsel %vm987_vm6, %v1350_v20, %v6428_v57 }
 0x2a3   : > { %v1700_v0 = vsel %vm987_vm6, %v1699_v51, %v6444_v4  ;;  %v1359_v3 = vsel %vm989_vm7, %v1358_v22, %v6414_v8  ;;  %v10170_v7 = vsel %vm987_vm6, %v1692_v11, %v6443_v23  ;;  %v12866_v11 = vld [vmem:[#allocation10_spill] sm:$0xff]  ;;  %v12867_v23 = vrot.slane %v12850_v2, 4 }
 0x2a4   : > { %v10027_v42 = vpop.permute.xlu0 %6511  ;;  %v10095_v62 = vpop.permute.xlu2 %6561  ;;  %v1701_v19 = vsel %vm989_vm7, %v1700_v0, %v6419_v35  ;;  %v10176_v51 = vsel %vm991_vm8, %v1359_v3, %v6474_v29  ;;  %v12868_v0 = vld [vmem:[#allocation67_spill] sm:$0xff]  ;;  %v6483_v49 = vunpack.i.l.bf16 %v9991_v16  ;;  %v6533_v2 = vunpack.i.l.bf16 %v9999_v13 }
 0x2a5   : > { %12838 = vst [vmem:[#allocation45_spill] sm:$0xff] %v10027_v42  ;;  %v12849_v42 = vld [vmem:[#allocation30_spill] sm:$0xff]  ;;  %v10182_v8 = vsel %vm991_vm8, %v1701_v19, %v6479_v10  ;;  %v3187_v22 = vsel %vm705_vm4, %v12867_v23, %v12866_v11  ;;  %v6534_v19 = vunpack.i.h.bf16 %v9999_v13  ;;  %v12870_v11 = vld [vmem:[#allocation69_spill] sm:$0xff]  ;;  %v12871_v23 = vrot.slane %v12852_v37, 4 }
 0x2a6   : > { %12865 = vst [vmem:[#allocation62_spill] sm:$0xff] %v10176_v51  ;;  %v12869_v35 = vrot.slane %v12849_v42, 4  ;;  %v6509_v32 = vunpack.i.h.bf16 %v9987_v41  ;;  %v6508_v20 = vunpack.i.l.bf16 %v9987_v41  ;;  %v6494_v13 = vunpack.i.h.bf16 %v9989_v40 }
 0x2a7   : > { %v10051_v26 = vpop.permute.xlu1 %6546  ;;  %v2177_v42 = vsel %vm705_vm4, %v12871_v23, %v12870_v11  ;;  %v6493_v4 = vunpack.i.l.bf16 %v9989_v40  ;;  %v6504_v37 = vunpack.i.h.bf16 %v10001_v27  ;;  %v6503_v11 = vunpack.i.l.bf16 %v10001_v27 }
 0x2a8   : > { %v3299_v29 = vsel %vm705_vm4, %v12869_v35, %v12868_v0  ;;  %v12872_v0 = vld [vmem:[#allocation71_spill] sm:$0xff]  ;;  %v12873_v35 = vrot.slane %v12853_v34, 4  ;;  %v6524_v34 = vunpack.i.h.bf16 %v9993_v30  ;;  %v6523_v23 = vunpack.i.l.bf16 %v9993_v30 }
 0x2a9   : > { %v12877_v43 = vrot.slane %v9657_v54, 4  ;;  %v3377_v40 = vsel %vm985_vm5, %v3299_v29, %v6534_v19  ;;  %v3370_v3 = vsel %vm985_vm5, %v3187_v22, %v6533_v2  ;;  %v6549_v27 = vunpack.i.h.bf16 %v10051_v26 }
 0x2aa   : > { %v2289_v57 = vsel %vm705_vm4, %v12873_v35, %v12872_v0  ;;  %v12874_v0 = vld [vmem:[#allocation27_spill] sm:$0xff]  ;;  %v12875_v35 = vrot.slane %v9640_v52, 4  ;;  %v6548_v24 = vunpack.i.l.bf16 %v10051_v26  ;;  %v6539_v52 = vunpack.i.h.bf16 %v10003_v21 }
 0x2ab   : > { %v3641_v38 = vsel %vm705_vm4, %v12877_v43, %v12876_v25  ;;  %v12879_v54 = vrot.slane %v12855_v18, 4  ;;  %v12880_v43 = vld [vmem:[#allocation52_spill] sm:$0xff]  ;;  %v12881_v29 = vrot.slane %v12854_v31, 4  ;;  %v2367_v19 = vsel %vm985_vm5, %v2289_v57, %v6504_v37  ;;  %v12882_v31 = vld [vmem:[#allocation35_spill] sm:$0xff] }
 0x2ac   : > { %v3529_v41 = vsel %vm705_vm4, %v12875_v35, %v12874_v0  ;;  %v6538_v0 = vunpack.i.l.bf16 %v10003_v21  ;;  %v12878_v35 = vld [vmem:[#allocation15_spill] sm:$0xff]  ;;  %v2360_v26 = vsel %vm985_vm5, %v2177_v42, %v6503_v11  ;;  %v6499_v21 = vunpack.i.h.bf16 %v9995_v59  ;;  %v12884_v47 = vld [vmem:[#allocation45_spill] sm:$0xff] }
 0x2ad   : > { %v10158_v61 = vpop.permute.xlu2 %6571  ;;  %v2519_v25 = vsel %vm705_vm4, %v12879_v54, %v12878_v35  ;;  %v2631_v22 = vsel %vm705_vm4, %v12881_v29, %v12880_v43  ;;  %v6498_v51 = vunpack.i.l.bf16 %v9995_v59  ;;  %v3378_v18 = vsel %vm987_vm6, %v3377_v40, %v6539_v52  ;;  %v12883_v29 = vld [vmem:[#allocation5_spill] sm:$0xff] }
 0x2ae   : > { %v3371_v35 = vsel %vm987_vm6, %v3370_v3, %v6538_v0  ;;  %v6554_v43 = vunpack.i.h.bf16 %v12882_v31  ;;  %v6553_v57 = vunpack.i.l.bf16 %v12882_v31  ;;  %v3719_v42 = vsel %vm985_vm5, %v3641_v38, %v6549_v27 }
 0x2af   : > { %v10077_v48 = vpop.permute.xlu0 %6516  ;;  %v3712_v37 = vsel %vm985_vm5, %v3529_v41, %v6548_v24  ;;  %v2361_v11 = vsel %vm987_vm6, %v2360_v26, %v6508_v20  ;;  %v6544_v59 = vunpack.i.h.bf16 %v12883_v29  ;;  %v6543_v40 = vunpack.i.l.bf16 %v12883_v29 }
 0x2b0   : > { %v6519_v2 = vunpack.i.h.bf16 %v10077_v48  ;;  %v6518_v5 = vunpack.i.l.bf16 %v10077_v48  ;;  %v2368_v48 = vsel %vm987_vm6, %v2367_v19, %v6509_v32  ;;  %v6564_v3 = vunpack.i.h.bf16 %v10095_v62 }
 0x2b1   : > { %v10097_v45 = vpop.permute.xlu1 %6556  ;;  %v6563_v52 = vunpack.i.l.bf16 %v10095_v62  ;;  %v6514_v38 = vunpack.i.h.bf16 %v12884_v47  ;;  %v3720_v24 = vsel %vm987_vm6, %v3719_v42, %v6554_v43  ;;  %v3713_v32 = vsel %vm987_vm6, %v3712_v37, %v6553_v57 }
 0x2b2   : > { %v2709_v0 = vsel %vm985_vm5, %v2631_v22, %v6519_v2  ;;  %v2702_v31 = vsel %vm985_vm5, %v2519_v25, %v6518_v5  ;;  %v3372_v20 = vsel %vm989_vm7, %v3371_v35, %v6493_v4  ;;  %v6574_v41 = vunpack.i.h.bf16 %v10158_v61 }
 0x2b3   : > { %v6573_v27 = vunpack.i.l.bf16 %v10158_v61  ;;  %v3379_v19 = vsel %vm989_vm7, %v3378_v18, %v6494_v13  ;;  %v10272_v26 = vsel %vm989_vm7, %v2361_v11, %v6483_v49  ;;  %v2710_v5 = vsel %vm987_vm6, %v2709_v0, %v6524_v34  ;;  %v12886_v13 = vld [vmem:[#allocation20_spill] sm:$0xff] }
 0x2b4   : > { %v2703_v25 = vsel %vm987_vm6, %v2702_v31, %v6523_v23  ;;  %v12885_v57 = vunpack.i.h.bf16 %v9991_v16  ;;  %v3714_v35 = vsel %vm989_vm7, %v3713_v32, %v6498_v51  ;;  %v3721_v37 = vsel %vm989_vm7, %v3720_v24, %v6499_v21 }
 0x2b5   : > { %v10230_v30 = vpop.permute.xlu2 %6576  ;;  %v12887_v18 = vunpack.i.l.bf16 %v12886_v13  ;;  %v6559_v34 = vunpack.i.h.bf16 %v10097_v45  ;;  %v6558_v23 = vunpack.i.l.bf16 %v10097_v45  ;;  %v12888_v16 = vunpack.i.l.bf16 %v9915_v44  ;;  %v12903_v45 = vld [vmem:[#allocation43_spill] sm:$0xff] }
 0x2b6   : > { %v2369_v4 = vsel %vm989_vm7, %v2368_v48, %v12885_v57  ;;  %v6578_v51 = vunpack.i.l.bf16 %v10230_v30  ;;  %v12889_v21 = vunpack.i.l.bf16 %v9997_v39  ;;  %v12890_v31 = vunpack.i.h.bf16 %v9997_v39 }
 0x2b7   : > { %v3014_v49 = vsel %vm989_vm7, %v10082_v1, %v12887_v18 }
 0x2b8   : > { %v3015_v48 = vsel %vm991_vm8, %v3014_v49, %v12888_v16  ;;  %v2704_v0 = vsel %vm989_vm7, %v2703_v25, %v12889_v21  ;;  %v2711_v1 = vsel %vm989_vm7, %v2710_v5, %v12890_v31  ;;  %v12892_v25 = vunpack.i.h.bf16 %v9836_v55 }
 0x2b9   : > { %v12895_v31 = vunpack.i.l.bf16 %v9566_v63 }
 0x2ba   : > { %v10144_v33 = vpop.permute.xlu0 %6526  ;;  %v3023_v39 = vsel %vm993_vm9, %v10115_v6, %v12892_v25  ;;  %v12894_v6 = vunpack.i.h.bf16 %v9902_v14  ;;  %v12896_v25 = vunpack.i.l.bf16 %v9946_v17 }
 0x2bd   : > { %v10160_v53 = vpop.permute.xlu1 %6566  ;;  %v6587_v42 = vpop.permute.xlu2 %6586 }
 0x2be   : > { %v6589_v24 = vunpack.i.h.bf16 %v6587_v42  ;;  %v6569_v5 = vunpack.i.h.bf16 %v10160_v53  ;;  %v6588_v49 = vunpack.i.l.bf16 %v6587_v42  ;;  %v3024_v42 = vsel %vm995_vm10, %v3023_v39, %v12894_v6 }
 0x2bf   : > { %v6568_v63 = vunpack.i.l.bf16 %v10160_v53 }
 0x2c2   : > { %v10196_v10 = vpop.permute.xlu0 %6581 }
 0x2c6   : > { %v6607_v58 = vpop.permute.xlu1 %6606 }
 0x2c7   : > { %v6609_v2 = vunpack.i.h.bf16 %v6607_v58  ;;  %v6608_v43 = vunpack.i.l.bf16 %v6607_v58  ;;  %v6579_v58 = vunpack.i.h.bf16 %v10230_v30  ;;  %v12891_v30 = vunpack.i.l.bf16 %v9836_v55 }
 0x2c8   : > { %v12893_v55 = vunpack.i.l.bf16 %v9902_v14 }
 0x2c9   : > { %v3373_v32 = vsel %vm991_vm8, %v3372_v20, %v6608_v43  ;;  %v3380_v57 = vsel %vm991_vm8, %v3379_v19, %v6609_v2  ;;  %v3016_v18 = vsel %vm993_vm9, %v3015_v48, %v12891_v30  ;;  %v6584_v20 = vunpack.i.h.bf16 %v10196_v10 }
 0x2ca   : > { %v10250_v54 = vpop.permute.xlu0 %6591  ;;  %v6583_v19 = vunpack.i.l.bf16 %v10196_v10  ;;  %v3381_v16 = vsel %vm993_vm9, %v3380_v57, %v6579_v58  ;;  %v3017_v21 = vsel %vm995_vm10, %v3016_v18, %v12893_v55  ;;  %v2004_v10 = vsel %vm989_vm7, %v10085_v46, %v12895_v31  ;;  %v3771_v58 = vld [vmem:[%s12162_s5] sm:$0xf] }
 0x2cb   : > { %v6594_v48 = vunpack.i.h.bf16 %v10250_v54  ;;  %v3382_v18 = vsel %vm995_vm10, %v3381_v16, %v6584_v20  ;;  %v2005_v39 = vsel %vm991_vm8, %v2004_v10, %v12896_v25  ;;  %v7023_v55 = vmov 0   ;;  %v12900_v10 = vld [vmem:[#allocation14_spill] sm:$0xff] }
 0x2cc   : > { %6621 = vset.pattern.permute.xlu0 %v7023_v55  ;;  %6620 = vset.pattern.permute.xlu2 %v7023_v55 }
 0x2cd   : > { %3774 = vperm.xlu2 %6620, %v3771_v58  }
 0x2ce   : > { %v6612_v22 = vpop.permute.xlu1 %6611 }
 0x2cf   : > { %v6614_v44 = vunpack.i.h.bf16 %v6612_v22  ;;  %v6613_v13 = vunpack.i.l.bf16 %v6612_v22  ;;  %v3374_v22 = vsel %vm993_vm9, %v3373_v32, %v6578_v51  ;;  %v6593_v51 = vunpack.i.l.bf16 %v10250_v54 }
 0x2d0   : > { %v3375_v46 = vsel %vm995_vm10, %v3374_v22, %v6583_v19  ;;  %v2370_v22 = vsel %vm991_vm8, %v2369_v4, %v6594_v48 }
 0x2d1   : > { %v3715_v32 = vsel %vm991_vm8, %v3714_v35, %v6613_v13  ;;  %v3722_v14 = vsel %vm991_vm8, %v3721_v37, %v6614_v44  ;;  %v2363_v17 = vsel %vm991_vm8, %v10272_v26, %v6593_v51  ;;  %v3383_v51 = vsel %vm997_vm11, %v3382_v18, %v6544_v59 }
 0x2d2   : > { %v6597_v11 = vpop.permute.xlu0 %6596  ;;  %v3716_v19 = vsel %vm993_vm9, %v3715_v32, %v6588_v49  ;;  %v3723_v20 = vsel %vm993_vm9, %v3722_v14, %v6589_v24  ;;  %v6529_v49 = vunpack.i.h.bf16 %v10144_v33  ;;  %v12897_v24 = vld [vmem:[#allocation53_spill] sm:$0xff]  ;;  %v6528_v32 = vunpack.i.l.bf16 %v10144_v33 }
 0x2d3   : > { %v6599_v2 = vunpack.i.h.bf16 %v6597_v11  ;;  %v6598_v43 = vunpack.i.l.bf16 %v6597_v11  ;;  %v3779_v11 = vld [vmem:[%s12163_s6] sm:$0xf]  ;;  %v12898_v26 = vunpack.i.l.bf16 %v12897_v24  ;;  %v12899_v48 = vunpack.i.h.bf16 %v12897_v24 }
 0x2d4   : > { %3782 = vperm.xlu0 %6621, %v3779_v11   ;;  %v12901_v11 = vunpack.i.l.bf16 %v12900_v10  ;;  %v12902_v59 = vunpack.i.l.bf16 %v9968_v56  ;;  %v12904_v14 = vunpack.i.l.bf16 %v12903_v45  ;;  %v12905_v33 = vunpack.i.h.bf16 %v12900_v10 }
 0x2d5   : > { %v2705_v54 = vsel %vm991_vm8, %v2704_v0, %v6598_v43  ;;  %v2712_v35 = vsel %vm991_vm8, %v2711_v1, %v6599_v2  ;;  %v3018_v4 = vsel %vm997_vm11, %v3017_v21, %v12898_v26  ;;  %v3025_v31 = vsel %vm997_vm11, %v3024_v42, %v12899_v48 }
 0x2d6   : > { %v6617_v57 = vpop.permute.xlu1 %6616  ;;  %v2706_v43 = vsel %vm993_vm9, %v2705_v54, %v6568_v63  ;;  %v2713_v6 = vsel %vm993_vm9, %v2712_v35, %v6569_v5  ;;  %v2006_v58 = vsel %vm993_vm9, %v2005_v39, %v12901_v11  ;;  %v3376_v5 = vsel %vm997_vm11, %v3375_v46, %v6543_v40  ;;  %v12910_v39 = vld [vmem:[#allocation46_spill] sm:$0xff] }
 0x2d7   : > { %v6619_v53 = vunpack.i.h.bf16 %v6617_v57  ;;  %v6618_v13 = vunpack.i.l.bf16 %v6617_v57  ;;  %v2364_v21 = vsel %vm993_vm9, %v2363_v17, %v6558_v23  ;;  %v2371_v42 = vsel %vm993_vm9, %v2370_v22, %v6559_v34  ;;  %v12919_v22 = vld [vmem:[#allocation62_spill] sm:$0xff] }
 0x2d8   : > { %v2707_v40 = vsel %vm995_vm10, %v2706_v43, %v6573_v27  ;;  %v2714_v29 = vsel %vm995_vm10, %v2713_v6, %v6574_v41  ;;  %v1694_v23 = vsel %vm989_vm7, %v10170_v7, %v12902_v59  ;;  %v2007_v34 = vsel %vm995_vm10, %v2006_v58, %v12904_v14  ;;  %v12924_v43 = vld [vmem:[#allocation12_spill] sm:$0xff]  ;;  %v12933_v59 = vld [vmem:[#allocation7_spill] sm:$0xff] }
 0x2d9   : > { %v2013_v57 = vsel %vm993_vm9, %v10124_v36, %v12905_v33  ;;  %v12906_v27 = vunpack.i.l.bf16 %v9983_v28  ;;  %v12907_v41 = vunpack.i.h.bf16 %v9985_v15  ;;  %v6513_v7 = vunpack.i.l.bf16 %v12884_v47  ;;  %v12936_v33 = vld [vmem:[#allocation54_spill] sm:$0xff] }
 0x2da   : > { %v6602_v30 = vpop.permute.xlu0 %6601  ;;  %v2365_v63 = vsel %vm995_vm10, %v2364_v21, %v6563_v52  ;;  %v2372_v36 = vsel %vm995_vm10, %v2371_v42, %v6564_v3  ;;  %v12908_v28 = vunpack.i.l.bf16 %v9985_v15  ;;  %v2708_v46 = vsel %vm997_vm11, %v2707_v40, %v6528_v32  ;;  %v12912_v52 = vld [vmem:[#allocation8_spill] sm:$0xff] }
 0x2db   : > { %v6604_v37 = vunpack.i.h.bf16 %v6602_v30  ;;  %v6603_v44 = vunpack.i.l.bf16 %v6602_v30  ;;  %v1695_v61 = vsel %vm991_vm8, %v1694_v23, %v12906_v27  ;;  %v1703_v56 = vsel %vm993_vm9, %v10182_v8, %v12907_v41  ;;  %v12932_v32 = vld [vmem:[#allocation64_spill] sm:$0xff] }
 0x2dc   : > { %v1696_v30 = vsel %vm993_vm9, %v1695_v61, %v12908_v28  ;;  %v2715_v8 = vsel %vm997_vm11, %v2714_v29, %v6529_v49  ;;  %v12909_v18 = vunpack.i.l.bf16 %v9952_v50  ;;  %v12911_v55 = vunpack.i.l.bf16 %v12910_v39  ;;  %v12925_v49 = vld [vmem:[#allocation65_spill] sm:$0xff] }
 0x2dd   : > { %v3717_v16 = vsel %vm995_vm10, %v3716_v19, %v6603_v44  ;;  %v3724_v0 = vsel %vm995_vm10, %v3723_v20, %v6604_v37  ;;  %v6468_v3 = vunpack.i.l.bf16 %v9981_v60  ;;  %v12913_v15 = vunpack.i.h.bf16 %v12903_v45 }
 0x2de   : > { %v3718_v1 = vsel %vm997_vm11, %v3717_v16, %v6618_v13  ;;  %v3725_v2 = vsel %vm997_vm11, %v3724_v0, %v6619_v53  ;;  %v1352_v25 = vsel %vm989_vm7, %v10164_v12, %v12909_v18  ;;  %v990_v62 = vsel %vm989_vm7, %v12912_v52, %v12911_v55  ;;  %v12916_v13 = vld [vmem:[#allocation16_spill] sm:$0xff]  ;;  %v12920_v16 = vld [vmem:[#allocation55_spill] sm:$0xff] }
 0x2df   : > { %3738 = vmatpush.msrb.mxu1 %v3718_v1  ;;  %3758 = vmatpush.msra.mxu3 %v3725_v2  ;;  %v2014_v54 = vsel %vm995_vm10, %v2013_v57, %v12913_v15  ;;  %v12914_v35 = vunpack.i.h.bf16 %v9981_v60  ;;  %v12915_v37 = vunpack.i.l.bf16 %v9977_v9  ;;  %v2366_v44 = vsel %vm997_vm11, %v2365_v63, %v6513_v7  ;;  %v12921_v1 = vld [vmem:[#allocation68_spill] sm:$0xff] }
 0x2e0   : > { %v2373_v53 = vsel %vm997_vm11, %v2372_v36, %v6514_v38  ;;  %v12917_v19 = vunpack.i.l.bf16 %v12916_v13  ;;  %v12918_v17 = vunpack.i.h.bf16 %v12916_v13  ;;  %v6458_v0 = vunpack.i.l.bf16 %v12920_v16 }
 0x2e1   : > { %3739 = vmatpush.msrb.mxu1 %v3376_v5  ;;  %3759 = vmatpush.msra.mxu3 %v3383_v51  ;;  %v1704_v50 = vsel %vm995_vm10, %v1703_v56, %v12914_v35  ;;  %v1353_v12 = vsel %vm991_vm8, %v1352_v25, %v12915_v37  ;;  %v1697_v9 = vsel %vm995_vm10, %v1696_v30, %v6468_v3  ;;  %v12922_v2 = vunpack.i.l.bf16 %v12921_v1  ;;  %v12939_v56 = vld [vmem:[#allocation13_spill] sm:$0xff]  ;;  %v3726_v30 = vld [vmem:[%s12161_s4] sm:$0xf] }
 0x2e2   : > { %v1354_v20 = vsel %vm993_vm9, %v1353_v12, %v12917_v19  ;;  %v1361_v60 = vsel %vm993_vm9, %v12919_v22, %v12918_v17  ;;  %v12923_v38 = vunpack.i.h.bf16 %v12921_v1  ;;  %v12926_v24 = vunpack.i.l.bf16 %v12925_v49 }
 0x2e3   : > { %3740 = vmatpush.msrb.mxu1 %v3018_v4  ;;  %3760 = vmatpush.msra.mxu3 %v3025_v31  ;;  %v992_v47 = vsel %vm991_vm8, %v990_v62, %v12922_v2  ;;  %v12927_v4 = vunpack.i.h.bf16 %v12925_v49  ;;  %v12928_v31 = vld [vmem:[#allocation51_spill] sm:$0xff]  ;;  %v1355_v51 = vsel %vm995_vm10, %v1354_v20, %v6458_v0  ;;  %v12931_v21 = vunpack.i.h.bf16 %v12920_v16 }
 0x2e4   : > { %v1002_v6 = vsel %vm991_vm8, %v12924_v43, %v12923_v38  ;;  %v2008_v26 = vsel %vm997_vm11, %v2007_v34, %v12926_v24  ;;  %v12929_v10 = vunpack.i.l.bf16 %v12928_v31  ;;  %v12930_v58 = vunpack.i.h.bf16 %v12928_v31 }
 0x2e5   : > { %3741 = vmatpush.msrb.mxu1 %v2708_v46  ;;  %3761 = vmatpush.msra.mxu3 %v2715_v8  ;;  %v2015_v48 = vsel %vm997_vm11, %v2014_v54, %v12927_v4  ;;  %v1362_v42 = vsel %vm995_vm10, %v1361_v60, %v12931_v21  ;;  %v6434_v40 = vunpack.i.h.bf16 %v12932_v32  ;;  %v6433_v29 = vunpack.i.l.bf16 %v12932_v32 }
 0x2e6   : > { %v994_v11 = vsel %vm993_vm9, %v992_v47, %v12929_v10  ;;  %v1003_v5 = vsel %vm993_vm9, %v1002_v6, %v12930_v58  ;;  %v12934_v23 = vunpack.i.l.bf16 %v12933_v59  ;;  %v12935_v14 = vunpack.i.h.bf16 %v12933_v59 }
 0x2e7   : > { %3742 = vmatpush.msrb.mxu1 %v2366_v44  ;;  %3762 = vmatpush.msra.mxu3 %v2373_v53  ;;  %v12937_v57 = vunpack.i.l.bf16 %v12936_v33  ;;  %v12938_v61 = vunpack.i.h.bf16 %v12936_v33  ;;  %v6324_v7 = vunpack.i.h.bf16 %v12939_v56  ;;  %v6323_v63 = vunpack.i.l.bf16 %v12939_v56 }
 0x2e8   : > { %v1698_v45 = vsel %vm997_vm11, %v1697_v9, %v12934_v23  ;;  %v1705_v34 = vsel %vm997_vm11, %v1704_v50, %v12935_v14  ;;  %v1356_v36 = vsel %vm997_vm11, %v1355_v51, %v6433_v29  ;;  %v1363_v28 = vsel %vm997_vm11, %v1362_v42, %v6434_v40  ;;  %v12940_v9 = vld [vmem:[#allocation4_spill] sm:$0xff] }
 0x2e9   : > { %3743 = vmatpush.msrb.mxu1 %v2008_v26  ;;  %3763 = vmatpush.msra.mxu3 %v2015_v48  ;;  %v996_v27 = vsel %vm995_vm10, %v994_v11, %v12937_v57  ;;  %v1004_v41 = vsel %vm995_vm10, %v1003_v5, %v12938_v61  ;;  %v12941_v48 = vld [vmem:[#allocation19_spill] sm:$0xff] }
 0x2ea   : > { %v998_v46 = vsel %vm997_vm11, %v996_v27, %v6323_v63  ;;  %v1005_v8 = vsel %vm997_vm11, %v1004_v41, %v6324_v7 }
 0x2eb   : > { %3744 = vmatpush.msrb.mxu1 %v1698_v45  ;;  %3764 = vmatpush.msra.mxu3 %v1705_v34 }
 0x2ed   : > { %3745 = vmatpush.msrb.mxu1 %v1356_v36  ;;  %3765 = vmatpush.msra.mxu3 %v1363_v28 }
 0x2ef   : > { %3746 = vmatpush.msrb.mxu1 %v998_v46  ;;  %3766 = vmatpush.msra.mxu3 %v1005_v8 }
 0x2f0   : > { %6032 = vmatmul.msk.f32.vlgmr.msrb.gmra.mxu1 %vm3727_vm12, %v3726_v30  ;;  %6033 = vmatmul.msk.f32.vlgmr.msra.gmra.mxu3 %vm3727_vm12, %v3726_v30 }
 0x327   : > { %v3775_v18 = vpop.permute.xlu2 %3774 }
 0x346   : > { %v3783_v39 = vpop.permute.xlu0 %3782 }
 0x36d   : > { %v3748_v25 = vpop.f32.mrf.mxu1 }
 0x36e   : > { %v3777_v55 = vmul.f32 %v3775_v18, %v3748_v25 }
 0x370   : > { %v3785_v52 = vadd.f32 %v3783_v39, %v3777_v55 }
 0x372   : > { %v3787_v62 = vmax.f32 %v3785_v52, 0.0 }
 0x373   : > { %v3768_v3 = vpop.f32.mrf.mxu3 }
 0x374   : > { %3814 = vrot.lane.b32.xlu0 %v3787_v62, %s7016_s16  ;;  %3805 = vrot.lane.b32.xlu2 %v3787_v62, %s7019_s19  ;;  %v3778_v15 = vmul.f32 %v3775_v18, %v3768_v3 }
 0x375   : > { %3802 = vrot.lane.b32.xlu1 %v3787_v62, %s7021_s21 }
 0x376   : > { %v3786_v54 = vadd.f32 %v3783_v39, %v3778_v15 }
 0x378   : > { %v3788_v35 = vmax.f32 %v3786_v54, 0.0 }
 0x37c   : > { %3811 = vrot.lane.b32.xlu2 %v3787_v62, %s7022_s22  ;;  %3824 = vrot.lane.b32.xlu0 %v3788_v35, %s7021_s21 }
 0x37d   : > { %3808 = vrot.lane.b32.xlu1 %v3787_v62, %s7020_s20 }
 0x384   : > { %3820 = vrot.lane.b32.xlu2 %v3787_v62, %s7018_s18  ;;  %3833 = vrot.lane.b32.xlu0 %v3788_v35, %s7022_s22 }
 0x385   : > { %3817 = vrot.lane.b32.xlu1 %v3787_v62, %s7017_s17 }
 0x38c   : > { %3830 = vrot.lane.b32.xlu2 %v3788_v35, %s7020_s20  ;;  %3842 = vrot.lane.b32.xlu0 %v3788_v35, %s7018_s18 }
 0x38d   : > { %3827 = vrot.lane.b32.xlu1 %v3788_v35, %s7019_s19 }
 0x394   : > { %3839 = vrot.lane.b32.xlu2 %v3788_v35, %s7017_s17 }
 0x395   : > { %3836 = vrot.lane.b32.xlu1 %v3788_v35, %s7016_s16 }
 0x3ce   : > { %v3806_v50 = vpop.permute.xlu2 %3805 }
 0x3cf   : > { %v3845_v13 = vrot.slane %v3806_v50, 4 }
 0x3d1   : > { %v3846_v22 = vsel %vm705_vm4, %v3845_v13, %v3787_v62 }
 0x3d2   : > { %v3850_v47 = vperm.slane %v3846_v22, %v12940_v9 }
 0x3d4   : > { %v3871_v58 = vrot.slane %v3850_v47, 4 }
 0x3d6   : > { %v3812_v37 = vpop.permute.xlu2 %3811 }
 0x3de   : > { %v3821_v53 = vpop.permute.xlu2 %3820 }
 0x3df   : > { %v3863_v60 = vrot.slane %v3821_v53, 4 }
 0x3e6   : > { %v3815_v12 = vpop.permute.xlu0 %3814  ;;  %v3831_v16 = vpop.permute.xlu2 %3830 }
 0x3e7   : > { %v3803_v44 = vpop.permute.xlu1 %3802  ;;  %v3864_v2 = vsel %vm705_vm4, %v3863_v60, %v3815_v12  ;;  %v3907_v51 = vrot.slane %v3831_v16, 4 }
 0x3e8   : > { %v3868_v43 = vperm.slane %v3864_v2, %v12940_v9 }
 0x3ea   : > { %v3881_v10 = vrot.slane %v3868_v43, 4 }
 0x3ee   : > { %v3825_v20 = vpop.permute.xlu0 %3824  ;;  %v3840_v5 = vpop.permute.xlu2 %3839 }
 0x3ef   : > { %v3809_v19 = vpop.permute.xlu1 %3808  ;;  %v3913_v59 = vrot.slane %v3840_v5, 4  ;;  %v3908_v23 = vsel %vm705_vm4, %v3907_v51, %v3825_v20 }
 0x3f0   : > { %v3851_v17 = vrot.slane %v3809_v19, 4  ;;  %v3912_v36 = vperm.slane %v3908_v23, %v12940_v9 }
 0x3f2   : > { %v3852_v0 = vsel %vm705_vm4, %v3851_v17, %v3803_v44  ;;  %v3925_v25 = vrot.slane %v3912_v36, 4 }
 0x3f3   : > { %v3856_v1 = vperm.slane %v3852_v0, %v12940_v9 }
 0x3f5   : > { %v3869_v38 = vrot.slane %v3856_v1, 4  ;;  %v3872_v29 = vsel %vm705_vm4, %v3856_v1, %v3871_v58 }
 0x3f6   : > { %v3834_v26 = vpop.permute.xlu0 %3833  ;;  %v3880_v61 = vperm.slane %v3872_v29, %v12941_v48 }
 0x3f7   : > { %v3818_v6 = vpop.permute.xlu1 %3817  ;;  %v3870_v49 = vsel %vm705_vm4, %v3869_v38, %v3850_v47  ;;  %v3914_v41 = vsel %vm705_vm4, %v3913_v59, %v3834_v26 }
 0x3f8   : > { %v3857_v24 = vrot.slane %v3818_v6, 4  ;;  %v3876_v31 = vperm.slane %v3870_v49, %v12941_v48  ;;  %v3918_v8 = vperm.slane %v3914_v41, %v12940_v9  ;;  %v3899_v62 = vrot.slane %v3880_v61, 4 }
 0x3fa   : > { %v3858_v4 = vsel %vm705_vm4, %v3857_v24, %v3812_v37  ;;  %v3895_v40 = vrot.slane %v3876_v31, 4  ;;  %v3939_v3 = vrot.slane %v3918_v8, 4 }
 0x3fb   : > { %v3862_v11 = vperm.slane %v3858_v4, %v12940_v9 }
 0x3fd   : > { %v3883_v21 = vrot.slane %v3862_v11, 4  ;;  %v3882_v42 = vsel %vm705_vm4, %v3881_v10, %v3862_v11 }
 0x3fe   : > { %v3888_v32 = vperm.slane %v3882_v42, %v12941_v48  ;;  %v3843_v30 = vpop.permute.xlu0 %3842 }
 0x3ff   : > { %v3828_v45 = vpop.permute.xlu1 %3827  ;;  %v3884_v14 = vsel %vm705_vm4, %v3868_v43, %v3883_v21  ;;  %v3919_v18 = vrot.slane %v3843_v30, 4 }
 0x400   : > { %v3901_v34 = vrot.slane %v3828_v45, 4  ;;  %v3896_v33 = vsel %vm705_vm4, %v3888_v32, %v3895_v40  ;;  %v3893_v57 = vrot.slane %v3888_v32, 4  ;;  %v3892_v27 = vperm.slane %v3884_v14, %v12941_v48 }
 0x401   : > { %3969 = vrot.lane.b32.xlu0 %v3896_v33, %s7011_s25 }
 0x402   : > { %v3902_v56 = vsel %vm705_vm4, %v3901_v34, %v3788_v35  ;;  %v3894_v7 = vsel %vm705_vm4, %v3893_v57, %v3876_v31  ;;  %v3897_v63 = vrot.slane %v3892_v27, 4  ;;  %v3900_v35 = vsel %vm705_vm4, %v3892_v27, %v3899_v62 }
 0x403   : > { %v3906_v28 = vperm.slane %v3902_v56, %v12940_v9  ;;  %3965 = vrot.lane.b32.xlu1 %v3894_v7, %s7011_s25 }
 0x404   : > { %v3898_v46 = vsel %vm705_vm4, %v3897_v63, %v3880_v61 }
 0x405   : > { %3973 = vrot.lane.b32.xlu2 %v3898_v46, %s7011_s25  ;;  %v3927_v39 = vrot.slane %v3906_v28, 4  ;;  %v3926_v54 = vsel %vm705_vm4, %v3925_v25, %v3906_v28 }
 0x406   : > { %v3932_v53 = vperm.slane %v3926_v54, %v12941_v48 }
 0x407   : > { %v3837_v55 = vpop.permute.xlu1 %3836  ;;  %v3928_v12 = vsel %vm705_vm4, %v3912_v36, %v3927_v39 }
 0x408   : > { %v3920_v52 = vsel %vm705_vm4, %v3919_v18, %v3837_v55  ;;  %v3936_v19 = vperm.slane %v3928_v12, %v12941_v48  ;;  %v3951_v60 = vrot.slane %v3932_v53, 4 }
 0x409   : > { %v3924_v15 = vperm.slane %v3920_v52, %v12940_v9 }
 0x40a   : > { %v3955_v2 = vrot.slane %v3936_v19, 4 }
 0x40b   : > { %v3937_v50 = vrot.slane %v3924_v15, 4  ;;  %v3940_v37 = vsel %vm705_vm4, %v3924_v15, %v3939_v3  ;;  %3977 = vrot.lane.b32.xlu1 %v3900_v35, %s7011_s25 }
 0x40c   : > { %v3948_v44 = vperm.slane %v3940_v37, %v12941_v48 }
 0x40d   : > { %v3938_v13 = vsel %vm705_vm4, %v3937_v50, %v3918_v8 }
 0x40e   : > { %v3953_v20 = vrot.slane %v3948_v44, 4  ;;  %v3944_v17 = vperm.slane %v3938_v13, %v12941_v48  ;;  %v3956_v47 = vsel %vm705_vm4, %v3948_v44, %v3955_v2 }
 0x410   : > { %v3954_v22 = vsel %vm705_vm4, %v3953_v20, %v3936_v19  ;;  %v3949_v16 = vrot.slane %v3944_v17, 4  ;;  %v3952_v0 = vsel %vm705_vm4, %v3944_v17, %v3951_v60 }
 0x411   : > { %3975 = vrot.lane.b32.xlu0 %v3954_v22, %s7011_s25 }
 0x412   : > { %v3950_v1 = vsel %vm705_vm4, %v3949_v16, %v3932_v53 }
 0x413   : > { %3971 = vrot.lane.b32.xlu1 %v3952_v0, %s7011_s25  ;;  %3967 = vrot.lane.b32.xlu2 %v3950_v1, %s7011_s25 }
 0x41b   : > { %3979 = vrot.lane.b32.xlu2 %v3956_v47, %s7011_s25 }
 0x45f   : > { %v3974_v38 = vpop.permute.xlu2 %3973 }
 0x460   : > { %3993 = vst.msk [vmem:[#allocation3 + $0x31] sm:$0xff] %vm446_vm3, %v3974_v38 }
 0x467   : > { %v4001_v23 = vld [vmem:[#allocation3 + $0x30] sm:$0xff] }
 0x468   : > { %v10668_v60 = vld [vmem:[#allocation3 + $0x31] sm:$0xff] }
 0x46d   : > { %v3968_v43 = vpop.permute.xlu2 %3967 }
 0x46e   : > { %3990 = vst.msk [vmem:[#allocation3 + $0x9] sm:$0xff] %vm446_vm3, %v3968_v43  ;;  %v4005_v43 = vrot.slane %v4001_v23, 4 }
 0x473   : > { %v3970_v6 = vpop.permute.xlu0 %3969 }
 0x474   : > { %3991 = vst.msk [vmem:[#allocation3 + $0x19] sm:$0xff] %vm446_vm3, %v3970_v6 }
 0x475   : > { %v3966_v49 = vpop.permute.xlu1 %3965  ;;  %v3980_v24 = vpop.permute.xlu2 %3979  ;;  %v10632_v3 = vld [vmem:[#allocation3 + $0xa] sm:$0xff] }
 0x476   : > { %3989 = vst.msk [vmem:[#allocation3 + $0x1] sm:$0xff] %vm446_vm3, %v3966_v49  ;;  %v5283_v54 = vrot.slane %v10632_v3, 4  ;;  %v10680_v38 = vld [vmem:[#allocation3 + $0x9] sm:$0xff] }
 0x477   : > { %3996 = vst.msk [vmem:[#allocation3 + $0x51] sm:$0xff] %vm446_vm3, %v3980_v24 }
 0x47b   : > { %v10572_v32 = vld [vmem:[#allocation3 + $0x19] sm:$0xff] }
 0x47c   : > { %v10588_v33 = vld [vmem:[#allocation3 + $0x18] sm:$0xff] }
 0x47d   : > { %v3978_v26 = vpop.permute.xlu1 %3977  ;;  %v10554_v4 = vld [vmem:[#allocation3] sm:$0xff]  ;;  %v10556_v31 = vld [vmem:[#allocation3 + $0x8] sm:$0xff] }
 0x47e   : > { %3995 = vst.msk [vmem:[#allocation3 + $0x49] sm:$0xff] %vm446_vm3, %v3978_v26  ;;  %v6627_v10 = vpack.i.bf16 %v10556_v31, %v10554_v4  ;;  %v10600_v7 = vld [vmem:[#allocation3 + $0x52] sm:$0xff]  ;;  %v10640_v37 = vld [vmem:[#allocation3 + $0x2] sm:$0xff]  ;;  %v4007_v47 = vrot.slane %v10554_v4, 4  ;;  %v4006_v24 = vsel %vm705_vm4, %v4005_v43, %v10554_v4 }
 0x47f   : > { %v5293_v30 = vrot.slane %v10600_v7, 4  ;;  %v5227_v53 = vrot.slane %v10640_v37, 4  ;;  %v10675_v0 = vld [vmem:[#allocation3 + $0x1] sm:$0xff] }
 0x480   : > { %6628 = vrot.lane.b32.xlu1 %v6627_v10, %s7012_s26  ;;  %v6667_v6 = vpack.i.bf16 %v10680_v38, %v10675_v0 }
 0x483   : > { %v3976_v11 = vpop.permute.xlu0 %3975 }
 0x484   : > { %3994 = vst.msk [vmem:[#allocation3 + $0x39] sm:$0xff] %vm446_vm3, %v3976_v11  ;;  %v4063_v11 = vrot.slane %v10556_v31, 4 }
 0x485   : > { %v3972_v58 = vpop.permute.xlu1 %3971  ;;  %v10563_v5 = vld [vmem:[#allocation3 + $0x48] sm:$0xff]  ;;  %v10565_v51 = vld [vmem:[#allocation3 + $0x50] sm:$0xff] }
 0x486   : > { %v10567_v21 = vld [vmem:[#allocation3 + $0x49] sm:$0xff]  ;;  %3992 = vst.msk [vmem:[#allocation3 + $0x21] sm:$0xff] %vm446_vm3, %v3972_v58  ;;  %v6642_v42 = vpack.i.bf16 %v10565_v51, %v10563_v5  ;;  %v4017_v1 = vrot.slane %v10563_v5, 4  ;;  %v4073_v49 = vrot.slane %v10565_v51, 4  ;;  %v4008_v58 = vsel %vm705_vm4, %v4001_v23, %v4007_v47 }
 0x487   : > { %v4627_v40 = vrot.slane %v10567_v21, 4  ;;  %v6622_v29 = vpack.i.bf16 %v10572_v32, %v10567_v21  ;;  %v10585_v14 = vld [vmem:[#allocation3 + $0x4a] sm:$0xff] }
 0x488   : > { %6643 = vrot.lane.b32.xlu1 %v6642_v42, %s7012_s26  ;;  %v5237_v41 = vrot.slane %v10585_v14, 4 }
 0x489   : > { %v10580_v59 = vsel %vm705_vm4, %v4627_v40, %v10572_v32  ;;  %6623 = vrot.lane.b32.xlu2 %v6622_v29, %s7013_s29  ;;  %v10702_v40 = vperm.slane %v4006_v24, %v12940_v9 }
 0x48b   : > { %v10583_v45 = vld [vmem:[#allocation3 + $0x38] sm:$0xff] }
 0x48c   : > { %v6637_v34 = vpack.i.bf16 %v10583_v45, %v4001_v23  ;;  %v10617_v18 = vld [vmem:[#allocation3 + $0x32] sm:$0xff]  ;;  %v10634_v15 = vld [vmem:[#allocation3 + $0x3a] sm:$0xff]  ;;  %v4061_v2 = vrot.slane %v10583_v45, 4  ;;  %v4064_v4 = vsel %vm705_vm4, %v10583_v45, %v4063_v11  ;;  %v4016_v23 = vperm.slane %v4008_v58, %v12940_v9 }
 0x48d   : > { %v10590_v57 = vld [vmem:[#allocation3 + $0x20] sm:$0xff]  ;;  %v5225_v52 = vrot.slane %v10617_v18, 4  ;;  %v5281_v50 = vrot.slane %v10634_v15, 4  ;;  %v10645_v12 = vsel %vm705_vm4, %v10634_v15, %v5283_v54  ;;  %v10659_v20 = vsel %vm705_vm4, %v10617_v18, %v5227_v53 }
 0x48e   : > { %v10592_v27 = vld [vmem:[#allocation3 + $0x1a] sm:$0xff]  ;;  %6638 = vrot.lane.b32.xlu0 %v6637_v34, %s7012_s26  ;;  %v6652_v61 = vpack.i.bf16 %v10590_v57, %v10588_v33  ;;  %v10598_v56 = vld [vmem:[#allocation3 + $0x22] sm:$0xff]  ;;  %v4062_v26 = vsel %vm705_vm4, %v4061_v2, %v10556_v31 }
 0x48f   : > { %v5238_v63 = vsel %vm705_vm4, %v5237_v41, %v10592_v27  ;;  %v5239_v36 = vrot.slane %v10592_v27, 4  ;;  %v5295_v28 = vrot.slane %v10598_v56, 4  ;;  %v10619_v25 = vld [vmem:[#allocation3 + $0x21] sm:$0xff]  ;;  %v10623_v39 = vsel %vm705_vm4, %v5293_v30, %v10598_v56  ;;  %v10661_v17 = vld [vmem:[#allocation3 + $0x39] sm:$0xff] }
 0x490   : > { %6653 = vrot.lane.b32.xlu1 %v6652_v61, %s7013_s29  ;;  %v10626_v55 = vperm.slane %v5238_v63, %v12940_v9  ;;  %v6672_v62 = vpack.i.bf16 %v10619_v25, %v10572_v32  ;;  %v5226_v44 = vsel %vm705_vm4, %v5225_v52, %v10640_v37  ;;  %v10652_v13 = vsel %vm705_vm4, %v5281_v50, %v10632_v3 }
 0x491   : > { %6633 = vrot.lane.b32.xlu2 %v6652_v61, %s7012_s26  ;;  %v10611_v46 = vsel %vm705_vm4, %v10585_v14, %v5239_v36  ;;  %v10615_v8 = vsel %vm705_vm4, %v10600_v7, %v5295_v28  ;;  %v10655_v19 = vperm.slane %v5226_v44, %v12940_v9  ;;  %v6677_v16 = vpack.i.bf16 %v10661_v17, %v10668_v60  ;;  %v10712_v61 = vld [vmem:[#allocation3 + $0x51] sm:$0xff] }
 0x492   : > { %v5249_v35 = vrot.slane %v10626_v55, 4  ;;  %v10708_v31 = vperm.slane %v4062_v26, %v12940_v9  ;;  %v4031_v41 = vrot.slane %v10702_v40, 4  ;;  %v4072_v36 = vperm.slane %v4064_v4, %v12940_v9 }
 0x493   : > { %v4019_v28 = vrot.slane %v10588_v33, 4  ;;  %v6682_v30 = vpack.i.bf16 %v10712_v61, %v10567_v21  ;;  %v4043_v44 = vrot.slane %v4016_v23, 4  ;;  %v4617_v4 = vrot.slane %v10675_v0, 4 }
 0x494   : > { %v10665_v22 = vsel %vm705_vm4, %v5249_v35, %v10655_v19  ;;  %v4087_v63 = vrot.slane %v10708_v31, 4  ;;  %v4099_v2 = vrot.slane %v4072_v36, 4 }
 0x495   : > { %12942 = vst [vmem:[#allocation23_spill] sm:$0xff] %v10665_v22 }
 0x496   : > { %6648 = vrot.lane.b32.xlu0 %v6627_v10, %s7013_s29  ;;  %v4018_v10 = vsel %vm705_vm4, %v4017_v1, %v10588_v33  ;;  %v4020_v33 = vsel %vm705_vm4, %v10563_v5, %v4019_v28  ;;  %v6717_v28 = vpack.i.bf16 %v10661_v17, %v10619_v25 }
 0x497   : > { %v10705_v29 = vperm.slane %v4018_v10, %v12940_v9  ;;  %v4028_v50 = vperm.slane %v4020_v33, %v12940_v9  ;;  %v6712_v10 = vpack.i.bf16 %v10632_v3, %v10634_v15  ;;  %v4618_v33 = vsel %vm705_vm4, %v10668_v60, %v4617_v4 }
 0x498   : > { %6673 = vrot.lane.b32.xlu1 %v6672_v62, %s7012_s26  ;;  %v6707_v62 = vpack.i.bf16 %v10598_v56, %v10600_v7 }
 0x499   : > { %6658 = vrot.lane.b32.xlu2 %v6637_v34, %s7013_s29  ;;  %v4075_v34 = vrot.slane %v10590_v57, 4  ;;  %v4032_v52 = vsel %vm705_vm4, %v10705_v29, %v4031_v41  ;;  %v4044_v47 = vsel %vm705_vm4, %v4028_v50, %v4043_v44  ;;  %v6697_v41 = vpack.i.bf16 %v10640_v37, %v10617_v18 }
 0x49a   : > { %v10731_v54 = vperm.slane %v4032_v52, %v12941_v48  ;;  %v10750_v43 = vperm.slane %v4044_v47, %v12941_v48 }
 0x49b   : > { %v4076_v53 = vsel %vm705_vm4, %v10565_v51, %v4075_v34  ;;  %v4673_v34 = vrot.slane %v10680_v38, 4 }
 0x49c   : > { %v4084_v1 = vperm.slane %v4076_v53, %v12940_v9  ;;  %v4671_v53 = vrot.slane %v10661_v17, 4 }
 0x49e   : > { %6663 = vrot.lane.b32.xlu0 %v6642_v42, %s7013_s29  ;;  %v4074_v42 = vsel %vm705_vm4, %v4073_v49, %v10590_v57  ;;  %v4100_v5 = vsel %vm705_vm4, %v4084_v1, %v4099_v2  ;;  %v4041_v49 = vrot.slane %v4028_v50, 4  ;;  %v4097_v24 = vrot.slane %v4084_v1, 4 }
 0x49f   : > { %v10716_v45 = vperm.slane %v4074_v42, %v12940_v9  ;;  %v10753_v51 = vperm.slane %v4100_v5, %v12941_v48  ;;  %v4685_v42 = vrot.slane %v10619_v25, 4  ;;  %v4055_v50 = vrot.slane %v10731_v54, 4 }
 0x4a0   : > { %5633 = vrot.lane.b32.xlu1 %v10585_v14, %s7013_s29  ;;  %v4042_v11 = vsel %vm705_vm4, %v4041_v49, %v4016_v23  ;;  %v4098_v58 = vsel %vm705_vm4, %v4097_v24, %v4072_v36  ;;  %v4615_v49 = vrot.slane %v10668_v60, 4 }
 0x4a1   : > { %6678 = vrot.lane.b32.xlu2 %v6677_v16, %s7012_s26  ;;  %v4088_v57 = vsel %vm705_vm4, %v10716_v45, %v4087_v63  ;;  %v6732_v26 = vpack.i.bf16 %v10753_v51, %v10750_v43  ;;  %v10804_v2 = vsel %vm705_vm4, 0.0, %v4055_v50  ;;  %v4115_v50 = vrot.slane %v10753_v51, 4 }
 0x4a2   : > { %v10734_v35 = vperm.slane %v4088_v57, %v12941_v48 }
 0x4a4   : > { %v6722_v16 = vpack.i.bf16 %v10734_v35, %v10731_v54  ;;  %v4111_v44 = vrot.slane %v10734_v35, 4  ;;  %v4626_v54 = vperm.slane %v4618_v33, %v12940_v9 }
 0x4a6   : > { %6668 = vrot.lane.b32.xlu0 %v6667_v6, %s7012_s26  ;;  %v10807_v47 = vsel %vm705_vm4, 0.0, %v4111_v44  ;;  %v4653_v24 = vrot.slane %v4626_v54, 4 }
 0x4a8   : > { %5625 = vrot.lane.b32.xlu1 %v10592_v27, %s7013_s29 }
 0x4a9   : > { %6688 = vrot.lane.b32.xlu2 %v6667_v6, %s7013_s29  ;;  %v6692_v6 = vpack.i.bf16 %v10592_v27, %v10585_v14  ;;  %v10768_v14 = vperm.slane %v4042_v11, %v12941_v48  ;;  %v10771_v27 = vperm.slane %v4098_v58, %v12941_v48  ;;  %v4616_v58 = vsel %vm705_vm4, %v4615_v49, %v10675_v0 }
 0x4ab   : > { %v4057_v63 = vrot.slane %v10768_v14, 4  ;;  %v4113_v23 = vrot.slane %v10771_v27, 4  ;;  %v6727_v36 = vpack.i.bf16 %v10771_v27, %v10768_v14 }
 0x4ad   : > { %v4058_v52 = vsel %vm705_vm4, 0.0, %v4057_v63  ;;  %v4114_v57 = vsel %vm705_vm4, 0.0, %v4113_v23 }
 0x4ae   : > { %6683 = vrot.lane.b32.xlu0 %v6682_v30, %s7012_s26  ;;  %v4674_v30 = vsel %vm705_vm4, %v10661_v17, %v4673_v34  ;;  %v6757_v17 = vpack.i.bf16 %v10807_v47, %v10804_v2  ;;  %v4622_v34 = vperm.slane %v4616_v58, %v12940_v9 }
 0x4b0   : > { %6708 = vrot.lane.b32.xlu1 %v6707_v62, %s7012_s26  ;;  %v4686_v62 = vsel %vm705_vm4, %v10712_v61, %v4685_v42  ;;  %v4683_v42 = vrot.slane %v10712_v61, 4 }
 0x4b1   : > { %5629 = vrot.lane.b32.xlu2 %v10617_v18, %s7013_s29  ;;  %v4629_v18 = vrot.slane %v10572_v32, 4  ;;  %v4682_v32 = vperm.slane %v4674_v30, %v12940_v9  ;;  %v4694_v35 = vperm.slane %v4686_v62, %v12940_v9 }
 0x4b3   : > { %v4630_v1 = vsel %vm705_vm4, %v10567_v21, %v4629_v18  ;;  %v4672_v21 = vsel %vm705_vm4, %v4671_v53, %v10680_v38 }
 0x4b4   : > { %v4638_v5 = vperm.slane %v4630_v1, %v12940_v9  ;;  %v4678_v11 = vperm.slane %v4672_v21, %v12940_v9  ;;  %v4029_v21 = vrot.slane %v10705_v29, 4 }
 0x4b6   : > { %6693 = vrot.lane.b32.xlu0 %v6692_v6, %s7012_s26  ;;  %v4709_v6 = vrot.slane %v4682_v32, 4  ;;  %v4654_v38 = vsel %vm705_vm4, %v4638_v5, %v4653_v24  ;;  %v4697_v0 = vrot.slane %v4678_v11, 4  ;;  %v4651_v63 = vrot.slane %v4638_v5, 4 }
 0x4b8   : > { %6713 = vrot.lane.b32.xlu1 %v6712_v10, %s7012_s26  ;;  %v4710_v10 = vsel %vm705_vm4, %v4694_v35, %v4709_v6 }
 0x4b9   : > { %5621 = vrot.lane.b32.xlu2 %v10640_v37, %s7013_s29  ;;  %v6762_v37 = vpack.i.bf16 %v4114_v57, %v4058_v52  ;;  %v10830_v4 = vperm.slane %v4710_v10, %v12941_v48  ;;  %v4030_v10 = vsel %vm705_vm4, %v4029_v21, %v10702_v40 }
 0x4be   : > { %6698 = vrot.lane.b32.xlu0 %v6697_v41, %s7012_s26  ;;  %v4707_v41 = vrot.slane %v4694_v35, 4 }
 0x4c0   : > { %6718 = vrot.lane.b32.xlu1 %v6717_v28, %s7013_s29  ;;  %v4641_v28 = vrot.slane %v4622_v34, 4 }
 0x4c1   : > { %5627 = vrot.lane.b32.xlu2 %v10598_v56, %s7013_s29  ;;  %v6702_v56 = vpack.i.bf16 %v10712_v61, %v10668_v60  ;;  %v4684_v60 = vsel %vm705_vm4, %v4683_v42, %v10619_v25  ;;  %v4634_v61 = vperm.slane %v10580_v59, %v12940_v9  ;;  %v4708_v25 = vsel %vm705_vm4, %v4707_v41, %v4682_v32 }
 0x4c2   : > { %v4690_v23 = vperm.slane %v4684_v60, %v12940_v9  ;;  %v4652_v59 = vsel %vm705_vm4, %v4651_v63, %v4626_v54  ;;  %v10855_v52 = vperm.slane %v4708_v25, %v12941_v48  ;;  %v4116_v54 = vsel %vm705_vm4, 0.0, %v4115_v50 }
 0x4c3   : > { %v10859_v18 = vperm.slane %v4652_v59, %v12941_v48  ;;  %v4639_v44 = vrot.slane %v4634_v61, 4  ;;  %v4725_v42 = vrot.slane %v10830_v4, 4 }
 0x4c4   : > { %v4698_v30 = vsel %vm705_vm4, %v4690_v23, %v4697_v0  ;;  %v4695_v33 = vrot.slane %v4690_v23, 4  ;;  %v4723_v25 = vrot.slane %v10855_v52, 4 }
 0x4c5   : > { %v4706_v57 = vperm.slane %v4698_v30, %v12941_v48  ;;  %v6742_v53 = vpack.i.bf16 %v10855_v52, %v10859_v18  ;;  %v4640_v5 = vsel %vm705_vm4, %v4639_v44, %v4622_v34 }
 0x4c6   : > { %6703 = vrot.lane.b32.xlu0 %v6702_v56, %s7013_s29  ;;  %v10886_v24 = vperm.slane %v4640_v5, %v12941_v48  ;;  %v4724_v59 = vsel %vm705_vm4, 0.0, %v4723_v25 }
 0x4c7   : > { %v4721_v32 = vrot.slane %v4706_v57, 4 }
 0x4c8   : > { %6723 = vrot.lane.b32.xlu1 %v6722_v16, %s7017_s17  ;;  %v10836_v16 = vperm.slane %v4654_v38, %v12941_v48  ;;  %v4663_v27 = vrot.slane %v10886_v24, 4 }
 0x4c9   : > { %5623 = vrot.lane.b32.xlu2 %v10632_v3, %s7013_s29  ;;  %v4722_v51 = vsel %vm705_vm4, 0.0, %v4721_v32 }
 0x4ca   : > { %v6747_v3 = vpack.i.bf16 %v10830_v4, %v10836_v16  ;;  %v4664_v2 = vsel %vm705_vm4, 0.0, %v4663_v27  ;;  %v4669_v60 = vrot.slane %v10836_v16, 4  ;;  %v4667_v16 = vrot.slane %v10859_v18, 4 }
 0x4ce   : > { %5635 = vrot.lane.b32.xlu0 %v10600_v7, %s7013_s29  ;;  %v4642_v7 = vsel %vm705_vm4, %v4634_v61, %v4641_v28  ;;  %v4726_v61 = vsel %vm705_vm4, 0.0, %v4725_v42 }
 0x4cf   : > { %v4650_v62 = vperm.slane %v4642_v7, %v12941_v48 }
 0x4d0   : > { %6748 = vrot.lane.b32.xlu1 %v6747_v3, %s7019_s19  ;;  %v4670_v3 = vsel %vm705_vm4, 0.0, %v4669_v60 }
 0x4d1   : > { %6733 = vrot.lane.b32.xlu2 %v6732_v26, %s7019_s19  ;;  %v4059_v26 = vrot.slane %v10750_v43, 4  ;;  %v4665_v35 = vrot.slane %v4650_v62, 4  ;;  %v4085_v43 = vrot.slane %v10716_v45, 4  ;;  %v6787_v63 = vpack.i.bf16 %v4726_v61, %v4670_v3 }
 0x4d3   : > { %v4060_v1 = vsel %vm705_vm4, 0.0, %v4059_v26  ;;  %v4666_v6 = vsel %vm705_vm4, 0.0, %v4665_v35  ;;  %v4086_v45 = vsel %vm705_vm4, %v4085_v43, %v10708_v31  ;;  %v10905_v31 = vperm.slane %v4030_v10, %v12941_v48 }
 0x4d4   : > { %v6767_v56 = vpack.i.bf16 %v4116_v54, %v4060_v1  ;;  %v6777_v49 = vpack.i.bf16 %v4722_v51, %v4666_v6  ;;  %v10899_v14 = vperm.slane %v4086_v45, %v12941_v48  ;;  %v4668_v26 = vsel %vm705_vm4, 0.0, %v4667_v16 }
 0x4d5   : > { %v6782_v50 = vpack.i.bf16 %v4724_v59, %v4668_v26 }
 0x4d6   : > { %5631 = vrot.lane.b32.xlu0 %v10634_v15, %s7013_s29  ;;  %v4696_v15 = vsel %vm705_vm4, %v4695_v33, %v4678_v11  ;;  %v6737_v11 = vpack.i.bf16 %v4706_v57, %v4650_v62  ;;  %v4109_v40 = vrot.slane %v10899_v14, 4 }
 0x4d8   : > { %6763 = vrot.lane.b32.xlu1 %v6762_v37, %s7020_s20  ;;  %v10878_v37 = vperm.slane %v4696_v15, %v12941_v48  ;;  %v4110_v38 = vsel %vm705_vm4, 0.0, %v4109_v40 }
 0x4d9   : > { %6743 = vrot.lane.b32.xlu2 %v6742_v53, %s7022_s22 }
 0x4da   : > { %v4719_v29 = vrot.slane %v10878_v37, 4 }
 0x4dc   : > { %v4720_v58 = vsel %vm705_vm4, 0.0, %v4719_v29 }
 0x4dd   : > { %v6772_v47 = vpack.i.bf16 %v4720_v58, %v4664_v2 }
 0x4de   : > { %6728 = vrot.lane.b32.xlu0 %v6727_v36, %s7022_s22 }
 0x4e0   : > { %6778 = vrot.lane.b32.xlu1 %v6777_v49, %s7016_s16 }
 0x4e1   : > { %6758 = vrot.lane.b32.xlu2 %v6757_v17, %s7016_s16  ;;  %v4053_v17 = vrot.slane %v10905_v31, 4 }
 0x4e3   : > { %v10902_v36 = vpop.permute.xlu2 %6623  ;;  %v4054_v41 = vsel %vm705_vm4, 0.0, %v4053_v17 }
 0x4e4   : > { %v6752_v0 = vpack.i.bf16 %v4110_v38, %v4054_v41 }
 0x4e6   : > { %6738 = vrot.lane.b32.xlu0 %v6737_v11, %s7017_s17 }
 0x4e9   : > { %6773 = vrot.lane.b32.xlu2 %v6772_v47, %s7018_s18 }
 0x4eb   : > { %v6634_v34 = vpop.permute.xlu2 %6633 }
 0x4ec   : > { %v6636_v28 = vunpack.i.h.bf16 %v6634_v34  ;;  %v6635_v30 = vunpack.i.l.bf16 %v6634_v34 }
 0x4ee   : > { %6753 = vrot.lane.b32.xlu0 %v6752_v0, %s7018_s18  ;;  %v4289_v44 = vrot.slane %v6636_v28, 4  ;;  %v4233_v53 = vrot.slane %v6635_v30, 4 }
 0x4f1   : > { %6788 = vrot.lane.b32.xlu2 %v6787_v63, %s7021_s21 }
 0x4f2   : > { %v6629_v4 = vpop.permute.xlu1 %6628 }
 0x4f3   : > { %v10921_v23 = vpop.permute.xlu2 %6658  ;;  %v6631_v32 = vunpack.i.h.bf16 %v6629_v4  ;;  %v6630_v52 = vunpack.i.l.bf16 %v6629_v4 }
 0x4f5   : > { %v4277_v35 = vrot.slane %v6631_v32, 4  ;;  %v4221_v15 = vrot.slane %v6630_v52, 4 }
 0x4f6   : > { %6768 = vrot.lane.b32.xlu0 %v6767_v56, %s7021_s21 }
 0x4fa   : > { %v6644_v7 = vpop.permute.xlu1 %6643 }
 0x4fb   : > { %v6646_v57 = vunpack.i.h.bf16 %v6644_v7  ;;  %v6645_v62 = vunpack.i.l.bf16 %v6644_v7  ;;  %v10927_v33 = vpop.permute.xlu2 %6678 }
 0x4fd   : > { %v4234_v18 = vsel %vm705_vm4, %v6645_v62, %v4233_v53  ;;  %v4290_v1 = vsel %vm705_vm4, %v6646_v57, %v4289_v44  ;;  %v4287_v51 = vrot.slane %v6646_v57, 4  ;;  %v4231_v5 = vrot.slane %v6645_v62, 4 }
 0x4fe   : > { %6783 = vrot.lane.b32.xlu0 %v6782_v50, %s7020_s20  ;;  %v4242_v21 = vperm.slane %v4234_v18, %v12940_v9  ;;  %v4298_v6 = vperm.slane %v4290_v1, %v12940_v9 }
 0x4ff   : > { %v4232_v34 = vsel %vm705_vm4, %v4231_v5, %v6635_v30  ;;  %v4288_v41 = vsel %vm705_vm4, %v4287_v51, %v6636_v28  ;;  %v6660_v28 = vunpack.i.l.bf16 %v10921_v23 }
 0x500   : > { %v6639_v54 = vpop.permute.xlu0 %6638  ;;  %v4255_v17 = vrot.slane %v4242_v21, 4  ;;  %v4311_v42 = vrot.slane %v4298_v6, 4  ;;  %v10967_v26 = vperm.slane %v4232_v34, %v12940_v9  ;;  %v10970_v50 = vperm.slane %v4288_v41, %v12940_v9 }
 0x501   : > { %v6641_v56 = vunpack.i.h.bf16 %v6639_v54  ;;  %v6640_v43 = vunpack.i.l.bf16 %v6639_v54  ;;  %v4425_v34 = vrot.slane %v6660_v28, 4 }
 0x502   : > { %v10935_v49 = vpop.permute.xlu1 %6653 }
 0x503   : > { %v4275_v45 = vrot.slane %v6641_v56, 4  ;;  %v4278_v29 = vsel %vm705_vm4, %v6641_v56, %v4277_v35  ;;  %v4219_v10 = vrot.slane %v6640_v43, 4  ;;  %v4222_v27 = vsel %vm705_vm4, %v6640_v43, %v4221_v15  ;;  %v10939_v11 = vpop.permute.xlu2 %6688 }
 0x504   : > { %v4286_v58 = vperm.slane %v4278_v29, %v12940_v9  ;;  %v4230_v40 = vperm.slane %v4222_v27, %v12940_v9  ;;  %v6655_v18 = vunpack.i.l.bf16 %v10935_v49  ;;  %v6661_v35 = vunpack.i.h.bf16 %v10921_v23 }
 0x505   : > { %v4276_v2 = vsel %vm705_vm4, %v4275_v45, %v6631_v32  ;;  %v4220_v47 = vsel %vm705_vm4, %v4219_v10, %v6630_v52  ;;  %v6656_v52 = vunpack.i.h.bf16 %v10935_v49 }
 0x506   : > { %v10946_v38 = vperm.slane %v4276_v2, %v12940_v9  ;;  %v10949_v60 = vperm.slane %v4220_v47, %v12940_v9  ;;  %v4313_v0 = vrot.slane %v4286_v58, 4  ;;  %v4257_v61 = vrot.slane %v4230_v40, 4 }
 0x507   : > { %v4256_v25 = vsel %vm705_vm4, %v4255_v17, %v4230_v40  ;;  %v4312_v16 = vsel %vm705_vm4, %v4311_v42, %v4286_v58  ;;  %v4439_v49 = vrot.slane %v6655_v18, 4 }
 0x508   : > { %v4301_v3 = vrot.slane %v10946_v38, 4  ;;  %v4245_v63 = vrot.slane %v10949_v60, 4  ;;  %v6649_v4 = vpop.permute.xlu0 %6648  ;;  %v10958_v57 = vperm.slane %v4256_v25, %v12941_v48  ;;  %v10961_v30 = vperm.slane %v4312_v16, %v12941_v48 }
 0x509   : > { %v6651_v59 = vunpack.i.h.bf16 %v6649_v4  ;;  %v6650_v7 = vunpack.i.l.bf16 %v6649_v4  ;;  %v4258_v1 = vsel %vm705_vm4, %v4242_v21, %v4257_v61  ;;  %v4314_v54 = vsel %vm705_vm4, %v4298_v6, %v4313_v0 }
 0x50a   : > { %v10964_v62 = vpop.permute.xlu1 %6673  ;;  %v6797_v15 = vpack.i.bf16 %v10961_v30, %v10958_v57  ;;  %v4246_v56 = vsel %vm705_vm4, %v10967_v26, %v4245_v63  ;;  %v4302_v43 = vsel %vm705_vm4, %v10970_v50, %v4301_v3  ;;  %v10989_v21 = vperm.slane %v4258_v1, %v12941_v48 }
 0x50b   : > { %v4483_v44 = vrot.slane %v6651_v59, 4  ;;  %v4427_v53 = vrot.slane %v6650_v7, 4  ;;  %v10972_v32 = vpop.permute.xlu2 %5629  ;;  %v10992_v23 = vperm.slane %v4314_v54, %v12941_v48  ;;  %v4495_v6 = vrot.slane %v6656_v52, 4 }
 0x50c   : > { %6798 = vrot.lane.b32.xlu2 %v6797_v15, %s7022_s22  ;;  %v10995_v45 = vperm.slane %v4246_v56, %v12941_v48  ;;  %v10998_v29 = vperm.slane %v4302_v43, %v12941_v48  ;;  %v4481_v3 = vrot.slane %v6661_v35, 4  ;;  %v4426_v16 = vsel %vm705_vm4, %v4425_v34, %v6650_v7 }
 0x50d   : > { %v4428_v51 = vsel %vm705_vm4, %v6660_v28, %v4427_v53  ;;  %v4484_v5 = vsel %vm705_vm4, %v6661_v35, %v4483_v44  ;;  %v6802_v58 = vpack.i.bf16 %v10992_v23, %v10989_v21  ;;  %v6681_v56 = vunpack.i.h.bf16 %v10927_v33 }
 0x50e   : > { %12943 = vst [vmem:[#allocation6_spill] sm:$0xff] %v10995_v45  ;;  %v4436_v27 = vperm.slane %v4428_v51, %v12940_v9  ;;  %v4492_v47 = vperm.slane %v4484_v5, %v12940_v9  ;;  %v6792_v17 = vpack.i.bf16 %v10998_v29, %v10995_v45  ;;  %v4482_v28 = vsel %vm705_vm4, %v4481_v3, %v6651_v59 }
 0x50f   : > { %12944 = vst [vmem:[#allocation47_spill] sm:$0xff] %v10998_v29  ;;  %6803 = vrot.lane.b32.xlu1 %v6802_v58, %s7019_s19  ;;  %v6680_v43 = vunpack.i.l.bf16 %v10927_v33  ;;  %v11023_v51 = vperm.slane %v4426_v16, %v12940_v9  ;;  %v6675_v3 = vunpack.i.l.bf16 %v10964_v62 }
 0x510   : > { %v6664_v10 = vpop.permute.xlu0 %6663  ;;  %6793 = vrot.lane.b32.xlu0 %v6792_v17, %s7017_s17  ;;  %v4463_v44 = vrot.slane %v4436_v27, 4  ;;  %v4519_v53 = vrot.slane %v4492_v47, 4 }
 0x511   : > { %v6666_v40 = vunpack.i.h.bf16 %v6664_v10  ;;  %v6665_v2 = vunpack.i.l.bf16 %v6664_v10  ;;  %12945 = vst [vmem:[#allocation11_spill] sm:$0xff] %v11023_v51 }
 0x512   : > { %v11006_v42 = vpop.permute.xlu1 %5633 }
 0x513   : > { %v4496_v41 = vsel %vm705_vm4, %v6666_v40, %v4495_v6  ;;  %v4437_v0 = vrot.slane %v6665_v2, 4  ;;  %v4440_v61 = vsel %vm705_vm4, %v6665_v2, %v4439_v49  ;;  %v11014_v25 = vpop.permute.xlu2 %5621  ;;  %v4493_v1 = vrot.slane %v6666_v40, 4 }
 0x514   : > { %v4504_v63 = vperm.slane %v4496_v41, %v12940_v9  ;;  %v4448_v4 = vperm.slane %v4440_v61, %v12940_v9  ;;  %v11027_v6 = vperm.slane %v4482_v28, %v12940_v9  ;;  %v4451_v61 = vrot.slane %v11023_v51, 4 }
 0x515   : > { %v4438_v54 = vsel %vm705_vm4, %v4437_v0, %v6655_v18  ;;  %v12389_v18 = vunpack.i.h.bf16 %v10964_v62  ;;  %v4494_v58 = vsel %vm705_vm4, %v4493_v1, %v6656_v52  ;;  %v6625_v28 = vunpack.i.l.bf16 %v10902_v36 }
 0x516   : > { %v4461_v15 = vrot.slane %v4448_v4, 4  ;;  %v4464_v35 = vsel %vm705_vm4, %v4448_v4, %v4463_v44  ;;  %v4520_v7 = vsel %vm705_vm4, %v4504_v63, %v4519_v53  ;;  %12946 = vst [vmem:[#allocation48_spill] sm:$0xff] %v11027_v6  ;;  %v4517_v59 = vrot.slane %v4504_v63, 4 }
 0x517   : > { %v11032_v40 = vperm.slane %v4438_v54, %v12940_v9  ;;  %v11037_v2 = vperm.slane %v4464_v35, %v12941_v48  ;;  %v11040_v41 = vperm.slane %v4520_v7, %v12941_v48  ;;  %v11046_v52 = vperm.slane %v4494_v58, %v12940_v9 }
 0x518   : > { %v6669_v5 = vpop.permute.xlu0 %6668  ;;  %v4462_v0 = vsel %vm705_vm4, %v4461_v15, %v4436_v27  ;;  %v4518_v16 = vsel %vm705_vm4, %v4517_v59, %v4492_v47  ;;  %v6626_v44 = vunpack.i.h.bf16 %v10902_v36  ;;  %v11062_v54 = vperm.slane %v10611_v46, %v12940_v9 }
 0x519   : > { %v6671_v49 = vunpack.i.h.bf16 %v6669_v5  ;;  %v6670_v10 = vunpack.i.l.bf16 %v6669_v5  ;;  %12947 = vst [vmem:[#allocation18_spill] sm:$0xff] %v11032_v40  ;;  %v11056_v27 = vperm.slane %v4462_v0, %v12941_v48  ;;  %v4452_v1 = vsel %vm705_vm4, %v11032_v40, %v4451_v61 }
 0x51a   : > { %v11034_v33 = vpop.permute.xlu1 %5625  ;;  %12948 = vst [vmem:[#allocation29_spill] sm:$0xff] %v11037_v2  ;;  %v4507_v15 = vrot.slane %v11027_v6, 4  ;;  %v4899_v47 = vrot.slane %v12389_v18, 4  ;;  %v6817_v36 = vpack.i.bf16 %v11040_v41, %v11037_v2  ;;  %v4843_v35 = vrot.slane %v6675_v3, 4 }
 0x51b   : > { %v4887_v17 = vrot.slane %v6671_v49, 4  ;;  %v4831_v34 = vrot.slane %v6670_v10, 4  ;;  %12949 = vst [vmem:[#allocation38_spill] sm:$0xff] %v11040_v41  ;;  %v11053_v53 = vpop.permute.xlu2 %5627  ;;  %v11074_v59 = vperm.slane %v4518_v16, %v12941_v48  ;;  %v11078_v46 = vperm.slane %v4452_v1, %v12941_v48 }
 0x51c   : > { %12950 = vst [vmem:[#allocation44_spill] sm:$0xff] %v11046_v52  ;;  %6818 = vrot.lane.b32.xlu0 %v6817_v36, %s7019_s19  ;;  %v5049_v61 = vrot.slane %v6626_v44, 4  ;;  %v5047_v18 = vrot.slane %v6625_v28, 4  ;;  %v4885_v41 = vrot.slane %v6681_v56, 4  ;;  %v4829_v36 = vrot.slane %v6680_v43, 4 }
 0x51d   : > { %v4888_v63 = vsel %vm705_vm4, %v6681_v56, %v4887_v17  ;;  %v4832_v4 = vsel %vm705_vm4, %v6680_v43, %v4831_v34  ;;  %v4508_v17 = vsel %vm705_vm4, %v11046_v52, %v4507_v15 }
 0x51e   : > { %v11070_v5 = vperm.slane %v4888_v63, %v12940_v9  ;;  %v4840_v7 = vperm.slane %v4832_v4, %v12940_v9  ;;  %v6812_v63 = vpack.i.bf16 %v11074_v59, %v11056_v27  ;;  %v11085_v4 = vperm.slane %v4508_v17, %v12941_v48 }
 0x51f   : > { %v11098_v17 = vperm.slane %v10659_v20, %v12940_v9  ;;  %v4830_v29 = vsel %vm705_vm4, %v4829_v36, %v6670_v10  ;;  %v5050_v45 = vsel %vm705_vm4, %v6625_v28, %v5049_v61 }
 0x520   : > { %v6684_v58 = vpop.permute.xlu0 %6683  ;;  %6813 = vrot.lane.b32.xlu1 %v6812_v63, %s7022_s22  ;;  %v6807_v15 = vpack.i.bf16 %v11085_v4, %v11078_v46  ;;  %v4923_v43 = vrot.slane %v11070_v5, 4  ;;  %v4886_v63 = vsel %vm705_vm4, %v4885_v41, %v6671_v49  ;;  %v5657_v41 = vrot.slane %v11006_v42, 4 }
 0x521   : > { %v6686_v34 = vunpack.i.h.bf16 %v6684_v58  ;;  %v6685_v0 = vunpack.i.l.bf16 %v6684_v58 }
 0x522   : > { %v11087_v16 = vpop.permute.xlu1 %6708  ;;  %6808 = vrot.lane.b32.xlu2 %v6807_v15, %s7017_s17 }
 0x523   : > { %v4900_v1 = vsel %vm705_vm4, %v6686_v34, %v4899_v47  ;;  %v4844_v2 = vsel %vm705_vm4, %v6685_v0, %v4843_v35  ;;  %v4841_v6 = vrot.slane %v6685_v0, 4  ;;  %v4867_v47 = vrot.slane %v4840_v7, 4 }
 0x524   : > { %v4908_v58 = vperm.slane %v4900_v1, %v12940_v9  ;;  %v4852_v51 = vperm.slane %v4844_v2, %v12940_v9  ;;  %v11103_v35 = vsel %vm705_vm4, %v5047_v18, %v6626_v44  ;;  %v4897_v0 = vrot.slane %v6686_v34, 4  ;;  %v11113_v18 = vpop.permute.xlu2 %5623 }
 0x525   : > { %v5645_v2 = vrot.slane %v10972_v32, 4  ;;  %v4842_v22 = vsel %vm705_vm4, %v4841_v6, %v6675_v3  ;;  %v11127_v34 = vperm.slane %v4886_v63, %v12940_v9  ;;  %v11130_v6 = vperm.slane %v4830_v29, %v12940_v9 }
 0x526   : > { %v4865_v1 = vrot.slane %v4852_v51, 4  ;;  %v4868_v20 = vsel %vm705_vm4, %v4852_v51, %v4867_v47  ;;  %v4924_v56 = vsel %vm705_vm4, %v4908_v58, %v4923_v43  ;;  %v12955_v3 = vunpack.i.h.bf16 %v10964_v62 }
 0x527   : > { %v11118_v49 = vperm.slane %v4868_v20, %v12941_v48  ;;  %v11121_v10 = vperm.slane %v4924_v56, %v12941_v48  ;;  %v5646_v51 = vsel %vm705_vm4, %v5645_v2, %v11014_v25  ;;  %12953 = vst [vmem:[#allocation63_spill] sm:$0xff] %v11127_v34  ;;  %v4921_v61 = vrot.slane %v4908_v58, 4 }
 0x528   : > { %v11115_v44 = vpop.permute.xlu0 %6693  ;;  %12954 = vst [vmem:[#allocation56_spill] sm:$0xff] %v11130_v6  ;;  %v4898_v28 = vsel %vm705_vm4, %v4897_v0, %v12955_v3  ;;  %v6710_v36 = vunpack.i.l.bf16 %v11087_v16  ;;  %v11141_v43 = vperm.slane %v4842_v22, %v12940_v9  ;;  %v6711_v47 = vunpack.i.h.bf16 %v11087_v16 }
 0x529   : > { %12951 = vst [vmem:[#allocation21_spill] sm:$0xff] %v11118_v49  ;;  %v6832_v56 = vpack.i.bf16 %v11121_v10, %v11118_v49  ;;  %v4866_v63 = vsel %vm705_vm4, %v4865_v1, %v4840_v7  ;;  %v5647_v62 = vrot.slane %v11014_v25, 4  ;;  %v11148_v58 = vperm.slane %v5646_v51, %v12940_v9 }
 0x52a   : > { %12952 = vst [vmem:[#allocation57_spill] sm:$0xff] %v11121_v10  ;;  %v11136_v15 = vpop.permute.xlu1 %6713  ;;  %v5658_v0 = vsel %vm705_vm4, %v5657_v41, %v11034_v33  ;;  %v5659_v2 = vrot.slane %v11034_v33, 4  ;;  %v4855_v22 = vrot.slane %v11130_v6, 4  ;;  %v11156_v16 = vperm.slane %v4898_v28, %v12940_v9 }
 0x52b   : > { %12956 = vst [vmem:[#allocation59_spill] sm:$0xff] %v11141_v43  ;;  %v6715_v29 = vunpack.i.l.bf16 %v11136_v15  ;;  %6833 = vrot.lane.b32.xlu0 %v6832_v56, %s7019_s19  ;;  %v6716_v20 = vunpack.i.h.bf16 %v11136_v15  ;;  %v4911_v25 = vrot.slane %v11127_v34, 4  ;;  %v5507_v1 = vrot.slane %v6710_v36, 4 }
 0x52c   : > { %12957 = vst [vmem:[#allocation24_spill] sm:$0xff] %v11148_v58  ;;  %v11161_v51 = vperm.slane %v4866_v63, %v12941_v48  ;;  %v4922_v41 = vsel %vm705_vm4, %v4921_v61, %v11070_v5  ;;  %v5509_v33 = vrot.slane %v6711_v47, 4  ;;  %v4856_v28 = vsel %vm705_vm4, %v11141_v43, %v4855_v22 }
 0x52d   : > { %12958 = vst [vmem:[#allocation58_spill] sm:$0xff] %v11156_v16  ;;  %v5495_v7 = vrot.slane %v6715_v29, 4  ;;  %v11167_v56 = vperm.slane %v4922_v41, %v12941_v48  ;;  %v11172_v15 = vperm.slane %v5050_v45, %v12940_v9  ;;  %v5648_v63 = vsel %vm705_vm4, %v10972_v32, %v5647_v62 }
 0x52e   : > { %12959 = vst [vmem:[#allocation61_spill] sm:$0xff] %v11161_v51  ;;  %v5671_v61 = vrot.slane %v11148_v58, 4  ;;  %v11186_v22 = vperm.slane %v4856_v28, %v12941_v48  ;;  %v4912_v45 = vsel %vm705_vm4, %v11156_v16, %v4911_v25  ;;  %v11191_v41 = vperm.slane %v5658_v0, %v12940_v9 }
 0x52f   : > { %v5496_v3 = vsel %vm705_vm4, %v5495_v7, %v6716_v20  ;;  %12960 = vst [vmem:[#allocation60_spill] sm:$0xff] %v11167_v56  ;;  %v6827_v7 = vpack.i.bf16 %v11167_v56, %v11161_v51  ;;  %v5508_v32 = vsel %vm705_vm4, %v5507_v1, %v6711_v47  ;;  %v6695_v62 = vunpack.i.l.bf16 %v11115_v44 }
 0x530   : > { %v11178_v49 = vperm.slane %v5496_v3, %v12940_v9  ;;  %v11180_v5 = vpop.permute.xlu0 %6698  ;;  %12962 = vst [vmem:[#allocation40_spill] sm:$0xff] %v11191_v41  ;;  %v11195_v3 = vpop.permute.xlu2 %6733  ;;  %v11198_v10 = vperm.slane %v4912_v45, %v12941_v48  ;;  %v5660_v28 = vsel %vm705_vm4, %v11006_v42, %v5659_v2  ;;  %v5510_v6 = vsel %vm705_vm4, %v6710_v36, %v5509_v33 }
 0x531   : > { %12963 = vst [vmem:[#allocation39_spill] sm:$0xff] %v11195_v3  ;;  %6828 = vrot.lane.b32.xlu1 %v6827_v7, %s7022_s22  ;;  %v6700_v47 = vunpack.i.l.bf16 %v11180_v5  ;;  %v5497_v0 = vrot.slane %v6716_v20, 4  ;;  %v12964_v3 = vrot.slane %v10655_v19, 4  ;;  %v11216_v42 = vperm.slane %v5508_v32, %v12940_v9 }
 0x532   : > { %12961 = vst [vmem:[#allocation22_spill] sm:$0xff] %v11178_v49  ;;  %v11200_v34 = vpop.permute.xlu1 %6718  ;;  %v5521_v25 = vrot.slane %v11178_v49, 4  ;;  %v6822_v1 = vpack.i.bf16 %v11198_v10, %v11186_v22  ;;  %v6696_v36 = vunpack.i.h.bf16 %v11115_v44  ;;  %v6701_v2 = vunpack.i.h.bf16 %v11180_v5 }
 0x533   : > { %v5252_v43 = vsel %vm705_vm4, %v10626_v55, %v12964_v3  ;;  %12965 = vst [vmem:[#allocation37_spill] sm:$0xff] %v11216_v42  ;;  %v5439_v33 = vrot.slane %v6700_v47, 4  ;;  %v12966_v7 = vunpack.i.l.bf16 %v10939_v11  ;;  %v11224_v45 = vperm.slane %v5660_v28, %v12940_v9 }
 0x534   : > { %v5451_v19 = vrot.slane %v6695_v62, 4  ;;  %6823 = vrot.lane.b32.xlu2 %v6822_v1, %s7017_s17  ;;  %v11228_v55 = vperm.slane %v5648_v63, %v12940_v9  ;;  %v5672_v44 = vsel %vm705_vm4, %v11191_v41, %v5671_v61  ;;  %v5522_v32 = vsel %vm705_vm4, %v11216_v42, %v5521_v25 }
 0x535   : > { %v5037_v16 = vrot.slane %v12966_v7, 4  ;;  %v5440_v5 = vsel %vm705_vm4, %v5439_v33, %v6701_v2  ;;  %v11236_v3 = vperm.slane %v5510_v6, %v12940_v9  ;;  %v5498_v28 = vsel %vm705_vm4, %v6715_v29, %v5497_v0 }
 0x536   : > { %v11240_v7 = vperm.slane %v5440_v5, %v12940_v9  ;;  %v12968_v1 = vunpack.i.h.bf16 %v11200_v34  ;;  %v5453_v40 = vrot.slane %v6696_v36, 4  ;;  %v11249_v25 = vperm.slane %v5522_v32, %v12941_v48 }
 0x537   : > { %v5681_v6 = vrot.slane %v11224_v45, 4  ;;  %v5452_v29 = vsel %vm705_vm4, %v5451_v19, %v6696_v36  ;;  %v11254_v0 = vperm.slane %v5672_v44, %v12941_v48  ;;  %v11257_v5 = vperm.slane %v5252_v43, %v12941_v48 }
 0x538   : > { %12967 = vst [vmem:[#allocation34_spill] sm:$0xff] %v11240_v7  ;;  %v5091_v63 = vrot.slane %v12968_v1, 4  ;;  %v11244_v20 = vpop.permute.xlu0 %6703  ;;  %v11262_v52 = vperm.slane %v5498_v28, %v12940_v9  ;;  %v5261_v49 = vrot.slane %v11062_v54, 4  ;;  %v5465_v42 = vrot.slane %v11240_v7, 4  ;;  %v11272_v44 = vpop.permute.xlu2 %6743 }
 0x539   : > { %v12409_v61 = vunpack.i.h.bf16 %v11244_v20  ;;  %v6705_v33 = vunpack.i.l.bf16 %v11244_v20  ;;  %12969 = vst [vmem:[#allocation41_spill] sm:$0xff] %v11249_v25  ;;  %v12971_v19 = vunpack.i.h.bf16 %v10939_v11  ;;  %v6842_v28 = vpack.i.bf16 %v11249_v25, %v11257_v5 }
 0x53a   : > { %12970 = vst [vmem:[#allocation28_spill] sm:$0xff] %v11254_v0  ;;  %v11259_v1 = vpop.permute.xlu1 %6723  ;;  %v5531_v41 = vrot.slane %v11236_v3, 4  ;;  %v5441_v56 = vrot.slane %v6701_v2, 4  ;;  %v12972_v51 = vunpack.i.l.bf16 %v10939_v11  ;;  %v11282_v36 = vperm.slane %v5452_v29, %v12940_v9 }
 0x53b   : > { %v5103_v58 = vrot.slane %v12409_v61, 4  ;;  %v5035_v32 = vrot.slane %v6705_v33, 4  ;;  %v5092_v43 = vsel %vm705_vm4, %v5091_v63, %v12971_v19  ;;  %v5454_v61 = vsel %vm705_vm4, %v6695_v62, %v5453_v40  ;;  %6843 = vrot.lane.b32.xlu0 %v6842_v28, %s7017_s17 }
 0x53c   : > { %5762 = vrot.lane.b32.xlu2 %v11254_v0, %s7017_s17  ;;  %v12973_v63 = vunpack.i.l.bf16 %v11200_v34  ;;  %v11294_v40 = vperm.slane %v5092_v43, %v12940_v9  ;;  %v5262_v62 = vsel %vm705_vm4, %v5261_v49, %v11098_v17  ;;  %v5532_v2 = vsel %vm705_vm4, %v5531_v41, %v11262_v52 }
 0x53d   : > { %v5036_v7 = vsel %vm705_vm4, %v5035_v32, %v12972_v51  ;;  %v5038_v51 = vsel %vm705_vm4, %v6705_v33, %v5037_v16  ;;  %v11303_v29 = vperm.slane %v11103_v35, %v12940_v9  ;;  %v11307_v32 = vperm.slane %v5532_v2, %v12941_v48 }
 0x53e   : > { %v5104_v19 = vsel %vm705_vm4, %v5103_v58, %v12973_v63  ;;  %v11290_v25 = vperm.slane %v5036_v7, %v12940_v9  ;;  %12974 = vst [vmem:[#allocation36_spill] sm:$0xff] %v11294_v40  ;;  %v5466_v43 = vsel %vm705_vm4, %v11282_v36, %v5465_v42  ;;  %v11313_v16 = vperm.slane %v10652_v13, %v12940_v9 }
 0x53f   : > { %12975 = vst [vmem:[#allocation32_spill] sm:$0xff] %v11307_v32  ;;  %v5442_v49 = vsel %vm705_vm4, %v6700_v47, %v5441_v56  ;;  %v11317_v41 = vperm.slane %v5104_v19, %v12940_v9  ;;  %v5682_v35 = vsel %vm705_vm4, %v5681_v6, %v11228_v55  ;;  %v11322_v33 = vperm.slane %v5454_v61, %v12940_v9 }
 0x540   : > { %v5061_v58 = vrot.slane %v11290_v25, 4  ;;  %v5636_v7 = vpop.permute.xlu0 %5635  ;;  %v5046_v28 = vperm.slane %v5038_v51, %v12940_v9  ;;  %v11326_v63 = vperm.slane %v5262_v62, %v12941_v48  ;;  %v5071_v56 = vrot.slane %v11172_v15, 4  ;;  %v11357_v0 = vpop.permute.xlu2 %6758 }
 0x541   : > { %12976 = vst [vmem:[#allocation42_spill] sm:$0xff] %v11317_v41  ;;  %v5117_v47 = vrot.slane %v11294_v40, 4  ;;  %v11338_v61 = vperm.slane %v5466_v43, %v12941_v48  ;;  %v5450_v6 = vperm.slane %v5442_v49, %v12940_v9  ;;  %v11342_v51 = vperm.slane %v5682_v35, %v12941_v48 }
 0x542   : > { %12977 = vst [vmem:[#allocation30_spill] sm:$0xff] %v11326_v63  ;;  %v11328_v42 = vpop.permute.xlu1 %6748  ;;  %v5062_v13 = vsel %vm705_vm4, %v11303_v29, %v5061_v58  ;;  %v5713_v62 = vrot.slane %v5636_v7, 4  ;;  %v6852_v2 = vpack.i.bf16 %v11307_v32, %v11326_v63  ;;  %v5307_v43 = vrot.slane %v11313_v16, 4 }
 0x543   : > { %12978 = vst [vmem:[#allocation66_spill] sm:$0xff] %v11328_v42  ;;  %v11335_v19 = vperm.slane %v5062_v13, %v12941_v48  ;;  %v5118_v40 = vsel %vm705_vm4, %v11317_v41, %v5117_v47  ;;  %v11352_v13 = vperm.slane %v10623_v39, %v12940_v9  ;;  %v5715_v49 = vrot.slane %v11053_v53, 4 }
 0x544   : > { %12980 = vst [vmem:[#allocation70_spill] sm:$0xff] %v11338_v61  ;;  %v5475_v35 = vrot.slane %v11322_v33, 4  ;;  %5770 = vrot.lane.b32.xlu2 %v11342_v51, %s7022_s22  ;;  %6853 = vrot.lane.b32.xlu0 %v6852_v2, %s7022_s22  ;;  %v4243_v47 = vrot.slane %v10967_v26, 4  ;;  %v5703_v39 = vrot.slane %v11113_v18, 4  ;;  %v11370_v42 = vperm.slane %v5118_v40, %v12941_v48 }
 0x545   : > { %12979 = vst [vmem:[#allocation26_spill] sm:$0xff] %v11335_v19  ;;  %v6837_v58 = vpack.i.bf16 %v11335_v19, %v11338_v61  ;;  %v5072_v61 = vsel %vm705_vm4, %v5071_v56, %v5046_v28  ;;  %v5308_v41 = vsel %vm705_vm4, %v11352_v13, %v5307_v43  ;;  %v5073_v19 = vrot.slane %v5046_v28, 4 }
 0x546   : > { %12981 = vst [vmem:[#allocation72_spill] sm:$0xff] %v11342_v51  ;;  %v5716_v32 = vsel %vm705_vm4, %v5636_v7, %v5715_v49  ;;  %v5476_v2 = vsel %vm705_vm4, %v5475_v35, %v5450_v6  ;;  %v5714_v56 = vsel %vm705_vm4, %v5713_v62, %v11053_v53  ;;  %v11376_v51 = vperm.slane %v5072_v61, %v12941_v48 }
 0x547   : > { %6838 = vrot.lane.b32.xlu1 %v6837_v58, %s7017_s17  ;;  %v4271_v58 = vrot.slane %v10958_v57, 4  ;;  %v4299_v43 = vrot.slane %v10970_v50, 4  ;;  %v11382_v7 = vperm.slane %v5308_v41, %v12941_v48  ;;  %v4327_v40 = vrot.slane %v10961_v30, 4 }
 0x548   : > { %v5632_v63 = vpop.permute.xlu0 %5631  ;;  %v5477_v49 = vrot.slane %v5450_v6, 4  ;;  %v11386_v35 = vperm.slane %v5716_v32, %v12940_v9  ;;  %v11393_v57 = vperm.slane %v5476_v2, %v12941_v48  ;;  %v11396_v50 = vperm.slane %v5714_v56, %v12940_v9 }
 0x549   : > { %v5701_v26 = vrot.slane %v5632_v63, 4  ;;  %v5704_v28 = vsel %vm705_vm4, %v5632_v63, %v5703_v39  ;;  %v6862_v30 = vpack.i.bf16 %v11382_v7, %v11370_v42  ;;  %v5074_v32 = vsel %vm705_vm4, %v11172_v15, %v5073_v19 }
 0x54a   : > { %v11390_v61 = vpop.permute.xlu1 %6763  ;;  %v11406_v63 = vperm.slane %v5704_v28, %v12940_v9  ;;  %v11411_v6 = vsel %vm705_vm4, 0.0, %v4271_v58  ;;  %v11414_v62 = vsel %vm705_vm4, 0.0, %v4327_v40  ;;  %v4244_v15 = vsel %vm705_vm4, %v4243_v47, %v10949_v60  ;;  %v6774_v28 = vpop.permute.xlu2 %6773 }
 0x54b   : > { %v5702_v53 = vsel %vm705_vm4, %v5701_v26, %v11113_v18  ;;  %12982 = vst [vmem:[#allocation9_spill] sm:$0xff] %v11390_v61  ;;  %v6847_v18 = vpack.i.bf16 %v11376_v51, %v11393_v57  ;;  %v4300_v19 = vsel %vm705_vm4, %v4299_v43, %v10946_v38  ;;  %v5737_v56 = vrot.slane %v11386_v35, 4 }
 0x54c   : > { %v11399_v41 = vperm.slane %v5702_v53, %v12940_v9  ;;  %6863 = vrot.lane.b32.xlu0 %v6862_v30, %s7017_s17  ;;  %v11427_v26 = vperm.slane %v4244_v15, %v12941_v48  ;;  %v11430_v58 = vperm.slane %v4300_v19, %v12941_v48  ;;  %v5478_v60 = vsel %vm705_vm4, %v11322_v33, %v5477_v49 }
 0x54d   : > { %v5738_v38 = vsel %vm705_vm4, %v5737_v56, %v11406_v63  ;;  %v11444_v43 = vperm.slane %v5074_v32, %v12941_v48  ;;  %v5683_v49 = vrot.slane %v11228_v55, 4  ;;  %v6776_v19 = vunpack.i.h.bf16 %v6774_v28 }
 0x54e   : > { %v5727_v39 = vrot.slane %v11399_v41, 4  ;;  %12983 = vst [vmem:[#allocation50_spill] sm:$0xff] %v11427_v26  ;;  %v4267_v30 = vrot.slane %v11427_v26, 4  ;;  %v4323_v33 = vrot.slane %v11430_v58, 4  ;;  %v6775_v56 = vunpack.i.l.bf16 %v6774_v28 }
 0x54f   : > { %6848 = vrot.lane.b32.xlu1 %v6847_v18, %s7022_s22  ;;  %12984 = vst [vmem:[#allocation17_spill] sm:$0xff] %v11430_v58  ;;  %v11449_v18 = vperm.slane %v10615_v8, %v12940_v9  ;;  %v11458_v32 = vperm.slane %v5478_v60, %v12941_v48  ;;  %v6746_v8 = vunpack.i.h.bf16 %v11272_v44  ;;  %v11463_v2 = vperm.slane %v5738_v38, %v12941_v48 }
 0x550   : > { %v11432_v40 = vpop.permute.xlu0 %6728  ;;  %v5728_v53 = vsel %vm705_vm4, %v11396_v50, %v5727_v39  ;;  %v12986_v39 = vunpack.i.h.bf16 %v10939_v11  ;;  %v5263_v11 = vrot.slane %v11098_v17, 4  ;;  %v6745_v28 = vunpack.i.l.bf16 %v11272_v44 }
 0x551   : > { %12985 = vst [vmem:[#allocation31_spill] sm:$0xff] %v11432_v40  ;;  %v11441_v47 = vperm.slane %v5728_v53, %v12941_v48  ;;  %v5533_v53 = vrot.slane %v11262_v52, 4  ;;  %v6857_v61 = vpack.i.bf16 %v11444_v43, %v11458_v32  ;;  %v4268_v60 = vsel %vm705_vm4, 0.0, %v4267_v30 }
 0x552   : > { %v5093_v15 = vrot.slane %v12986_v39, 4  ;;  %v12987_v39 = vunpack.i.l.bf16 %v11200_v34  ;;  %v6779_v40 = vpop.permute.xlu1 %6778  ;;  %v4324_v52 = vsel %vm705_vm4, 0.0, %v4323_v33  ;;  %v5264_v38 = vsel %vm705_vm4, %v11062_v54, %v5263_v11 }
 0x553   : > { %5790 = vrot.lane.b32.xlu2 %v11441_v47, %s7017_s17  ;;  %v4477_v17 = vrot.slane %v11056_v27, 4  ;;  %v12988_v44 = vunpack.i.h.bf16 %v11244_v20  ;;  %v4790_v26 = vsel %vm985_vm5, %v10878_v37, %v6776_v19  ;;  %v4783_v30 = vsel %vm985_vm5, %v10886_v24, %v6775_v56  ;;  %s6042_s17 = sshll.u32 %s13039_s14, 3 }
 0x554   : > { %v5105_v55 = vrot.slane %v12987_v39, 4  ;;  %5798 = vrot.lane.b32.xlu0 %v11463_v2, %s7022_s22  ;;  %v4533_v39 = vrot.slane %v11074_v59, 4  ;;  %v5684_v33 = vsel %vm705_vm4, %v11224_v45, %v5683_v49  ;;  %v6781_v54 = vunpack.i.h.bf16 %v6779_v40 }
 0x555   : > { %v4273_v27 = vrot.slane %v10989_v21, 4  ;;  %v11491_v59 = vsel %vm705_vm4, 0.0, %v4477_v17  ;;  %v6877_v19 = vpack.i.bf16 %v4324_v52, %v4268_v60  ;;  %v4329_v56 = vrot.slane %v10992_v23, 4 }
 0x556   : > { %v5106_v58 = vsel %vm705_vm4, %v12988_v44, %v5105_v55  ;;  %v11494_v20 = vsel %vm705_vm4, 0.0, %v4533_v39  ;;  %v11501_v45 = vperm.slane %v10645_v12, %v12940_v9  ;;  %v5317_v21 = vrot.slane %v11449_v18, 4 }
 0x557   : > { %6858 = vrot.lane.b32.xlu1 %v6857_v61, %s7019_s19  ;;  %v6907_v24 = vpack.i.bf16 %v11494_v20, %v11491_v59  ;;  %v6780_v61 = vunpack.i.l.bf16 %v6779_v40  ;;  %v4475_v60 = vrot.slane %v11078_v46, 4  ;;  %v4531_v52 = vrot.slane %v11085_v4, 4 }
 0x558   : > { %v6739_v11 = vpop.permute.xlu0 %6738  ;;  %v5318_v12 = vsel %vm705_vm4, %v5317_v21, %v11501_v45  ;;  %v12989_v39 = vunpack.i.h.bf16 %v11200_v34  ;;  %v11526_v4 = vperm.slane %v5106_v58, %v12940_v9  ;;  %v4274_v34 = vsel %vm705_vm4, 0.0, %v4273_v27 }
 0x559   : > { %v6741_v55 = vunpack.i.h.bf16 %v6739_v11  ;;  %v6740_v37 = vunpack.i.l.bf16 %v6739_v11  ;;  %v4476_v58 = vsel %vm705_vm4, 0.0, %v4475_v60  ;;  %v5463_v11 = vrot.slane %v11282_v36, 4 }
 0x55a   : > { %v5094_v44 = vsel %vm705_vm4, %v12989_v39, %v5093_v15  ;;  %v4330_v15 = vsel %vm705_vm4, 0.0, %v4329_v56  ;;  %v6725_v27 = vunpack.i.l.bf16 %v11259_v1  ;;  %v6760_v36 = vunpack.i.l.bf16 %v11357_v0 }
 0x55b   : > { %v4784_v49 = vsel %vm987_vm6, %v4783_v30, %v6740_v37  ;;  %v4791_v17 = vsel %vm987_vm6, %v4790_v26, %v6741_v55  ;;  %6878 = vrot.lane.b32.xlu2 %v6877_v19, %s7018_s18  ;;  %v11517_v30 = vperm.slane %v5684_v33, %v12941_v48  ;;  %v5534_v33 = vsel %vm705_vm4, %v11236_v3, %v5533_v53 }
 0x55c   : > { %v4785_v40 = vsel %vm989_vm7, %v4784_v49, %v6780_v61  ;;  %v4792_v23 = vsel %vm989_vm7, %v4791_v17, %v6781_v54  ;;  %v12990_v54 = vpack.i.bf16 %v11414_v62, %v11411_v6  ;;  %v11543_v6 = vperm.slane %v5094_v44, %v12940_v9 }
 0x55d   : > { %v11520_v26 = vsel %vm991_vm8, %v4785_v40, %v6745_v28  ;;  %v11523_v46 = vsel %vm991_vm8, %v4792_v23, %v6746_v8  ;;  %v5059_v28 = vrot.slane %v11303_v29, 4  ;;  %v4532_v8 = vsel %vm705_vm4, 0.0, %v4531_v52 }
 0x55e   : > { %6888 = vrot.lane.b32.xlu0 %v12990_v54, %s7020_s20  ;;  %v6726_v62 = vunpack.i.h.bf16 %v11259_v1  ;;  %v6892_v29 = vpack.i.bf16 %v4330_v15, %v4274_v34  ;;  %v11548_v37 = vperm.slane %v5534_v33, %v12941_v48  ;;  %v5127_v19 = vrot.slane %v11526_v4, 4 }
 0x55f   : > { %5778 = vrot.lane.b32.xlu1 %v11517_v30, %s7019_s19  ;;  %v6761_v61 = vunpack.i.h.bf16 %v11357_v0  ;;  %v6902_v56 = vpack.i.bf16 %v4532_v8, %v4476_v58  ;;  %v11559_v21 = vperm.slane %v5264_v38, %v12941_v48  ;;  %v4879_v49 = vrot.slane %v11186_v22, 4 }
 0x560   : > { %v6754_v55 = vpop.permute.xlu0 %6753  ;;  %v4935_v0 = vrot.slane %v11198_v10, 4  ;;  %v5275_v52 = vrot.slane %v11257_v5, 4  ;;  %v5060_v22 = vsel %vm705_vm4, %v5059_v28, %v11290_v25  ;;  %v5128_v40 = vsel %vm705_vm4, %v5127_v19, %v11543_v6  ;;  %v12991_v10 = vld [vmem:[#allocation41_spill] sm:$0xff]  ;;  %v12992_v5 = vld [vmem:[#allocation34_spill] sm:$0xff] }
 0x561   : > { %v6756_v3 = vunpack.i.h.bf16 %v6754_v55  ;;  %v6755_v53 = vunpack.i.l.bf16 %v6754_v55  ;;  %v6867_v38 = vpack.i.bf16 %v11548_v37, %v11559_v21  ;;  %v5545_v23 = vrot.slane %v12991_v10, 4  ;;  %v12995_v55 = vld [vmem:[#allocation40_spill] sm:$0xff] }
 0x562   : > { %v5464_v39 = vsel %vm705_vm4, %v5463_v11, %v12992_v5  ;;  %v5305_v44 = vrot.slane %v11352_v13, 4  ;;  %v4880_v54 = vsel %vm705_vm4, 0.0, %v4879_v49  ;;  %v4936_v25 = vsel %vm705_vm4, 0.0, %v4935_v0  ;;  %v12993_v13 = vld [vmem:[#allocation61_spill] sm:$0xff]  ;;  %v12994_v11 = vld [vmem:[#allocation60_spill] sm:$0xff] }
 0x563   : > { %v4180_v9 = vsel %vm985_vm5, %v10899_v14, %v6756_v3  ;;  %v4173_v1 = vsel %vm985_vm5, %v10905_v31, %v6755_v53  ;;  %6893 = vrot.lane.b32.xlu2 %v6892_v29, %s7021_s21  ;;  %v11589_v15 = vperm.slane %v5060_v22, %v12941_v48  ;;  %v11592_v33 = vsel %vm705_vm4, 0.0, %v5275_v52  ;;  %v12999_v5 = vld [vmem:[#allocation44_spill] sm:$0xff] }
 0x564   : > { %v4181_v17 = vsel %vm987_vm6, %v4180_v9, %v6726_v62  ;;  %v4174_v60 = vsel %vm987_vm6, %v4173_v1, %v6725_v27  ;;  %v11595_v28 = vsel %vm705_vm4, 0.0, %v5545_v23  ;;  %v11598_v58 = vperm.slane %v5128_v40, %v12941_v48 }
 0x565   : > { %v11567_v14 = vsel %vm989_vm7, %v4181_v17, %v6761_v61  ;;  %v11570_v31 = vsel %vm989_vm7, %v4174_v60, %v6760_v36  ;;  %v4881_v8 = vrot.slane %v12993_v13, 4  ;;  %v4937_v62 = vrot.slane %v12994_v11, 4  ;;  %v12996_v36 = vld [vmem:[#allocation37_spill] sm:$0xff] }
 0x566   : > { %6903 = vrot.lane.b32.xlu0 %v6902_v56, %s7016_s16  ;;  %v6952_v27 = vpack.i.bf16 %v11595_v28, %v11592_v33  ;;  %v5669_v3 = vrot.slane %v12995_v55, 4  ;;  %v11610_v53 = vperm.slane %v5318_v12, %v12941_v48  ;;  %v11613_v29 = vperm.slane %v5464_v39, %v12941_v48  ;;  %v13002_v55 = vld [vmem:[#allocation23_spill] sm:$0xff] }
 0x567   : > { %6868 = vrot.lane.b32.xlu1 %v6867_v38, %s7019_s19  ;;  %v5319_v19 = vrot.slane %v11501_v45, 4  ;;  %v11618_v61 = vsel %vm705_vm4, %v5305_v44, %v11313_v16  ;;  %v5519_v56 = vrot.slane %v12996_v36, 4  ;;  %v5739_v9 = vrot.slane %v11406_v63, 4  ;;  %v12997_v16 = vld [vmem:[#allocation22_spill] sm:$0xff]  ;;  %v12998_v63 = vld [vmem:[#allocation24_spill] sm:$0xff] }
 0x568   : > { %v11585_v34 = vpop.permute.xlu0 %6768  ;;  %v6922_v1 = vpack.i.bf16 %v4936_v25, %v4880_v54  ;;  %v5083_v59 = vrot.slane %v11589_v15, 4  ;;  %v6872_v20 = vpack.i.bf16 %v11610_v53, %v11598_v58  ;;  %v4938_v12 = vsel %vm705_vm4, 0.0, %v4937_v62  ;;  %v13000_v44 = vld [vmem:[#allocation18_spill] sm:$0xff] }
 0x569   : > { %v11629_v45 = vsel %vm705_vm4, %v11449_v18, %v5319_v19  ;;  %v5520_v49 = vsel %vm705_vm4, %v5519_v56, %v12997_v16  ;;  %v5670_v17 = vsel %vm705_vm4, %v5669_v3, %v12998_v63  ;;  %v5487_v60 = vrot.slane %v11613_v29, 4  ;;  %v13001_v25 = vld [vmem:[#allocation66_spill] sm:$0xff]  ;;  %v13006_v63 = vld [vmem:[#allocation11_spill] sm:$0xff] }
 0x56a   : > { %v5084_v52 = vsel %vm705_vm4, 0.0, %v5083_v59  ;;  %v5740_v18 = vsel %vm705_vm4, %v11386_v35, %v5739_v9  ;;  %v11642_v10 = vperm.slane %v5520_v49, %v12941_v48  ;;  %v11645_v23 = vperm.slane %v5670_v17, %v12941_v48 }
 0x56b   : > { %6908 = vrot.lane.b32.xlu2 %v6907_v24, %s7020_s20  ;;  %v4882_v24 = vsel %vm705_vm4, 0.0, %v4881_v8  ;;  %v4505_v39 = vrot.slane %v12999_v5, 4  ;;  %v4449_v54 = vrot.slane %v13000_v44, 4  ;;  %v6751_v13 = vunpack.i.h.bf16 %v13001_v25 }
 0x56c   : > { %v6927_v38 = vpack.i.bf16 %v4938_v12, %v4882_v24  ;;  %v6750_v8 = vunpack.i.l.bf16 %v13001_v25  ;;  %v5488_v62 = vsel %vm705_vm4, 0.0, %v5487_v60  ;;  %v11659_v3 = vperm.slane %v13002_v55, %v12941_v48  ;;  %v13005_v12 = vld [vmem:[#allocation30_spill] sm:$0xff]  ;;  %v13007_v60 = vld [vmem:[#allocation48_spill] sm:$0xff] }
 0x56d   : > { %v6937_v56 = vpack.i.bf16 %v5084_v52, %v5488_v62  ;;  %v5693_v9 = vrot.slane %v11645_v23, 4  ;;  %v5277_v16 = vrot.slane %v13005_v12, 4  ;;  %v4450_v17 = vsel %vm705_vm4, %v4449_v54, %v13006_v63  ;;  %v13008_v52 = vld [vmem:[#allocation32_spill] sm:$0xff] }
 0x56e   : > { %6923 = vrot.lane.b32.xlu0 %v6922_v1, %s7016_s16  ;;  %v13003_v1 = vld [vmem:[#allocation6_spill] sm:$0xff]  ;;  %v5273_v49 = vrot.slane %v11659_v3, 4  ;;  %v11691_v25 = vperm.slane %v4450_v17, %v12941_v48  ;;  %v13009_v55 = vld [vmem:[#allocation28_spill] sm:$0xff]  ;;  %v13011_v17 = vld [vmem:[#allocation59_spill] sm:$0xff] }
 0x56f   : > { %6873 = vrot.lane.b32.xlu1 %v6872_v20, %s7022_s22  ;;  %v4269_v59 = vrot.slane %v13003_v1, 4  ;;  %v13004_v20 = vld [vmem:[#allocation47_spill] sm:$0xff]  ;;  %v5725_v1 = vrot.slane %v11396_v50, 4 }
 0x570   : > { %v6784_v0 = vpop.permute.xlu0 %6783  ;;  %v4325_v24 = vrot.slane %v13004_v20, 4 }
 0x571   : > { %v6786_v22 = vunpack.i.h.bf16 %v6784_v0  ;;  %v6785_v40 = vunpack.i.l.bf16 %v6784_v0  ;;  %v4506_v0 = vsel %vm705_vm4, %v4505_v39, %v13007_v60  ;;  %v4270_v5 = vsel %vm705_vm4, 0.0, %v4269_v59 }
 0x572   : > { %v4326_v44 = vsel %vm705_vm4, 0.0, %v4325_v24  ;;  %v11694_v54 = vperm.slane %v4506_v0, %v12941_v48  ;;  %v5278_v39 = vsel %vm705_vm4, 0.0, %v5277_v16  ;;  %v5726_v16 = vsel %vm705_vm4, %v5725_v1, %v11399_v41  ;;  %v13014_v41 = vld [vmem:[#allocation38_spill] sm:$0xff] }
 0x573   : > { %v4794_v11 = vsel %vm993_vm9, %v11523_v46, %v6786_v22  ;;  %v4787_v35 = vsel %vm993_vm9, %v11520_v26, %v6785_v40  ;;  %6928 = vrot.lane.b32.xlu2 %v6927_v38, %s7020_s20  ;;  %v11668_v46 = vperm.slane %v5740_v18, %v12941_v48  ;;  %v5543_v26 = vrot.slane %v11642_v10, 4  ;;  %v11684_v18 = vpop.permute.xlu2 %6788 }
 0x574   : > { %v11662_v19 = vsel %vm995_vm10, %v4794_v11, %v6751_v13  ;;  %v11665_v36 = vsel %vm995_vm10, %v4787_v35, %v6750_v8  ;;  %v5547_v38 = vrot.slane %v13008_v52, 4  ;;  %v5694_v40 = vsel %vm705_vm4, 0.0, %v5693_v9  ;;  %v13012_v52 = vld [vmem:[#allocation72_spill] sm:$0xff] }
 0x575   : > { %v5544_v22 = vsel %vm705_vm4, 0.0, %v5543_v26  ;;  %v5274_v8 = vsel %vm705_vm4, 0.0, %v5273_v49  ;;  %v6882_v62 = vpack.i.bf16 %v4326_v44, %v4270_v5  ;;  %v4473_v26 = vrot.slane %v11691_v25, 4  ;;  %v13010_v49 = vld [vmem:[#allocation58_spill] sm:$0xff]  ;;  %v13015_v44 = vld [vmem:[#allocation56_spill] sm:$0xff] }
 0x576   : > { %6938 = vrot.lane.b32.xlu0 %v6937_v56, %s7018_s18  ;;  %v5548_v13 = vsel %vm705_vm4, 0.0, %v5547_v38  ;;  %v6942_v35 = vpack.i.bf16 %v5544_v22, %v5274_v8  ;;  %v5695_v56 = vrot.slane %v13009_v55, 4  ;;  %v4529_v9 = vrot.slane %v11694_v54, 4  ;;  %v13013_v22 = vld [vmem:[#allocation29_spill] sm:$0xff] }
 0x577   : > { %5806 = vrot.lane.b32.xlu1 %v11668_v46, %s7019_s19  ;;  %v6967_v11 = vpack.i.bf16 %v5548_v13, %v5278_v39  ;;  %v4474_v24 = vsel %vm705_vm4, 0.0, %v4473_v26  ;;  %v4909_v63 = vrot.slane %v13010_v49, 4  ;;  %v4853_v60 = vrot.slane %v13011_v17, 4  ;;  %v13016_v13 = vld [vmem:[#allocation63_spill] sm:$0xff] }
 0x578   : > { %v5696_v20 = vsel %vm705_vm4, 0.0, %v5695_v56  ;;  %v4530_v12 = vsel %vm705_vm4, 0.0, %v4529_v9  ;;  %v11717_v50 = vperm.slane %v5726_v16, %v12941_v48  ;;  %v5697_v38 = vrot.slane %v13012_v52, 4 }
 0x579   : > { %v6897_v0 = vpack.i.bf16 %v4530_v12, %v4474_v24  ;;  %v4535_v5 = vrot.slane %v13014_v41, 4  ;;  %v4854_v39 = vsel %vm705_vm4, %v4853_v60, %v13015_v44  ;;  %v4910_v8 = vsel %vm705_vm4, %v4909_v63, %v13016_v13 }
 0x57a   : > { %v5698_v55 = vsel %vm705_vm4, 0.0, %v5697_v38  ;;  %v11741_v56 = vperm.slane %v4910_v8, %v12941_v48  ;;  %v5089_v1 = vrot.slane %v11444_v43, 4  ;;  %v5493_v12 = vrot.slane %v11458_v32, 4  ;;  %v13017_v38 = vld [vmem:[#allocation21_spill] sm:$0xff] }
 0x57b   : > { %5758 = vrot.lane.b32.xlu2 %v5694_v40, %s7018_s18  ;;  %v11706_v59 = vpop.permute.xlu2 %6798  ;;  %v4479_v40 = vrot.slane %v13013_v22, 4  ;;  %v4536_v28 = vsel %vm705_vm4, 0.0, %v4535_v5  ;;  %v5129_v60 = vrot.slane %v11543_v6, 4  ;;  %v5699_v32 = vrot.slane %v11517_v30, 4 }
 0x57c   : > { %v4933_v24 = vrot.slane %v11741_v56, 4  ;;  %v5090_v49 = vsel %vm705_vm4, 0.0, %v5089_v1  ;;  %v5494_v43 = vsel %vm705_vm4, 0.0, %v5493_v12  ;;  %v4883_v22 = vrot.slane %v13017_v38, 4 }
 0x57d   : > { %v4480_v33 = vsel %vm705_vm4, 0.0, %v4479_v40  ;;  %v13018_v40 = vld [vmem:[#allocation57_spill] sm:$0xff]  ;;  %v5130_v5 = vsel %vm705_vm4, %v11526_v4, %v5129_v60  ;;  %v11771_v6 = vperm.slane %v11629_v45, %v12941_v48  ;;  %v5751_v30 = vrot.slane %v11441_v47, 4 }
 0x57e   : > { %6943 = vrot.lane.b32.xlu0 %v6942_v35, %s7018_s18  ;;  %v6912_v9 = vpack.i.bf16 %v4536_v28, %v4480_v33  ;;  %v4934_v17 = vsel %vm705_vm4, 0.0, %v4933_v24  ;;  %v4939_v41 = vrot.slane %v13018_v40, 4  ;;  %v11767_v44 = vperm.slane %v5130_v5, %v12941_v48  ;;  %v13022_v5 = vld [vmem:[#allocation36_spill] sm:$0xff] }
 0x57f   : > { %6883 = vrot.lane.b32.xlu1 %v6882_v62, %s7016_s16  ;;  %v5749_v62 = vrot.slane %v11717_v50, 4  ;;  %v5700_v13 = vsel %vm705_vm4, 0.0, %v5699_v32  ;;  %v4884_v4 = vsel %vm705_vm4, 0.0, %v4883_v22  ;;  %v5279_v45 = vrot.slane %v11559_v21, 4  ;;  %v13020_v21 = vld [vmem:[#allocation70_spill] sm:$0xff] }
 0x580   : > { %v4940_v8 = vsel %vm705_vm4, 0.0, %v4939_v41  ;;  %v5752_v33 = vsel %vm705_vm4, 0.0, %v5751_v30  ;;  %v5143_v28 = vrot.slane %v11598_v58, 4  ;;  %v5489_v12 = vrot.slane %v13020_v21, 4 }
 0x581   : > { %v5750_v26 = vsel %vm705_vm4, 0.0, %v5749_v62  ;;  %v5549_v62 = vrot.slane %v11548_v37, 4  ;;  %v6932_v47 = vpack.i.bf16 %v4940_v8, %v4884_v4  ;;  %v5333_v37 = vrot.slane %v11610_v53, 4 }
 0x582   : > { %v5280_v24 = vsel %vm705_vm4, 0.0, %v5279_v45  ;;  %v5144_v58 = vsel %vm705_vm4, 0.0, %v5143_v28  ;;  %v5335_v22 = vrot.slane %v11771_v6, 4  ;;  %v5753_v40 = vrot.slane %v11463_v2, 4 }
 0x583   : > { %5766 = vrot.lane.b32.xlu2 %v5696_v20, %s7016_s16  ;;  %v11731_v35 = vpop.permute.xlu2 %6808  ;;  %v5087_v41 = vrot.slane %v11376_v51, 4  ;;  %v5491_v4 = vrot.slane %v11393_v57, 4  ;;  %v5145_v8 = vrot.slane %v11767_v44, 4  ;;  %v11832_v28 = vperm.slane %v11618_v61, %v12941_v48  ;;  %v5919_v61 = vld [vmem:[%s12166_s9] sm:$0xf] }
 0x584   : > { %v5336_v45 = vsel %vm705_vm4, 0.0, %v5335_v22  ;;  %v5754_v2 = vsel %vm705_vm4, 0.0, %v5753_v40 }
 0x585   : > { %v5088_v51 = vsel %vm705_vm4, 0.0, %v5087_v41  ;;  %13024 = vst [vmem:[#allocation33_spill] sm:$0xff] %v11832_v28 }
 0x586   : > { %6953 = vrot.lane.b32.xlu0 %v6952_v27, %s7016_s16  ;;  %v11738_v27 = vperm.slane %v4854_v39, %v12941_v48  ;;  %v6987_v39 = vpack.i.bf16 %v11771_v6, %v11767_v44  ;;  %v5755_v6 = vrot.slane %v11668_v46, 4  ;;  %v5492_v44 = vsel %vm705_vm4, 0.0, %v5491_v4 }
 0x587   : > { %6898 = vrot.lane.b32.xlu1 %v6897_v0, %s7018_s18  ;;  %v6972_v0 = vpack.i.bf16 %v5090_v49, %v5494_v43  ;;  %v11797_v49 = vpop.permute.xlu1 %6803  ;;  %v13021_v43 = vld [vmem:[#allocation42_spill] sm:$0xff] }
 0x588   : > { %v4877_v20 = vrot.slane %v11738_v27, 4  ;;  %v5115_v60 = vrot.slane %v13021_v43, 4  ;;  %v5756_v46 = vsel %vm705_vm4, 0.0, %v5755_v6  ;;  %v13026_v6 = vld [vmem:[#allocation50_spill] sm:$0xff] }
 0x58a   : > { %v4878_v63 = vsel %vm705_vm4, 0.0, %v4877_v20  ;;  %v5116_v30 = vsel %vm705_vm4, %v5115_v60, %v13022_v5  ;;  %v5911_v60 = vld [vmem:[%s12165_s8] sm:$0xf] }
 0x58b   : > { %5774 = vrot.lane.b32.xlu2 %v5698_v55, %s7020_s20  ;;  %v6917_v52 = vpack.i.bf16 %v4934_v17, %v4878_v63 }
 0x58e   : > { %5786 = vrot.lane.b32.xlu0 %v5750_v26, %s7018_s18  ;;  %v11751_v16 = vpop.permute.xlu2 %6823  ;;  %v5550_v26 = vsel %vm705_vm4, 0.0, %v5549_v62 }
 0x58f   : > { %6913 = vrot.lane.b32.xlu1 %v6912_v9, %s7021_s21  ;;  %v13019_v9 = vld [vmem:[#allocation26_spill] sm:$0xff]  ;;  %v6982_v63 = vpack.i.bf16 %v5550_v26, %v5280_v24  ;;  %v5329_v24 = vrot.slane %v11832_v28, 4  ;;  %v6805_v28 = vunpack.i.l.bf16 %v11797_v49 }
 0x590   : > { %v5085_v1 = vrot.slane %v13019_v9, 4  ;;  %v6957_v9 = vpack.i.bf16 %v5088_v51, %v5492_v44  ;;  %v13027_v44 = vld [vmem:[#allocation17_spill] sm:$0xff] }
 0x592   : > { %v5086_v17 = vsel %vm705_vm4, 0.0, %v5085_v1  ;;  %v11818_v62 = vpop.permute.xlu1 %6813 }
 0x593   : > { %6968 = vrot.lane.b32.xlu2 %v6967_v11, %s7020_s20  ;;  %v11773_v11 = vpop.permute.xlu0 %6793 }
 0x594   : > { %v6795_v51 = vunpack.i.l.bf16 %v11773_v11 }
 0x596   : > { %6973 = vrot.lane.b32.xlu0 %v6972_v0, %s7021_s21  ;;  %v11782_v55 = vpop.permute.xlu2 %5762  ;;  %v5334_v0 = vsel %vm705_vm4, 0.0, %v5333_v37 }
 0x597   : > { %6918 = vrot.lane.b32.xlu1 %v6917_v52, %s7018_s18  ;;  %v6992_v53 = vpack.i.bf16 %v5334_v0, %v5144_v58  ;;  %v5490_v52 = vsel %vm705_vm4, 0.0, %v5489_v12  ;;  %v5330_v12 = vsel %vm705_vm4, 0.0, %v5329_v24  ;;  %v5331_v0 = vrot.slane %v11382_v7, 4 }
 0x598   : > { %v6947_v38 = vpack.i.bf16 %v5086_v17, %v5490_v52  ;;  %v5141_v17 = vrot.slane %v11370_v42, 4 }
 0x599   : > { %v5332_v52 = vsel %vm705_vm4, 0.0, %v5331_v0 }
 0x59b   : > { %5782 = vrot.lane.b32.xlu2 %v5700_v13, %s7021_s21  ;;  %v11793_v20 = vpop.permute.xlu0 %6818 }
 0x59e   : > { %5794 = vrot.lane.b32.xlu0 %v5752_v33, %s7016_s16  ;;  %v11805_v32 = vpop.permute.xlu2 %5770  ;;  %v11825_v33 = vperm.slane %v5116_v30, %v12941_v48 }
 0x59f   : > { %6933 = vrot.lane.b32.xlu1 %v6932_v47, %s7021_s21  ;;  %v5146_v47 = vsel %vm705_vm4, 0.0, %v5145_v8 }
 0x5a0   : > { %13023 = vst [vmem:[#allocation49_spill] sm:$0xff] %v11825_v33  ;;  %v6997_v57 = vpack.i.bf16 %v5336_v45, %v5146_v47  ;;  %v5139_v1 = vrot.slane %v11825_v33, 4 }
 0x5a2   : > { %v5140_v48 = vsel %vm705_vm4, 0.0, %v5139_v1 }
 0x5a3   : > { %6983 = vrot.lane.b32.xlu2 %v6982_v63, %s7021_s21  ;;  %v11814_v13 = vpop.permute.xlu0 %6833  ;;  %v11843_v21 = vpop.permute.xlu1 %6828  ;;  %v6962_v63 = vpack.i.bf16 %v5330_v12, %v5140_v48 }
 0x5a6   : > { %6993 = vrot.lane.b32.xlu0 %v6992_v53, %s7020_s20 }
 0x5a7   : > { %6948 = vrot.lane.b32.xlu1 %v6947_v38, %s7016_s16 }
 0x5ab   : > { %5802 = vrot.lane.b32.xlu2 %v5754_v2, %s7020_s20 }
 0x5ad   : > { %v11835_v26 = vpop.permute.xlu2 %5790  ;;  %v11840_v37 = vpop.permute.xlu0 %6843 }
 0x5ae   : > { %5810 = vrot.lane.b32.xlu0 %v5756_v46, %s7021_s21 }
 0x5af   : > { %6958 = vrot.lane.b32.xlu1 %v6957_v9, %s7020_s20  ;;  %v6796_v9 = vunpack.i.h.bf16 %v11773_v11  ;;  %s379_s20 = scalar_lea.vmem %s12167_s10, %s6042_s17 }
 0x5b3   : > { %6988 = vrot.lane.b32.xlu2 %v6987_v39, %s7019_s19  ;;  %v5142_v39 = vsel %vm705_vm4, 0.0, %v5141_v17 }
 0x5b4   : > { %v6977_v42 = vpack.i.bf16 %v5332_v52, %v5142_v39 }
 0x5b5   : > { %v6879_v58 = vpop.permute.xlu2 %6878 }
 0x5b6   : > { %5922 = vperm.xlu0 %6621, %v5919_v61   ;;  %v11853_v43 = vpop.permute.xlu0 %6853  ;;  %v6880_v30 = vunpack.i.l.bf16 %v6879_v58  ;;  %v6881_v8 = vunpack.i.h.bf16 %v6879_v58 }
 0x5b7   : > { %6963 = vrot.lane.b32.xlu1 %v6962_v63, %s7018_s18 }
 0x5b8   : > { %v4387_v45 = vsel %vm985_vm5, %v13026_v6, %v6880_v30  ;;  %v4394_v46 = vsel %vm985_vm5, %v13027_v44, %v6881_v8  ;;  %v6800_v8 = vunpack.i.l.bf16 %v11706_v59 }
 0x5b9   : > { %v11859_v53 = vpop.permute.xlu1 %6838  ;;  %v4395_v24 = vsel %vm987_vm6, %v4394_v46, %v6796_v9 }
 0x5bb   : > { %5914 = vperm.xlu2 %6620, %v5911_v60  }
 0x5bd   : > { %v11863_v38 = vpop.permute.xlu2 %6893 }
 0x5be   : > { %v11866_v22 = vpop.permute.xlu0 %6863 }
 0x5bf   : > { %6978 = vrot.lane.b32.xlu1 %v6977_v42, %s7016_s16  ;;  %13025 = vst [vmem:[#allocation10_spill] sm:$0xff] %v11866_v22 }
 0x5c1   : > { %v11868_v40 = vpop.permute.xlu1 %6848 }
 0x5c5   : > { %v11870_v41 = vpop.permute.xlu2 %6908 }
 0x5c6   : > { %v11873_v7 = vpop.permute.xlu0 %5798 }
 0x5c7   : > { %6998 = vrot.lane.b32.xlu1 %v6997_v57, %s7021_s21  ;;  %v4388_v57 = vsel %vm987_vm6, %v4387_v45, %v6795_v51 }
 0x5c9   : > { %v11875_v5 = vpop.permute.xlu1 %6858 }
 0x5cd   : > { %v11877_v4 = vpop.permute.xlu2 %6928 }
 0x5d0   : > { %v6889_v2 = vpop.permute.xlu0 %6888 }
 0x5d1   : > { %v5779_v47 = vpop.permute.xlu1 %5778  ;;  %v6891_v9 = vunpack.i.h.bf16 %v6889_v2 }
 0x5d5   : > { %v5759_v1 = vpop.permute.xlu2 %5758 }
 0x5d6   : > { %v5813_v12 = vsel %vm985_vm5, %v11645_v23, %v5759_v1  ;;  %v6890_v1 = vunpack.i.l.bf16 %v6889_v2 }
 0x5d7   : > { %v5814_v58 = vsel %vm987_vm6, %v5813_v12, %v11782_v55  ;;  %v6801_v55 = vunpack.i.h.bf16 %v11706_v59 }
 0x5d8   : > { %v11887_v48 = vpop.permute.xlu0 %6903 }
 0x5d9   : > { %v11889_v61 = vpop.permute.xlu1 %6868 }
 0x5dd   : > { %v5767_v63 = vpop.permute.xlu2 %5766 }
 0x5de   : > { %v5815_v17 = vsel %vm989_vm7, %v5814_v58, %v5767_v63 }
 0x5df   : > { %v5816_v60 = vsel %vm991_vm8, %v5815_v17, %v11805_v32  ;;  %v6846_v32 = vunpack.i.h.bf16 %v11840_v37 }
 0x5e0   : > { %v11898_v11 = vpop.permute.xlu0 %6923 }
 0x5e1   : > { %v11900_v0 = vpop.permute.xlu1 %6873 }
 0x5e2   : > { %13028 = vst [vmem:[#allocation67_spill] sm:$0xff] %v11900_v0 }
 0x5e5   : > { %v5775_v39 = vpop.permute.xlu2 %5774 }
 0x5e6   : > { %v5817_v51 = vsel %vm993_vm9, %v5816_v60, %v5775_v39 }
 0x5e7   : > { %v5818_v60 = vsel %vm995_vm10, %v5817_v51, %v5779_v47  ;;  %v6845_v47 = vunpack.i.l.bf16 %v11840_v37  ;;  %v6906_v51 = vunpack.i.h.bf16 %v11887_v48 }
 0x5e8   : > { %v11902_v52 = vpop.permute.xlu0 %6938 }
 0x5e9   : > { %v11904_v42 = vpop.permute.xlu1 %5806 }
 0x5ed   : > { %v11906_v30 = vpop.permute.xlu2 %6968 }
 0x5f0   : > { %v6944_v23 = vpop.permute.xlu0 %6943 }
 0x5f1   : > { %v6946_v6 = vunpack.i.h.bf16 %v6944_v23  ;;  %v6884_v45 = vpop.permute.xlu1 %6883  ;;  %v6945_v58 = vunpack.i.l.bf16 %v6944_v23  ;;  %v6811_v23 = vunpack.i.h.bf16 %v11731_v35 }
 0x5f2   : > { %v6886_v44 = vunpack.i.h.bf16 %v6884_v45  ;;  %v6885_v46 = vunpack.i.l.bf16 %v6884_v45 }
 0x5f3   : > { %v5614_v12 = vsel %vm985_vm5, %v11642_v10, %v6946_v6  ;;  %v6855_v6 = vunpack.i.l.bf16 %v11853_v43 }
 0x5f4   : > { %v4389_v63 = vsel %vm989_vm7, %v4388_v57, %v6885_v46  ;;  %v4396_v17 = vsel %vm989_vm7, %v4395_v24, %v6886_v44  ;;  %v5615_v59 = vsel %vm987_vm6, %v5614_v12, %v6846_v32  ;;  %v5393_v24 = vsel %vm985_vm5, %v11659_v3, %v6945_v58 }
 0x5f5   : > { %v4390_v0 = vsel %vm991_vm8, %v4389_v63, %v6800_v8  ;;  %v4397_v22 = vsel %vm991_vm8, %v4396_v17, %v6801_v55  ;;  %v5783_v39 = vpop.permute.xlu2 %5782  ;;  %v6810_v55 = vunpack.i.l.bf16 %v11731_v35  ;;  %v5394_v3 = vsel %vm987_vm6, %v5393_v24, %v6845_v47 }
 0x5f6   : > { %v11921_v2 = vsel %vm993_vm9, %v4390_v0, %v6890_v1  ;;  %v11924_v10 = vsel %vm993_vm9, %v4397_v22, %v6891_v9  ;;  %v5819_v57 = vsel %vm997_vm11, %v5818_v60, %v5783_v39  ;;  %v6856_v0 = vunpack.i.h.bf16 %v11853_v43 }
 0x5f7   : > { %6034 = vmatpush.msk.msra.mxu2 %vm5851_vm13, %v5819_v57  ;;  %v6905_v9 = vunpack.i.l.bf16 %v11887_v48  ;;  %v6971_v35 = vunpack.i.h.bf16 %v11906_v30  ;;  %v6871_v17 = vunpack.i.h.bf16 %v11889_v61 }
 0x5f8   : > { %v6954_v8 = vpop.permute.xlu0 %6953 }
 0x5f9   : > { %v6956_v22 = vunpack.i.h.bf16 %v6954_v8  ;;  %v6955_v45 = vunpack.i.l.bf16 %v6954_v8  ;;  %v6899_v32 = vpop.permute.xlu1 %6898 }
 0x5fa   : > { %v6901_v44 = vunpack.i.h.bf16 %v6899_v32  ;;  %v6900_v46 = vunpack.i.l.bf16 %v6899_v32  ;;  %v6826_v32 = vunpack.i.h.bf16 %v11751_v16 }
 0x5fb   : > { %v5395_v37 = vsel %vm989_vm7, %v5394_v3, %v6955_v45  ;;  %v5616_v1 = vsel %vm989_vm7, %v5615_v59, %v6956_v22  ;;  %v6770_v45 = vunpack.i.l.bf16 %v11585_v34  ;;  %v6825_v3 = vunpack.i.l.bf16 %v11751_v16 }
 0x5fc   : > { %v5396_v12 = vsel %vm991_vm8, %v5395_v37, %v6855_v6  ;;  %v5617_v43 = vsel %vm991_vm8, %v5616_v1, %v6856_v0  ;;  %v4600_v58 = vsel %vm985_vm5, %v11694_v54, %v6901_v44  ;;  %v4593_v63 = vsel %vm985_vm5, %v11691_v25, %v6900_v46  ;;  %v13030_v25 = vld [vmem:[#allocation39_spill] sm:$0xff]  ;;  %v13031_v0 = vld [vmem:[#allocation9_spill] sm:$0xff] }
 0x5fd   : > { %v4594_v48 = vsel %vm987_vm6, %v4593_v63, %v6810_v55  ;;  %v4601_v60 = vsel %vm987_vm6, %v4600_v58, %v6811_v23  ;;  %v5618_v39 = vsel %vm993_vm9, %v5617_v43, %v6971_v35  ;;  %v6735_v8 = vunpack.i.l.bf16 %v13030_v25  ;;  %v13032_v23 = vld [vmem:[#allocation31_spill] sm:$0xff] }
 0x5fe   : > { %v4595_v59 = vsel %vm989_vm7, %v4594_v48, %v6905_v9  ;;  %v11953_v57 = vsel %vm989_vm7, %v4601_v60, %v6906_v51  ;;  %v11956_v24 = vsel %vm995_vm10, %v5618_v39, %v6871_v17  ;;  %v6765_v6 = vunpack.i.l.bf16 %v13031_v0 }
 0x5ff   : > { %13029 = vst [vmem:[#allocation69_spill] sm:$0xff] %v11956_v24  ;;  %v6790_v55 = vunpack.i.l.bf16 %v11684_v18  ;;  %v6730_v22 = vunpack.i.l.bf16 %v13032_v23  ;;  %v6820_v44 = vunpack.i.l.bf16 %v11793_v20  ;;  %v6815_v46 = vunpack.i.l.bf16 %v11818_v62 }
 0x600   : > { %v5787_v54 = vpop.permute.xlu0 %5786  ;;  %v6830_v9 = vunpack.i.l.bf16 %v11843_v21  ;;  %v6910_v37 = vunpack.i.l.bf16 %v11870_v41  ;;  %v6970_v1 = vunpack.i.l.bf16 %v11906_v30  ;;  %v6870_v63 = vunpack.i.l.bf16 %v11889_v61 }
 0x601   : > { %v11958_v47 = vpop.permute.xlu1 %6913  ;;  %v6926_v17 = vunpack.i.h.bf16 %v11898_v11  ;;  %v6925_v48 = vunpack.i.l.bf16 %v11898_v11  ;;  %v4596_v30 = vsel %vm991_vm8, %v4595_v59, %v6815_v46 }
 0x602   : > { %v6915_v16 = vunpack.i.l.bf16 %v11958_v47  ;;  %v5397_v24 = vsel %vm993_vm9, %v5396_v12, %v6970_v1  ;;  %v4597_v11 = vsel %vm993_vm9, %v4596_v30, %v6910_v37  ;;  %v6835_v12 = vunpack.i.l.bf16 %v11814_v13 }
 0x603   : > { %v11987_v33 = vsel %vm995_vm10, %v5397_v24, %v6870_v63  ;;  %v4789_v24 = vsel %vm997_vm11, %v11665_v36, %v6790_v55  ;;  %v6895_v63 = vunpack.i.l.bf16 %v11863_v38  ;;  %v4392_v36 = vsel %vm995_vm10, %v11921_v2, %v6805_v28  ;;  %v12012_v55 = vpop.permute.xlu2 %6983 }
 0x604   : > { %v5835_v1 = vrot.slane %v4789_v24, 4  ;;  %v6736_v28 = vunpack.i.h.bf16 %v13030_v25  ;;  %v6831_v24 = vunpack.i.h.bf16 %v11843_v21  ;;  %v6860_v21 = vunpack.i.l.bf16 %v11875_v5 }
 0x608   : > { %v11966_v51 = vpop.permute.xlu0 %6973 }
 0x609   : > { %v6919_v35 = vpop.permute.xlu1 %6918 }
 0x60a   : > { %v6921_v43 = vunpack.i.h.bf16 %v6919_v35  ;;  %v6920_v58 = vunpack.i.l.bf16 %v6919_v35 }
 0x60c   : > { %v5004_v60 = vsel %vm985_vm5, %v11741_v56, %v6921_v43  ;;  %v4997_v39 = vsel %vm985_vm5, %v11738_v27, %v6920_v58  ;;  %v6930_v56 = vunpack.i.l.bf16 %v11877_v4  ;;  %v4176_v58 = vsel %vm991_vm8, %v11570_v31, %v6730_v22 }
 0x60d   : > { %v4998_v35 = vsel %vm987_vm6, %v4997_v39, %v6825_v3  ;;  %v5005_v61 = vsel %vm987_vm6, %v5004_v60, %v6826_v32  ;;  %v4598_v3 = vsel %vm995_vm10, %v4597_v11, %v6820_v44  ;;  %v4177_v44 = vsel %vm993_vm9, %v4176_v58, %v6765_v6 }
 0x60e   : > { %v4999_v43 = vsel %vm989_vm7, %v4998_v35, %v6925_v48  ;;  %v5006_v27 = vsel %vm989_vm7, %v5005_v61, %v6926_v17  ;;  %v4599_v37 = vsel %vm997_vm11, %v4598_v3, %v6915_v16  ;;  %v5820_v31 = vsel %vm985_vm5, %v11717_v50, %v5787_v54 }
 0x60f   : > { %v5000_v59 = vsel %vm991_vm8, %v4999_v43, %v6830_v9  ;;  %v12015_v48 = vsel %vm5851_vm13, %v4599_v37, %v5835_v1  ;;  %v4178_v22 = vsel %vm995_vm10, %v4177_v44, %v6735_v8  ;;  %v4393_v16 = vsel %vm997_vm11, %v4392_v36, %v6895_v63 }
 0x610   : > { %v5795_v32 = vpop.permute.xlu0 %5794  ;;  %v5001_v46 = vsel %vm993_vm9, %v5000_v59, %v6930_v56  ;;  %v6941_v60 = vunpack.i.h.bf16 %v11902_v52  ;;  %v6940_v39 = vunpack.i.l.bf16 %v11902_v52  ;;  %v4179_v6 = vsel %vm997_vm11, %v4178_v22, %v6770_v45 }
 0x611   : > { %v12004_v17 = vpop.permute.xlu1 %6933  ;;  %v12007_v9 = vsel %vm995_vm10, %v5001_v46, %v6835_v12  ;;  %v5829_v30 = vrot.slane %v4393_v16, 4  ;;  %v5821_v2 = vsel %vm987_vm6, %v5820_v31, %v11835_v26  ;;  %v6766_v50 = vunpack.i.h.bf16 %v13031_v0 }
 0x612   : > { %v6791_v54 = vunpack.i.h.bf16 %v11684_v18  ;;  %v6731_v8 = vunpack.i.h.bf16 %v13032_v23  ;;  %v5822_v61 = vsel %vm989_vm7, %v5821_v2, %v5795_v32  ;;  %v6771_v52 = vunpack.i.h.bf16 %v11585_v34  ;;  %v5803_v32 = vpop.permute.xlu2 %5802 }
 0x613   : > { %v12028_v35 = vsel %vm5851_vm13, %v4179_v6, %v5829_v30  ;;  %v6806_v45 = vunpack.i.h.bf16 %v11797_v49  ;;  %v5203_v11 = vsel %vm985_vm5, %v11589_v15, %v6941_v60  ;;  %v5607_v26 = vsel %vm985_vm5, %v11613_v29, %v6940_v39 }
 0x614   : > { %v6821_v0 = vunpack.i.h.bf16 %v11793_v20  ;;  %v6816_v18 = vunpack.i.h.bf16 %v11818_v62  ;;  %v6841_v23 = vunpack.i.h.bf16 %v11859_v53  ;;  %v6840_v43 = vunpack.i.l.bf16 %v11859_v53 }
 0x615   : > { %v6836_v34 = vunpack.i.h.bf16 %v11814_v13  ;;  %v5823_v49 = vsel %vm991_vm8, %v5822_v61, %v11873_v7  ;;  %v6851_v29 = vunpack.i.h.bf16 %v11868_v40  ;;  %v6850_v3 = vunpack.i.l.bf16 %v11868_v40 }
 0x616   : > { %v5204_v20 = vsel %vm987_vm6, %v5203_v11, %v6841_v23  ;;  %v5608_v62 = vsel %vm987_vm6, %v5607_v26, %v6840_v43  ;;  %v6896_v53 = vunpack.i.h.bf16 %v11863_v38  ;;  %v6931_v7 = vunpack.i.h.bf16 %v11877_v4 }
 0x617   : > { %v5824_v37 = vsel %vm993_vm9, %v5823_v49, %v5803_v32  ;;  %v6911_v58 = vunpack.i.h.bf16 %v11870_v41  ;;  %v6861_v63 = vunpack.i.h.bf16 %v11875_v5  ;;  %v5007_v38 = vsel %vm991_vm8, %v5006_v27, %v6831_v24  ;;  %v13034_v24 = vld [vmem:[#allocation49_spill] sm:$0xff]  ;;  %v13035_v32 = vld [vmem:[#allocation10_spill] sm:$0xff] }
 0x618   : > { %v12040_v56 = vpop.permute.xlu0 %6993  ;;  %v6985_v44 = vunpack.i.l.bf16 %v12012_v55  ;;  %v6916_v36 = vunpack.i.h.bf16 %v11958_v47  ;;  %v6976_v4 = vunpack.i.h.bf16 %v11966_v51  ;;  %v5008_v31 = vsel %vm993_vm9, %v5007_v38, %v6931_v7 }
 0x619   : > { %v6949_v12 = vpop.permute.xlu1 %6948  ;;  %v5825_v22 = vsel %vm995_vm10, %v5824_v37, %v11904_v42  ;;  %v12072_v41 = vsel %vm995_vm10, %v5008_v31, %v6836_v34  ;;  %v4603_v5 = vsel %vm991_vm8, %v11953_v57, %v6816_v18  ;;  %v4796_v27 = vsel %vm997_vm11, %v11662_v19, %v6791_v54 }
 0x61a   : > { %v6951_v15 = vunpack.i.h.bf16 %v6949_v12  ;;  %v6950_v59 = vunpack.i.l.bf16 %v6949_v12  ;;  %v6975_v60 = vunpack.i.l.bf16 %v11966_v51  ;;  %v4604_v6 = vsel %vm993_vm9, %v4603_v5, %v6911_v58  ;;  %v6989_v31 = vpop.permute.xlu2 %6988  ;;  %v13037_v5 = vld [vmem:[#allocation69_spill] sm:$0xff] }
 0x61b   : > { %v5836_v30 = vrot.slane %v4796_v27, 4  ;;  %v4605_v61 = vsel %vm995_vm10, %v4604_v6, %v6821_v0  ;;  %v4183_v57 = vsel %vm991_vm8, %v11567_v14, %v6731_v8  ;;  %v6935_v11 = vunpack.i.l.bf16 %v12004_v17 }
 0x61c   : > { %v5205_v13 = vsel %vm989_vm7, %v5204_v20, %v6951_v15  ;;  %v5609_v46 = vsel %vm989_vm7, %v5608_v62, %v6950_v59  ;;  %v4606_v19 = vsel %vm997_vm11, %v4605_v61, %v6916_v36  ;;  %v4184_v51 = vsel %vm993_vm9, %v4183_v57, %v6766_v50  ;;  %v13033_v62 = vld [vmem:[#allocation33_spill] sm:$0xff] }
 0x61d   : > { %v5206_v1 = vsel %vm991_vm8, %v5205_v13, %v6851_v29  ;;  %v5610_v40 = vsel %vm991_vm8, %v5609_v46, %v6850_v3  ;;  %v4399_v54 = vsel %vm995_vm10, %v11924_v10, %v6806_v45  ;;  %v12093_v23 = vsel %vm5851_vm13, %v4606_v19, %v5836_v30 }
 0x61e   : > { %v4185_v14 = vsel %vm995_vm10, %v4184_v51, %v6736_v28  ;;  %v4400_v43 = vsel %vm997_vm11, %v4399_v54, %v6896_v53  ;;  %v5399_v25 = vsel %vm997_vm11, %v11987_v33, %v6985_v44  ;;  %v5003_v28 = vsel %vm997_vm11, %v12007_v9, %v6935_v11  ;;  %v5860_v33 = vld [vmem:[%s12164_s7] sm:$0xf] }
 0x61f   : > { %v4186_v50 = vsel %vm997_vm11, %v4185_v14, %v6771_v52  ;;  %v5830_v12 = vrot.slane %v4400_v43, 4  ;;  %v6866_v13 = vunpack.i.h.bf16 %v13035_v32  ;;  %v6865_v46 = vunpack.i.l.bf16 %v13035_v32 }
 0x620   : > { %v5811_v16 = vpop.permute.xlu0 %5810  ;;  %v6986_v38 = vunpack.i.h.bf16 %v12012_v55  ;;  %v6936_v30 = vunpack.i.h.bf16 %v12004_v17 }
 0x621   : > { %v5826_v47 = vsel %vm997_vm11, %v5825_v22, %v5811_v16  ;;  %v6959_v39 = vpop.permute.xlu1 %6958  ;;  %v5853_v15 = vsel %vm5851_vm13, %v4186_v50, %v5830_v12  ;;  %v6996_v22 = vunpack.i.h.bf16 %v12040_v56  ;;  %v6995_v16 = vunpack.i.l.bf16 %v12040_v56 }
 0x622   : > { %6036 = vmatpush.msk.msra.mxu1 %vm5851_vm13, %v5826_v47  ;;  %v6961_v42 = vunpack.i.h.bf16 %v6959_v39  ;;  %v6960_v2 = vunpack.i.l.bf16 %v6959_v39  ;;  %v5620_v27 = vsel %vm997_vm11, %v13037_v5, %v6986_v38  ;;  %v6991_v47 = vunpack.i.h.bf16 %v6989_v31  ;;  %v5915_v14 = vpop.permute.xlu2 %5914 }
 0x623   : > { %v6990_v39 = vunpack.i.l.bf16 %v6989_v31  ;;  %v5848_v11 = vrot.slane %v5620_v27, 4 }
 0x624   : > { %v5207_v26 = vsel %vm993_vm9, %v5206_v1, %v6961_v42  ;;  %v5611_v18 = vsel %vm993_vm9, %v5610_v40, %v6960_v2  ;;  %v13036_v1 = vld [vmem:[#allocation67_spill] sm:$0xff] }
 0x625   : > { %v5208_v8 = vsel %vm995_vm10, %v5207_v26, %v6861_v63  ;;  %v5612_v0 = vsel %vm995_vm10, %v5611_v18, %v6860_v21  ;;  %v6876_v40 = vunpack.i.h.bf16 %v13036_v1  ;;  %v6875_v58 = vunpack.i.l.bf16 %v13036_v1 }
 0x626   : > { %v5613_v10 = vsel %vm997_vm11, %v5612_v0, %v6975_v60  ;;  %v5209_v45 = vsel %vm997_vm11, %v5208_v8, %v6976_v4  ;;  %v5010_v26 = vsel %vm997_vm11, %v12072_v41, %v6936_v30 }
 0x627   : > { %v5847_v34 = vrot.slane %v5613_v10, 4  ;;  %v5841_v49 = vrot.slane %v5209_v45, 4 }
 0x628   : > { %v5923_v43 = vpop.permute.xlu0 %5922 }
 0x629   : > { %v6964_v59 = vpop.permute.xlu1 %6963  ;;  %v5858_v52 = vsel %vm5851_vm13, %v5399_v25, %v5847_v34  ;;  %v5856_v29 = vsel %vm5851_vm13, %v5003_v28, %v5841_v49 }
 0x62a   : > { %5883 = vmatpush.msra.mxu2 %v5858_v52  ;;  %v6966_v3 = vunpack.i.h.bf16 %v6964_v59  ;;  %v6965_v20 = vunpack.i.l.bf16 %v6964_v59 }
 0x62c   : > { %5884 = vmatpush.msra.mxu2 %v5856_v29  ;;  %v5400_v9 = vsel %vm985_vm5, %v13033_v62, %v6966_v3  ;;  %v5210_v53 = vsel %vm985_vm5, %v13034_v24, %v6965_v20 }
 0x62d   : > { %v5211_v63 = vsel %vm987_vm6, %v5210_v53, %v6865_v46  ;;  %v5401_v21 = vsel %vm987_vm6, %v5400_v9, %v6866_v13 }
 0x62e   : > { %5885 = vmatpush.msra.mxu2 %v12015_v48 }
 0x630   : > { %5886 = vmatpush.msra.mxu2 %v12028_v35 }
 0x631   : > { %v6979_v7 = vpop.permute.xlu1 %6978  ;;  %6035 = vmatmul.msk.f32.vlgmr.msra.gmra.mxu2 %vm5861_vm14, %v5860_v33 }
 0x632   : > { %v6981_v48 = vunpack.i.h.bf16 %v6979_v7  ;;  %v6980_v37 = vunpack.i.l.bf16 %v6979_v7 }
 0x634   : > { %v5212_v35 = vsel %vm989_vm7, %v5211_v63, %v6980_v37  ;;  %v5402_v44 = vsel %vm989_vm7, %v5401_v21, %v6981_v48 }
 0x635   : > { %v5213_v36 = vsel %vm991_vm8, %v5212_v35, %v6875_v58  ;;  %v5403_v4 = vsel %vm991_vm8, %v5402_v44, %v6876_v40 }
 0x636   : > { %v5214_v60 = vsel %vm993_vm9, %v5213_v36, %v6995_v16  ;;  %v5404_v55 = vsel %vm993_vm9, %v5403_v4, %v6996_v22 }
 0x637   : > { %v5215_v61 = vsel %vm995_vm10, %v5214_v60, %v6990_v39  ;;  %v5405_v57 = vsel %vm995_vm10, %v5404_v55, %v6991_v47 }
 0x639   : > { %v6999_v6 = vpop.permute.xlu1 %6998 }
 0x63a   : > { %v7001_v42 = vunpack.i.h.bf16 %v6999_v6  ;;  %v7000_v2 = vunpack.i.l.bf16 %v6999_v6 }
 0x63c   : > { %v5216_v56 = vsel %vm997_vm11, %v5215_v61, %v7000_v2  ;;  %v5406_v19 = vsel %vm997_vm11, %v5405_v57, %v7001_v42 }
 0x63d   : > { %v5842_v51 = vrot.slane %v5216_v56, 4  ;;  %v5859_v54 = vsel %vm5851_vm13, %v5406_v19, %v5848_v11 }
 0x63e   : > { %5903 = vmatpush.msra.mxu1 %v5859_v54 }
 0x63f   : > { %v5857_v17 = vsel %vm5851_vm13, %v5010_v26, %v5842_v51 }
 0x640   : > { %5904 = vmatpush.msra.mxu1 %v5857_v17 }
 0x642   : > { %5905 = vmatpush.msra.mxu1 %v12093_v23 }
 0x644   : > { %5906 = vmatpush.msra.mxu1 %v5853_v15 }
 0x645   : > { %6037 = vmatmul.msk.f32.vlgmr.msra.gmra.mxu1 %vm5861_vm14, %v5860_v33 }
 0x6b4   : > { %v5888_v18 = vpop.f32.mrf.mxu2 }
 0x6b5   : > { %v5917_v8 = vmul.f32 %v5915_v14, %v5888_v18 }
 0x6b7   : > { %v5925_v10 = vadd.f32 %v5923_v43, %v5917_v8 }
 0x6b9   : > { %v5927_v34 = vmax.f32 %v5925_v10, 0.0 }
 0x6c2   : > { %v5908_v0 = vpop.f32.mrf.mxu1 }
 0x6c3   : > { %v5918_v50 = vmul.f32 %v5915_v14, %v5908_v0 }
 0x6c5   : > { %v5926_v45 = vadd.f32 %v5923_v43, %v5918_v50 }
 0x6c7   : > { %v5928_v12 = vmax.f32 %v5926_v45, 0.0 }
 0x6c9   : > { %v5931_v41 = vrot.slane %v5928_v12, 4 }
 0x6cb   : > { %v5932_v23 = vsel %vm5851_vm13, %v5927_v34, %v5931_v41 }
 0x6cc   : > { %5934 = vst [vmem:[%s379_s20] sm:$0xff] %v5932_v23 }
 0x6cd PF: > { %s20_s13 = sadd.s32 1, %s7008_s13  }
 0x6ce   : > { %p17_p4 = scmp.ge.s32.totalorder %s20_s13, 4  }
 0x6d0   :  { %19 = sbr.rel (!%p17_p4) target bundleno = 1 (0x1), region = 100 }

</bundles_post_ra>
